<compile_context>
chip_gen: v6e
topology: v6e:2x2x1
jax: 0.10.0
libtpu: 0.0.40
codegen_flags: <defaults>
</compile_context>

<pallas_src>
import jax
import jax.numpy as jnp
from jax import lax
from jax.experimental import pallas as pl
from jax.experimental.pallas import tpu as pltpu


# ----------------------------------------------------------------------------
# Fused Pallas kernel
# ----------------------------------------------------------------------------
def _bae_fused_kernel(
    tok_ref, emb_tab_ref, xi_ref,
    enc_fc5_w_ref, enc_fc5_b_ref,
    wih_cat_ref, bias_cat_ref,
    enc_whh_ref,
    enc_fc21_w_ref, enc_fc21_b_ref,
    dec_fc5_w_ref, dec_fc5_b_ref,
    dec_whh_ref,
    dec_fc4_w_ref, dec_fc4_b_ref,
    recon_ref, z_ref,
    gx_ref, hs_ref,
):
    f32, bf16 = jnp.float32, jnp.bfloat16
    TB = tok_ref.shape[0]
    B = z_ref.shape[0]
    T = TB // B
    Hp = enc_whh_ref.shape[0]          # lane-padded hidden size (multiple of 128)
    ntoken = emb_tab_ref.shape[0]

    def sigm(x):
        # sigmoid(x) == 0.5*tanh(0.5*x) + 0.5  -> single EUP op + free-slot VPU ops
        return 0.5 * jnp.tanh(0.5 * x) + 0.5

    # ---- Fused embedding gather: exact one-hot (0/1) selection on the MXU ----
    onehot = (tok_ref[...] ==
              lax.broadcasted_iota(jnp.int32, (TB, ntoken), 1)).astype(bf16)
    emb = jnp.dot(onehot, emb_tab_ref[...],
                  preferred_element_type=f32).astype(bf16)          # (TB, ninp)

    # ---- Hoisted input projections for BOTH LSTMs (single MXU pass) ----------
    # Columns [0, 4Hp) = encoder gates_x, [4Hp, 8Hp) = decoder gates_x.
    gx_ref[...] = (
        jnp.dot(emb, wih_cat_ref[...], preferred_element_type=f32) + bias_cat_ref[...]
    )

    def run_lstm(whh_ref, h0, gate_off, collect_hs):
        h = h0                                            # (B, Hp) f32
        c = jnp.zeros((B, Hp), f32)
        for t in range(T):                                # static full unroll (T small)
            g = gx_ref[t * B:(t + 1) * B, gate_off:gate_off + 4 * Hp] + jnp.dot(
                h.astype(bf16), whh_ref[...], preferred_element_type=f32
            )                                             # (B, 4Hp) f32
            # PyTorch gate order: i, f, g, o.  Each slice is a full 128-lane block.
            i_g = sigm(g[:, 0 * Hp:1 * Hp])
            f_g = sigm(g[:, 1 * Hp:2 * Hp])
            g_g = jnp.tanh(g[:, 2 * Hp:3 * Hp])
            o_g = sigm(g[:, 3 * Hp:4 * Hp])
            c = f_g * c + i_g * g_g
            h = o_g * jnp.tanh(c)
            if collect_hs:
                hs_ref[t * B:(t + 1) * B, :] = h          # lane-dense (B, Hp) store
        return h

    # ------------------------------ Encoder -----------------------------------
    h0_enc = (
        jnp.dot(xi_ref[...].astype(bf16), enc_fc5_w_ref[...],
                preferred_element_type=f32) + enc_fc5_b_ref[...]
    )
    enc_last = run_lstm(enc_whh_ref, h0_enc, 0, False)
    z = (
        jnp.dot(enc_last.astype(bf16), enc_fc21_w_ref[...],
                preferred_element_type=f32) + enc_fc21_b_ref[...]
    )
    z_ref[...] = z.astype(z_ref.dtype)                    # lane-dense (B, Zp) store

    # ------------------------------ Decoder -----------------------------------
    h0_dec = (
        jnp.dot(z.astype(bf16), dec_fc5_w_ref[...],
                preferred_element_type=f32) + dec_fc5_b_ref[...]
    )
    run_lstm(dec_whh_ref, h0_dec, 4 * Hp, True)
    recon_ref[...] = (
        jnp.dot(hs_ref[...].astype(bf16), dec_fc4_w_ref[...],
                preferred_element_type=f32) + dec_fc4_b_ref[...]
    ).astype(recon_ref.dtype)                             # lane-dense (TB, Np) store


# ----------------------------------------------------------------------------
# pallas_call wrapper
# ----------------------------------------------------------------------------
def _full_block(arr):
    nd = arr.ndim
    return pl.BlockSpec(arr.shape, lambda *_: (0,) * nd)


def bae_fused_forward(params, tokens_flat, xi_p):
    """tokens_flat: (T*B, 1) int32 (time-major rows); xi_p: (B, Zp) f32 (lane-padded).
    Returns (recon_p (T*B, Np) f32, z_p (B, Zp) f32) with lane-padded last dims."""
    TB = tokens_flat.shape[0]
    B, Zp = xi_p.shape
    Hp = params["enc_whh_t"].shape[0]
    Np = params["dec_fc4_w_t"].shape[1]

    args = (
        tokens_flat, params["embedding"], xi_p,
        params["enc_fc5_w_t"], params["enc_fc5_b"],
        params["wih_cat_t"], params["bias_cat"],
        params["enc_whh_t"],
        params["enc_fc21_w_t"], params["enc_fc21_b"],
        params["dec_fc5_w_t"], params["dec_fc5_b"],
        params["dec_whh_t"],
        params["dec_fc4_w_t"], params["dec_fc4_b"],
    )
    return pl.pallas_call(
        _bae_fused_kernel,
        out_shape=(
            jax.ShapeDtypeStruct((TB, Np), jnp.float32),
            jax.ShapeDtypeStruct((B, Zp), jnp.float32),
        ),
        grid_spec=pltpu.PrefetchScalarGridSpec(
            num_scalar_prefetch=0,
            grid=(1,),
            in_specs=[_full_block(a) for a in args],
            out_specs=(
                pl.BlockSpec((TB, Np), lambda i: (0, 0)),
                pl.BlockSpec((B, Zp), lambda i: (0, 0)),
            ),
            scratch_shapes=[
                pltpu.VMEM((TB, 8 * Hp), jnp.float32),   # enc+dec hoisted input gates
                pltpu.VMEM((TB, Hp), jnp.float32),       # decoder hidden states
            ],
        ),
        compiler_params=pltpu.CompilerParams(
            dimension_semantics=("arbitrary",),
        ),
    )(*args)


# ----------------------------------------------------------------------------
# Parameter initialization (mirrors the PyTorch module; fc biases are fill_(0)
# in the module's init_weights, so zero biases match exactly). Hidden / zdim /
# ntoken dims are zero-padded to lane-aligned Hp / Zp / Np; padding is exact.
# ----------------------------------------------------------------------------
def _round_up(x, m):
    return ((x + m - 1) // m) * m


def _pad2(w, rows, cols):
    return jnp.zeros((rows, cols), w.dtype).at[:w.shape[0], :w.shape[1]].set(w)


def _pad_gate_cols(w, H, Hp):
    """(K, 4H) -> (K, 4Hp); gate k's real columns land at [k*Hp, k*Hp + H)."""
    K = w.shape[0]
    out = jnp.zeros((K, 4 * Hp), w.dtype)
    for k in range(4):
        out = out.at[:, k * Hp:k * Hp + H].set(w[:, k * H:(k + 1) * H])
    return out


def init_params(key, ntoken, ninp, nhidden, zdim):
    H = nhidden
    Hp = _round_up(H, 128)
    Zp = _round_up(zdim, 128)
    Np = _round_up(ntoken, 128)
    ks = jax.random.split(key, 16)
    u = lambda k, shape, r: jax.random.uniform(k, shape, jnp.float32, -r, r)
    initrange = 0.1
    lstm_r = 1.0 / (float(H) ** 0.5)

    def lstm_params(k0, k1, k2, k3):
        # PyTorch layout: weight_ih (4H, in), weight_hh (4H, H); store transposed + padded.
        w_ih = u(k0, (4 * H, ninp), lstm_r)
        w_hh = u(k1, (4 * H, H), lstm_r)
        b = u(k2, (4 * H,), lstm_r) + u(k3, (4 * H,), lstm_r)            # b_ih + b_hh
        w_ih_t = _pad_gate_cols(w_ih.T, H, Hp)                            # (ninp, 4Hp) f32
        w_hh_t = _pad_gate_cols(
            jnp.zeros((Hp, 4 * H), jnp.float32).at[:H].set(w_hh.T), H, Hp
        ).astype(jnp.bfloat16)                                            # (Hp, 4Hp) bf16
        bias = _pad_gate_cols(b.reshape(1, 4 * H), H, Hp)                 # (1, 4Hp) f32
        return w_ih_t, w_hh_t, bias

    enc_wih_t, enc_whh_t, enc_bias = lstm_params(ks[1], ks[2], ks[3], ks[4])
    dec_wih_t, dec_whh_t, dec_bias = lstm_params(ks[7], ks[8], ks[9], ks[10])

    params = {
        "embedding": u(ks[0], (ntoken, ninp), initrange).astype(jnp.bfloat16),
        # Both LSTMs' input projections fused into one (ninp, 8Hp) weight.
        "wih_cat_t": jnp.concatenate([enc_wih_t, dec_wih_t], axis=1).astype(jnp.bfloat16),
        "bias_cat": jnp.concatenate([enc_bias, dec_bias], axis=1),                 # (1, 8Hp)
        "enc_whh_t": enc_whh_t,
        "dec_whh_t": dec_whh_t,
        # encoder linears (biases fill_(0) in the module)
        "enc_fc5_w_t": _pad2(u(ks[5], (H, zdim), initrange).T, Zp, Hp).astype(jnp.bfloat16),
        "enc_fc5_b": jnp.zeros((1, Hp), jnp.float32),
        "enc_fc21_w_t": _pad2(u(ks[6], (zdim, H), initrange).T, Hp, Zp).astype(jnp.bfloat16),
        "enc_fc21_b": jnp.zeros((1, Zp), jnp.float32),
        # decoder linears
        "dec_fc5_w_t": _pad2(u(ks[11], (H, zdim), initrange).T, Zp, Hp).astype(jnp.bfloat16),
        "dec_fc5_b": jnp.zeros((1, Hp), jnp.float32),
        "dec_fc4_w_t": _pad2(u(ks[12], (ntoken, H), initrange).T, Hp, Np).astype(jnp.bfloat16),
        "dec_fc4_b": jnp.zeros((1, Np), jnp.float32),
    }
    return params


# ----------------------------------------------------------------------------
# baeLSTM forward
# ----------------------------------------------------------------------------
@jax.jit
def bae_lstm_forward(params, tokens, xi):
    """tokens: (T, B) int32; xi: (B, zdim) f32.
    Returns (recon_batch (T*B, ntoken), z (B, zdim), xi (B, zdim))."""
    # TODO(synk): dropout layers (embed / self.drop) are identity -- eval-mode forward only.
    T, B = tokens.shape
    zdim = xi.shape[1]
    ntoken = params["embedding"].shape[0]
    Zp = params["enc_fc21_b"].shape[1]

    tokens_flat = tokens.reshape(T * B, 1)                       # time-major, matches view(-1, ntoken)
    xi_p = jnp.pad(xi, ((0, 0), (0, Zp - zdim)))                 # lane-pad zdim (exact: zero pad)
    recon_p, z_p = bae_fused_forward(params, tokens_flat, xi_p)
    return recon_p[:, :ntoken], z_p[:, :zdim], xi


# ----------------------------------------------------------------------------
if __name__ == "__main__":
    # Small shapes consistent with the module's forward.
    ntoken, ninp, nhidden, zdim = 64, 16, 32, 8
    seq_len, bsz = 8, 8

    key = jax.random.PRNGKey(0)
    k_params, k_tokens, k_xi = jax.random.split(key, 3)

    params = init_params(k_params, ntoken, ninp, nhidden, zdim)
    tokens = jax.random.randint(k_tokens, (seq_len, bsz), 0, ntoken, dtype=jnp.int32)
    # xi = torch.randn(bsz, zdim) in the encoder -- drawn deterministically here.
    xi = jax.random.normal(k_xi, (bsz, zdim), dtype=jnp.float32)

    recon_batch, z, xi_out = bae_lstm_forward(params, tokens, xi)
    jax.block_until_ready((recon_batch, z, xi_out))

    assert recon_batch.shape == (seq_len * bsz, ntoken)
    assert z.shape == (bsz, zdim)
    assert xi_out.shape == (bsz, zdim)
    assert bool(jnp.all(jnp.isfinite(recon_batch))) and bool(jnp.all(jnp.isfinite(z)))
    print("KERNEL_OK")
</pallas_src>

<mosaic_0001>
module attributes {stable_mosaic.version = 11 : i64} {
  func.func @_bae_fused_kernel(%arg0: i32, %arg1: memref<64x1xi32, #tpu.memory_space<vmem>>, %arg2: memref<64x16xbf16, #tpu.memory_space<vmem>>, %arg3: memref<8x128xf32, #tpu.memory_space<vmem>>, %arg4: memref<128x128xbf16, #tpu.memory_space<vmem>>, %arg5: memref<1x128xf32, #tpu.memory_space<vmem>>, %arg6: memref<16x1024xbf16, #tpu.memory_space<vmem>>, %arg7: memref<1x1024xf32, #tpu.memory_space<vmem>>, %arg8: memref<128x512xbf16, #tpu.memory_space<vmem>>, %arg9: memref<128x128xbf16, #tpu.memory_space<vmem>>, %arg10: memref<1x128xf32, #tpu.memory_space<vmem>>, %arg11: memref<128x128xbf16, #tpu.memory_space<vmem>>, %arg12: memref<1x128xf32, #tpu.memory_space<vmem>>, %arg13: memref<128x512xbf16, #tpu.memory_space<vmem>>, %arg14: memref<128x128xbf16, #tpu.memory_space<vmem>>, %arg15: memref<1x128xf32, #tpu.memory_space<vmem>>, %arg16: memref<64x128xf32, #tpu.memory_space<vmem>>, %arg17: memref<8x128xf32, #tpu.memory_space<vmem>>, %arg18: memref<64x1024xf32, #tpu.memory_space<vmem>>, %arg19: memref<64x128xf32, #tpu.memory_space<vmem>>) attributes {dimension_semantics = [#tpu.dimension_semantics<arbitrary>], iteration_bounds = array<i64: 1>, scalar_prefetch = 0 : i64, scratch_operands = 2 : i64, tpu.core_type = #tpu.core_type<tc>, window_params = [{pipeline_mode = #tpu.pipeline_mode<synchronous>, transform_indices = @transform_0, window_bounds = array<i64: 64, 1>}, {pipeline_mode = #tpu.pipeline_mode<synchronous>, transform_indices = @transform_1, window_bounds = array<i64: 64, 16>}, {pipeline_mode = #tpu.pipeline_mode<synchronous>, transform_indices = @transform_2, window_bounds = array<i64: 8, 128>}, {pipeline_mode = #tpu.pipeline_mode<synchronous>, transform_indices = @transform_3, window_bounds = array<i64: 128, 128>}, {pipeline_mode = #tpu.pipeline_mode<synchronous>, transform_indices = @transform_4, window_bounds = array<i64: 1, 128>}, {pipeline_mode = #tpu.pipeline_mode<synchronous>, transform_indices = @transform_5, window_bounds = array<i64: 16, 1024>}, {pipeline_mode = #tpu.pipeline_mode<synchronous>, transform_indices = @transform_6, window_bounds = array<i64: 1, 1024>}, {pipeline_mode = #tpu.pipeline_mode<synchronous>, transform_indices = @transform_7, window_bounds = array<i64: 128, 512>}, {pipeline_mode = #tpu.pipeline_mode<synchronous>, transform_indices = @transform_8, window_bounds = array<i64: 128, 128>}, {pipeline_mode = #tpu.pipeline_mode<synchronous>, transform_indices = @transform_9, window_bounds = array<i64: 1, 128>}, {pipeline_mode = #tpu.pipeline_mode<synchronous>, transform_indices = @transform_10, window_bounds = array<i64: 128, 128>}, {pipeline_mode = #tpu.pipeline_mode<synchronous>, transform_indices = @transform_11, window_bounds = array<i64: 1, 128>}, {pipeline_mode = #tpu.pipeline_mode<synchronous>, transform_indices = @transform_12, window_bounds = array<i64: 128, 512>}, {pipeline_mode = #tpu.pipeline_mode<synchronous>, transform_indices = @transform_13, window_bounds = array<i64: 128, 128>}, {pipeline_mode = #tpu.pipeline_mode<synchronous>, transform_indices = @transform_14, window_bounds = array<i64: 1, 128>}, {pipeline_mode = #tpu.pipeline_mode<synchronous>, transform_indices = @transform_15, window_bounds = array<i64: 64, 128>}, {pipeline_mode = #tpu.pipeline_mode<synchronous>, transform_indices = @transform_16, window_bounds = array<i64: 8, 128>}]} {
    %c0 = arith.constant 0 : index
    %c0_0 = arith.constant 0 : index
    %0 = vector.load %arg1[%c0, %c0_0] : memref<64x1xi32, #tpu.memory_space<vmem>>, vector<64x1xi32>
    %1 = tpu.iota {dimensions = array<i32: 1>} : vector<64x64xi32>
    %2 = vector.broadcast %0 : vector<64x1xi32> to vector<64x64xi32>
    %3 = arith.cmpi eq, %2, %1 : vector<64x64xi32>
    %4 = arith.extui %3 : vector<64x64xi1> to vector<64x64xi32>
    %5 = arith.sitofp %4 : vector<64x64xi32> to vector<64x64xf32>
    %6 = arith.truncf %5 : vector<64x64xf32> to vector<64x64xbf16>
    %c0_1 = arith.constant 0 : index
    %c0_2 = arith.constant 0 : index
    %7 = vector.load %arg2[%c0_1, %c0_2] : memref<64x16xbf16, #tpu.memory_space<vmem>>, vector<64x16xbf16>
    %cst = arith.constant dense<0.000000e+00> : vector<64x16xf32>
    %8 = tpu.matmul %6, %7, %cst {dimension_numbers = #tpu.dot_dimension_numbers<[1], [0], [0], [1], [0, 0, 1, 1], [], []>} : vector<64x64xbf16>, vector<64x16xbf16>, vector<64x16xf32> -> vector<64x16xf32>
    %9 = arith.truncf %8 : vector<64x16xf32> to vector<64x16xbf16>
    %c0_3 = arith.constant 0 : index
    %c0_4 = arith.constant 0 : index
    %10 = vector.load %arg6[%c0_3, %c0_4] : memref<16x1024xbf16, #tpu.memory_space<vmem>>, vector<16x1024xbf16>
    %cst_5 = arith.constant dense<0.000000e+00> : vector<64x1024xf32>
    %11 = tpu.matmul %9, %10, %cst_5 {dimension_numbers = #tpu.dot_dimension_numbers<[1], [0], [0], [1], [0, 0, 1, 1], [], []>} : vector<64x16xbf16>, vector<16x1024xbf16>, vector<64x1024xf32> -> vector<64x1024xf32>
    %c0_6 = arith.constant 0 : index
    %c0_7 = arith.constant 0 : index
    %12 = vector.load %arg7[%c0_6, %c0_7] : memref<1x1024xf32, #tpu.memory_space<vmem>>, vector<1x1024xf32>
    %13 = vector.broadcast %12 : vector<1x1024xf32> to vector<64x1024xf32>
    %14 = arith.addf %11, %13 : vector<64x1024xf32>
    %c0_8 = arith.constant 0 : index
    %c0_9 = arith.constant 0 : index
    %15 = vector.load %arg18[%c0_8, %c0_9] : memref<64x1024xf32, #tpu.memory_space<vmem>>, vector<64x1024xf32>
    tpu.vector_store %arg18[%c0_8, %c0_9], %14 {strides = array<i32>} : memref<64x1024xf32, #tpu.memory_space<vmem>>, vector<64x1024xf32>,
    %c0_10 = arith.constant 0 : index
    %c0_11 = arith.constant 0 : index
    %16 = vector.load %arg3[%c0_10, %c0_11] : memref<8x128xf32, #tpu.memory_space<vmem>>, vector<8x128xf32>
    %17 = arith.truncf %16 : vector<8x128xf32> to vector<8x128xbf16>
    %c0_12 = arith.constant 0 : index
    %c0_13 = arith.constant 0 : index
    %18 = vector.load %arg4[%c0_12, %c0_13] : memref<128x128xbf16, #tpu.memory_space<vmem>>, vector<128x128xbf16>
    %cst_14 = arith.constant dense<0.000000e+00> : vector<8x128xf32>
    %19 = tpu.matmul %17, %18, %cst_14 {dimension_numbers = #tpu.dot_dimension_numbers<[1], [0], [0], [1], [0, 0, 1, 1], [], []>} : vector<8x128xbf16>, vector<128x128xbf16>, vector<8x128xf32> -> vector<8x128xf32>
    %c0_15 = arith.constant 0 : index
    %c0_16 = arith.constant 0 : index
    %20 = vector.load %arg5[%c0_15, %c0_16] : memref<1x128xf32, #tpu.memory_space<vmem>>, vector<1x128xf32>
    %21 = vector.broadcast %20 : vector<1x128xf32> to vector<8x128xf32>
    %22 = arith.addf %19, %21 : vector<8x128xf32>
    %cst_17 = arith.constant 0.000000e+00 : f32
    %23 = vector.broadcast %cst_17 : f32 to vector<8x128xf32>
    %c0_18 = arith.constant 0 : index
    %c0_19 = arith.constant 0 : index
    %24 = vector.load %arg18[%c0_18, %c0_19] : memref<64x1024xf32, #tpu.memory_space<vmem>>, vector<8x512xf32>
    %25 = arith.truncf %22 : vector<8x128xf32> to vector<8x128xbf16>
    %c0_20 = arith.constant 0 : index
    %c0_21 = arith.constant 0 : index
    %26 = vector.load %arg8[%c0_20, %c0_21] : memref<128x512xbf16, #tpu.memory_space<vmem>>, vector<128x512xbf16>
    %cst_22 = arith.constant dense<0.000000e+00> : vector<8x512xf32>
    %27 = tpu.matmul %25, %26, %cst_22 {dimension_numbers = #tpu.dot_dimension_numbers<[1], [0], [0], [1], [0, 0, 1, 1], [], []>} : vector<8x128xbf16>, vector<128x512xbf16>, vector<8x512xf32> -> vector<8x512xf32>
    %28 = arith.addf %24, %27 : vector<8x512xf32>
    %29 = vector.extract_strided_slice %28 {offsets = [0, 0], sizes = [8, 128], strides = [1, 1]} : vector<8x512xf32> to vector<8x128xf32>
    %cst_23 = arith.constant 5.000000e-01 : f32
    %30 = vector.broadcast %cst_23 : f32 to vector<8x128xf32>
    %31 = arith.mulf %30, %29 : vector<8x128xf32>
    %32 = math.tanh %31 : vector<8x128xf32>
    %cst_24 = arith.constant 5.000000e-01 : f32
    %33 = vector.broadcast %cst_24 : f32 to vector<8x128xf32>
    %34 = arith.mulf %33, %32 : vector<8x128xf32>
    %cst_25 = arith.constant 5.000000e-01 : f32
    %35 = vector.broadcast %cst_25 : f32 to vector<8x128xf32>
    %36 = arith.addf %34, %35 : vector<8x128xf32>
    %37 = vector.extract_strided_slice %28 {offsets = [0, 128], sizes = [8, 128], strides = [1, 1]} : vector<8x512xf32> to vector<8x128xf32>
    %cst_26 = arith.constant 5.000000e-01 : f32
    %38 = vector.broadcast %cst_26 : f32 to vector<8x128xf32>
    %39 = arith.mulf %38, %37 : vector<8x128xf32>
    %40 = math.tanh %39 : vector<8x128xf32>
    %cst_27 = arith.constant 5.000000e-01 : f32
    %41 = vector.broadcast %cst_27 : f32 to vector<8x128xf32>
    %42 = arith.mulf %41, %40 : vector<8x128xf32>
    %cst_28 = arith.constant 5.000000e-01 : f32
    %43 = vector.broadcast %cst_28 : f32 to vector<8x128xf32>
    %44 = arith.addf %42, %43 : vector<8x128xf32>
    %45 = vector.extract_strided_slice %28 {offsets = [0, 256], sizes = [8, 128], strides = [1, 1]} : vector<8x512xf32> to vector<8x128xf32>
    %46 = math.tanh %45 : vector<8x128xf32>
    %47 = vector.extract_strided_slice %28 {offsets = [0, 384], sizes = [8, 128], strides = [1, 1]} : vector<8x512xf32> to vector<8x128xf32>
    %cst_29 = arith.constant 5.000000e-01 : f32
    %48 = vector.broadcast %cst_29 : f32 to vector<8x128xf32>
    %49 = arith.mulf %48, %47 : vector<8x128xf32>
    %50 = math.tanh %49 : vector<8x128xf32>
    %cst_30 = arith.constant 5.000000e-01 : f32
    %51 = vector.broadcast %cst_30 : f32 to vector<8x128xf32>
    %52 = arith.mulf %51, %50 : vector<8x128xf32>
    %cst_31 = arith.constant 5.000000e-01 : f32
    %53 = vector.broadcast %cst_31 : f32 to vector<8x128xf32>
    %54 = arith.addf %52, %53 : vector<8x128xf32>
    %55 = arith.mulf %44, %23 : vector<8x128xf32>
    %56 = arith.mulf %36, %46 : vector<8x128xf32>
    %57 = arith.addf %55, %56 : vector<8x128xf32>
    %58 = math.tanh %57 : vector<8x128xf32>
    %59 = arith.mulf %54, %58 : vector<8x128xf32>
    %c8 = arith.constant 8 : index
    %c0_32 = arith.constant 0 : index
    %60 = vector.load %arg18[%c8, %c0_32] : memref<64x1024xf32, #tpu.memory_space<vmem>>, vector<8x512xf32>
    %61 = arith.truncf %59 : vector<8x128xf32> to vector<8x128xbf16>
    %c0_33 = arith.constant 0 : index
    %c0_34 = arith.constant 0 : index
    %62 = vector.load %arg8[%c0_33, %c0_34] : memref<128x512xbf16, #tpu.memory_space<vmem>>, vector<128x512xbf16>
    %cst_35 = arith.constant dense<0.000000e+00> : vector<8x512xf32>
    %63 = tpu.matmul %61, %62, %cst_35 {dimension_numbers = #tpu.dot_dimension_numbers<[1], [0], [0], [1], [0, 0, 1, 1], [], []>} : vector<8x128xbf16>, vector<128x512xbf16>, vector<8x512xf32> -> vector<8x512xf32>
    %64 = arith.addf %60, %63 : vector<8x512xf32>
    %65 = vector.extract_strided_slice %64 {offsets = [0, 0], sizes = [8, 128], strides = [1, 1]} : vector<8x512xf32> to vector<8x128xf32>
    %cst_36 = arith.constant 5.000000e-01 : f32
    %66 = vector.broadcast %cst_36 : f32 to vector<8x128xf32>
    %67 = arith.mulf %66, %65 : vector<8x128xf32>
    %68 = math.tanh %67 : vector<8x128xf32>
    %cst_37 = arith.constant 5.000000e-01 : f32
    %69 = vector.broadcast %cst_37 : f32 to vector<8x128xf32>
    %70 = arith.mulf %69, %68 : vector<8x128xf32>
    %cst_38 = arith.constant 5.000000e-01 : f32
    %71 = vector.broadcast %cst_38 : f32 to vector<8x128xf32>
    %72 = arith.addf %70, %71 : vector<8x128xf32>
    %73 = vector.extract_strided_slice %64 {offsets = [0, 128], sizes = [8, 128], strides = [1, 1]} : vector<8x512xf32> to vector<8x128xf32>
    %cst_39 = arith.constant 5.000000e-01 : f32
    %74 = vector.broadcast %cst_39 : f32 to vector<8x128xf32>
    %75 = arith.mulf %74, %73 : vector<8x128xf32>
    %76 = math.tanh %75 : vector<8x128xf32>
    %cst_40 = arith.constant 5.000000e-01 : f32
    %77 = vector.broadcast %cst_40 : f32 to vector<8x128xf32>
    %78 = arith.mulf %77, %76 : vector<8x128xf32>
    %cst_41 = arith.constant 5.000000e-01 : f32
    %79 = vector.broadcast %cst_41 : f32 to vector<8x128xf32>
    %80 = arith.addf %78, %79 : vector<8x128xf32>
    %81 = vector.extract_strided_slice %64 {offsets = [0, 256], sizes = [8, 128], strides = [1, 1]} : vector<8x512xf32> to vector<8x128xf32>
    %82 = math.tanh %81 : vector<8x128xf32>
    %83 = vector.extract_strided_slice %64 {offsets = [0, 384], sizes = [8, 128], strides = [1, 1]} : vector<8x512xf32> to vector<8x128xf32>
    %cst_42 = arith.constant 5.000000e-01 : f32
    %84 = vector.broadcast %cst_42 : f32 to vector<8x128xf32>
    %85 = arith.mulf %84, %83 : vector<8x128xf32>
    %86 = math.tanh %85 : vector<8x128xf32>
    %cst_43 = arith.constant 5.000000e-01 : f32
    %87 = vector.broadcast %cst_43 : f32 to vector<8x128xf32>
    %88 = arith.mulf %87, %86 : vector<8x128xf32>
    %cst_44 = arith.constant 5.000000e-01 : f32
    %89 = vector.broadcast %cst_44 : f32 to vector<8x128xf32>
    %90 = arith.addf %88, %89 : vector<8x128xf32>
    %91 = arith.mulf %80, %57 : vector<8x128xf32>
    %92 = arith.mulf %72, %82 : vector<8x128xf32>
    %93 = arith.addf %91, %92 : vector<8x128xf32>
    %94 = math.tanh %93 : vector<8x128xf32>
    %95 = arith.mulf %90, %94 : vector<8x128xf32>
    %c16 = arith.constant 16 : index
    %c0_45 = arith.constant 0 : index
    %96 = vector.load %arg18[%c16, %c0_45] : memref<64x1024xf32, #tpu.memory_space<vmem>>, vector<8x512xf32>
    %97 = arith.truncf %95 : vector<8x128xf32> to vector<8x128xbf16>
    %c0_46 = arith.constant 0 : index
    %c0_47 = arith.constant 0 : index
    %98 = vector.load %arg8[%c0_46, %c0_47] : memref<128x512xbf16, #tpu.memory_space<vmem>>, vector<128x512xbf16>
    %cst_48 = arith.constant dense<0.000000e+00> : vector<8x512xf32>
    %99 = tpu.matmul %97, %98, %cst_48 {dimension_numbers = #tpu.dot_dimension_numbers<[1], [0], [0], [1], [0, 0, 1, 1], [], []>} : vector<8x128xbf16>, vector<128x512xbf16>, vector<8x512xf32> -> vector<8x512xf32>
    %100 = arith.addf %96, %99 : vector<8x512xf32>
    %101 = vector.extract_strided_slice %100 {offsets = [0, 0], sizes = [8, 128], strides = [1, 1]} : vector<8x512xf32> to vector<8x128xf32>
    %cst_49 = arith.constant 5.000000e-01 : f32
    %102 = vector.broadcast %cst_49 : f32 to vector<8x128xf32>
    %103 = arith.mulf %102, %101 : vector<8x128xf32>
    %104 = math.tanh %103 : vector<8x128xf32>
    %cst_50 = arith.constant 5.000000e-01 : f32
    %105 = vector.broadcast %cst_50 : f32 to vector<8x128xf32>
    %106 = arith.mulf %105, %104 : vector<8x128xf32>
    %cst_51 = arith.constant 5.000000e-01 : f32
    %107 = vector.broadcast %cst_51 : f32 to vector<8x128xf32>
    %108 = arith.addf %106, %107 : vector<8x128xf32>
    %109 = vector.extract_strided_slice %100 {offsets = [0, 128], sizes = [8, 128], strides = [1, 1]} : vector<8x512xf32> to vector<8x128xf32>
    %cst_52 = arith.constant 5.000000e-01 : f32
    %110 = vector.broadcast %cst_52 : f32 to vector<8x128xf32>
    %111 = arith.mulf %110, %109 : vector<8x128xf32>
    %112 = math.tanh %111 : vector<8x128xf32>
    %cst_53 = arith.constant 5.000000e-01 : f32
    %113 = vector.broadcast %cst_53 : f32 to vector<8x128xf32>
    %114 = arith.mulf %113, %112 : vector<8x128xf32>
    %cst_54 = arith.constant 5.000000e-01 : f32
    %115 = vector.broadcast %cst_54 : f32 to vector<8x128xf32>
    %116 = arith.addf %114, %115 : vector<8x128xf32>
    %117 = vector.extract_strided_slice %100 {offsets = [0, 256], sizes = [8, 128], strides = [1, 1]} : vector<8x512xf32> to vector<8x128xf32>
    %118 = math.tanh %117 : vector<8x128xf32>
    %119 = vector.extract_strided_slice %100 {offsets = [0, 384], sizes = [8, 128], strides = [1, 1]} : vector<8x512xf32> to vector<8x128xf32>
    %cst_55 = arith.constant 5.000000e-01 : f32
    %120 = vector.broadcast %cst_55 : f32 to vector<8x128xf32>
    %121 = arith.mulf %120, %119 : vector<8x128xf32>
    %122 = math.tanh %121 : vector<8x128xf32>
    %cst_56 = arith.constant 5.000000e-01 : f32
    %123 = vector.broadcast %cst_56 : f32 to vector<8x128xf32>
    %124 = arith.mulf %123, %122 : vector<8x128xf32>
    %cst_57 = arith.constant 5.000000e-01 : f32
    %125 = vector.broadcast %cst_57 : f32 to vector<8x128xf32>
    %126 = arith.addf %124, %125 : vector<8x128xf32>
    %127 = arith.mulf %116, %93 : vector<8x128xf32>
    %128 = arith.mulf %108, %118 : vector<8x128xf32>
    %129 = arith.addf %127, %128 : vector<8x128xf32>
    %130 = math.tanh %129 : vector<8x128xf32>
    %131 = arith.mulf %126, %130 : vector<8x128xf32>
    %c24 = arith.constant 24 : index
    %c0_58 = arith.constant 0 : index
    %132 = vector.load %arg18[%c24, %c0_58] : memref<64x1024xf32, #tpu.memory_space<vmem>>, vector<8x512xf32>
    %133 = arith.truncf %131 : vector<8x128xf32> to vector<8x128xbf16>
    %c0_59 = arith.constant 0 : index
    %c0_60 = arith.constant 0 : index
    %134 = vector.load %arg8[%c0_59, %c0_60] : memref<128x512xbf16, #tpu.memory_space<vmem>>, vector<128x512xbf16>
    %cst_61 = arith.constant dense<0.000000e+00> : vector<8x512xf32>
    %135 = tpu.matmul %133, %134, %cst_61 {dimension_numbers = #tpu.dot_dimension_numbers<[1], [0], [0], [1], [0, 0, 1, 1], [], []>} : vector<8x128xbf16>, vector<128x512xbf16>, vector<8x512xf32> -> vector<8x512xf32>
    %136 = arith.addf %132, %135 : vector<8x512xf32>
    %137 = vector.extract_strided_slice %136 {offsets = [0, 0], sizes = [8, 128], strides = [1, 1]} : vector<8x512xf32> to vector<8x128xf32>
    %cst_62 = arith.constant 5.000000e-01 : f32
    %138 = vector.broadcast %cst_62 : f32 to vector<8x128xf32>
    %139 = arith.mulf %138, %137 : vector<8x128xf32>
    %140 = math.tanh %139 : vector<8x128xf32>
    %cst_63 = arith.constant 5.000000e-01 : f32
    %141 = vector.broadcast %cst_63 : f32 to vector<8x128xf32>
    %142 = arith.mulf %141, %140 : vector<8x128xf32>
    %cst_64 = arith.constant 5.000000e-01 : f32
    %143 = vector.broadcast %cst_64 : f32 to vector<8x128xf32>
    %144 = arith.addf %142, %143 : vector<8x128xf32>
    %145 = vector.extract_strided_slice %136 {offsets = [0, 128], sizes = [8, 128], strides = [1, 1]} : vector<8x512xf32> to vector<8x128xf32>
    %cst_65 = arith.constant 5.000000e-01 : f32
    %146 = vector.broadcast %cst_65 : f32 to vector<8x128xf32>
    %147 = arith.mulf %146, %145 : vector<8x128xf32>
    %148 = math.tanh %147 : vector<8x128xf32>
    %cst_66 = arith.constant 5.000000e-01 : f32
    %149 = vector.broadcast %cst_66 : f32 to vector<8x128xf32>
    %150 = arith.mulf %149, %148 : vector<8x128xf32>
    %cst_67 = arith.constant 5.000000e-01 : f32
    %151 = vector.broadcast %cst_67 : f32 to vector<8x128xf32>
    %152 = arith.addf %150, %151 : vector<8x128xf32>
    %153 = vector.extract_strided_slice %136 {offsets = [0, 256], sizes = [8, 128], strides = [1, 1]} : vector<8x512xf32> to vector<8x128xf32>
    %154 = math.tanh %153 : vector<8x128xf32>
    %155 = vector.extract_strided_slice %136 {offsets = [0, 384], sizes = [8, 128], strides = [1, 1]} : vector<8x512xf32> to vector<8x128xf32>
    %cst_68 = arith.constant 5.000000e-01 : f32
    %156 = vector.broadcast %cst_68 : f32 to vector<8x128xf32>
    %157 = arith.mulf %156, %155 : vector<8x128xf32>
    %158 = math.tanh %157 : vector<8x128xf32>
    %cst_69 = arith.constant 5.000000e-01 : f32
    %159 = vector.broadcast %cst_69 : f32 to vector<8x128xf32>
    %160 = arith.mulf %159, %158 : vector<8x128xf32>
    %cst_70 = arith.constant 5.000000e-01 : f32
    %161 = vector.broadcast %cst_70 : f32 to vector<8x128xf32>
    %162 = arith.addf %160, %161 : vector<8x128xf32>
    %163 = arith.mulf %152, %129 : vector<8x128xf32>
    %164 = arith.mulf %144, %154 : vector<8x128xf32>
    %165 = arith.addf %163, %164 : vector<8x128xf32>
    %166 = math.tanh %165 : vector<8x128xf32>
    %167 = arith.mulf %162, %166 : vector<8x128xf32>
    %c32 = arith.constant 32 : index
    %c0_71 = arith.constant 0 : index
    %168 = vector.load %arg18[%c32, %c0_71] : memref<64x1024xf32, #tpu.memory_space<vmem>>, vector<8x512xf32>
    %169 = arith.truncf %167 : vector<8x128xf32> to vector<8x128xbf16>
    %c0_72 = arith.constant 0 : index
    %c0_73 = arith.constant 0 : index
    %170 = vector.load %arg8[%c0_72, %c0_73] : memref<128x512xbf16, #tpu.memory_space<vmem>>, vector<128x512xbf16>
    %cst_74 = arith.constant dense<0.000000e+00> : vector<8x512xf32>
    %171 = tpu.matmul %169, %170, %cst_74 {dimension_numbers = #tpu.dot_dimension_numbers<[1], [0], [0], [1], [0, 0, 1, 1], [], []>} : vector<8x128xbf16>, vector<128x512xbf16>, vector<8x512xf32> -> vector<8x512xf32>
    %172 = arith.addf %168, %171 : vector<8x512xf32>
    %173 = vector.extract_strided_slice %172 {offsets = [0, 0], sizes = [8, 128], strides = [1, 1]} : vector<8x512xf32> to vector<8x128xf32>
    %cst_75 = arith.constant 5.000000e-01 : f32
    %174 = vector.broadcast %cst_75 : f32 to vector<8x128xf32>
    %175 = arith.mulf %174, %173 : vector<8x128xf32>
    %176 = math.tanh %175 : vector<8x128xf32>
    %cst_76 = arith.constant 5.000000e-01 : f32
    %177 = vector.broadcast %cst_76 : f32 to vector<8x128xf32>
    %178 = arith.mulf %177, %176 : vector<8x128xf32>
    %cst_77 = arith.constant 5.000000e-01 : f32
    %179 = vector.broadcast %cst_77 : f32 to vector<8x128xf32>
    %180 = arith.addf %178, %179 : vector<8x128xf32>
    %181 = vector.extract_strided_slice %172 {offsets = [0, 128], sizes = [8, 128], strides = [1, 1]} : vector<8x512xf32> to vector<8x128xf32>
    %cst_78 = arith.constant 5.000000e-01 : f32
    %182 = vector.broadcast %cst_78 : f32 to vector<8x128xf32>
    %183 = arith.mulf %182, %181 : vector<8x128xf32>
    %184 = math.tanh %183 : vector<8x128xf32>
    %cst_79 = arith.constant 5.000000e-01 : f32
    %185 = vector.broadcast %cst_79 : f32 to vector<8x128xf32>
    %186 = arith.mulf %185, %184 : vector<8x128xf32>
    %cst_80 = arith.constant 5.000000e-01 : f32
    %187 = vector.broadcast %cst_80 : f32 to vector<8x128xf32>
    %188 = arith.addf %186, %187 : vector<8x128xf32>
    %189 = vector.extract_strided_slice %172 {offsets = [0, 256], sizes = [8, 128], strides = [1, 1]} : vector<8x512xf32> to vector<8x128xf32>
    %190 = math.tanh %189 : vector<8x128xf32>
    %191 = vector.extract_strided_slice %172 {offsets = [0, 384], sizes = [8, 128], strides = [1, 1]} : vector<8x512xf32> to vector<8x128xf32>
    %cst_81 = arith.constant 5.000000e-01 : f32
    %192 = vector.broadcast %cst_81 : f32 to vector<8x128xf32>
    %193 = arith.mulf %192, %191 : vector<8x128xf32>
    %194 = math.tanh %193 : vector<8x128xf32>
    %cst_82 = arith.constant 5.000000e-01 : f32
    %195 = vector.broadcast %cst_82 : f32 to vector<8x128xf32>
    %196 = arith.mulf %195, %194 : vector<8x128xf32>
    %cst_83 = arith.constant 5.000000e-01 : f32
    %197 = vector.broadcast %cst_83 : f32 to vector<8x128xf32>
    %198 = arith.addf %196, %197 : vector<8x128xf32>
    %199 = arith.mulf %188, %165 : vector<8x128xf32>
    %200 = arith.mulf %180, %190 : vector<8x128xf32>
    %201 = arith.addf %199, %200 : vector<8x128xf32>
    %202 = math.tanh %201 : vector<8x128xf32>
    %203 = arith.mulf %198, %202 : vector<8x128xf32>
    %c40 = arith.constant 40 : index
    %c0_84 = arith.constant 0 : index
    %204 = vector.load %arg18[%c40, %c0_84] : memref<64x1024xf32, #tpu.memory_space<vmem>>, vector<8x512xf32>
    %205 = arith.truncf %203 : vector<8x128xf32> to vector<8x128xbf16>
    %c0_85 = arith.constant 0 : index
    %c0_86 = arith.constant 0 : index
    %206 = vector.load %arg8[%c0_85, %c0_86] : memref<128x512xbf16, #tpu.memory_space<vmem>>, vector<128x512xbf16>
    %cst_87 = arith.constant dense<0.000000e+00> : vector<8x512xf32>
    %207 = tpu.matmul %205, %206, %cst_87 {dimension_numbers = #tpu.dot_dimension_numbers<[1], [0], [0], [1], [0, 0, 1, 1], [], []>} : vector<8x128xbf16>, vector<128x512xbf16>, vector<8x512xf32> -> vector<8x512xf32>
    %208 = arith.addf %204, %207 : vector<8x512xf32>
    %209 = vector.extract_strided_slice %208 {offsets = [0, 0], sizes = [8, 128], strides = [1, 1]} : vector<8x512xf32> to vector<8x128xf32>
    %cst_88 = arith.constant 5.000000e-01 : f32
    %210 = vector.broadcast %cst_88 : f32 to vector<8x128xf32>
    %211 = arith.mulf %210, %209 : vector<8x128xf32>
    %212 = math.tanh %211 : vector<8x128xf32>
    %cst_89 = arith.constant 5.000000e-01 : f32
    %213 = vector.broadcast %cst_89 : f32 to vector<8x128xf32>
    %214 = arith.mulf %213, %212 : vector<8x128xf32>
    %cst_90 = arith.constant 5.000000e-01 : f32
    %215 = vector.broadcast %cst_90 : f32 to vector<8x128xf32>
    %216 = arith.addf %214, %215 : vector<8x128xf32>
    %217 = vector.extract_strided_slice %208 {offsets = [0, 128], sizes = [8, 128], strides = [1, 1]} : vector<8x512xf32> to vector<8x128xf32>
    %cst_91 = arith.constant 5.000000e-01 : f32
    %218 = vector.broadcast %cst_91 : f32 to vector<8x128xf32>
    %219 = arith.mulf %218, %217 : vector<8x128xf32>
    %220 = math.tanh %219 : vector<8x128xf32>
    %cst_92 = arith.constant 5.000000e-01 : f32
    %221 = vector.broadcast %cst_92 : f32 to vector<8x128xf32>
    %222 = arith.mulf %221, %220 : vector<8x128xf32>
    %cst_93 = arith.constant 5.000000e-01 : f32
    %223 = vector.broadcast %cst_93 : f32 to vector<8x128xf32>
    %224 = arith.addf %222, %223 : vector<8x128xf32>
    %225 = vector.extract_strided_slice %208 {offsets = [0, 256], sizes = [8, 128], strides = [1, 1]} : vector<8x512xf32> to vector<8x128xf32>
    %226 = math.tanh %225 : vector<8x128xf32>
    %227 = vector.extract_strided_slice %208 {offsets = [0, 384], sizes = [8, 128], strides = [1, 1]} : vector<8x512xf32> to vector<8x128xf32>
    %cst_94 = arith.constant 5.000000e-01 : f32
    %228 = vector.broadcast %cst_94 : f32 to vector<8x128xf32>
    %229 = arith.mulf %228, %227 : vector<8x128xf32>
    %230 = math.tanh %229 : vector<8x128xf32>
    %cst_95 = arith.constant 5.000000e-01 : f32
    %231 = vector.broadcast %cst_95 : f32 to vector<8x128xf32>
    %232 = arith.mulf %231, %230 : vector<8x128xf32>
    %cst_96 = arith.constant 5.000000e-01 : f32
    %233 = vector.broadcast %cst_96 : f32 to vector<8x128xf32>
    %234 = arith.addf %232, %233 : vector<8x128xf32>
    %235 = arith.mulf %224, %201 : vector<8x128xf32>
    %236 = arith.mulf %216, %226 : vector<8x128xf32>
    %237 = arith.addf %235, %236 : vector<8x128xf32>
    %238 = math.tanh %237 : vector<8x128xf32>
    %239 = arith.mulf %234, %238 : vector<8x128xf32>
    %c48 = arith.constant 48 : index
    %c0_97 = arith.constant 0 : index
    %240 = vector.load %arg18[%c48, %c0_97] : memref<64x1024xf32, #tpu.memory_space<vmem>>, vector<8x512xf32>
    %241 = arith.truncf %239 : vector<8x128xf32> to vector<8x128xbf16>
    %c0_98 = arith.constant 0 : index
    %c0_99 = arith.constant 0 : index
    %242 = vector.load %arg8[%c0_98, %c0_99] : memref<128x512xbf16, #tpu.memory_space<vmem>>, vector<128x512xbf16>
    %cst_100 = arith.constant dense<0.000000e+00> : vector<8x512xf32>
    %243 = tpu.matmul %241, %242, %cst_100 {dimension_numbers = #tpu.dot_dimension_numbers<[1], [0], [0], [1], [0, 0, 1, 1], [], []>} : vector<8x128xbf16>, vector<128x512xbf16>, vector<8x512xf32> -> vector<8x512xf32>
    %244 = arith.addf %240, %243 : vector<8x512xf32>
    %245 = vector.extract_strided_slice %244 {offsets = [0, 0], sizes = [8, 128], strides = [1, 1]} : vector<8x512xf32> to vector<8x128xf32>
    %cst_101 = arith.constant 5.000000e-01 : f32
    %246 = vector.broadcast %cst_101 : f32 to vector<8x128xf32>
    %247 = arith.mulf %246, %245 : vector<8x128xf32>
    %248 = math.tanh %247 : vector<8x128xf32>
    %cst_102 = arith.constant 5.000000e-01 : f32
    %249 = vector.broadcast %cst_102 : f32 to vector<8x128xf32>
    %250 = arith.mulf %249, %248 : vector<8x128xf32>
    %cst_103 = arith.constant 5.000000e-01 : f32
    %251 = vector.broadcast %cst_103 : f32 to vector<8x128xf32>
    %252 = arith.addf %250, %251 : vector<8x128xf32>
    %253 = vector.extract_strided_slice %244 {offsets = [0, 128], sizes = [8, 128], strides = [1, 1]} : vector<8x512xf32> to vector<8x128xf32>
    %cst_104 = arith.constant 5.000000e-01 : f32
    %254 = vector.broadcast %cst_104 : f32 to vector<8x128xf32>
    %255 = arith.mulf %254, %253 : vector<8x128xf32>
    %256 = math.tanh %255 : vector<8x128xf32>
    %cst_105 = arith.constant 5.000000e-01 : f32
    %257 = vector.broadcast %cst_105 : f32 to vector<8x128xf32>
    %258 = arith.mulf %257, %256 : vector<8x128xf32>
    %cst_106 = arith.constant 5.000000e-01 : f32
    %259 = vector.broadcast %cst_106 : f32 to vector<8x128xf32>
    %260 = arith.addf %258, %259 : vector<8x128xf32>
    %261 = vector.extract_strided_slice %244 {offsets = [0, 256], sizes = [8, 128], strides = [1, 1]} : vector<8x512xf32> to vector<8x128xf32>
    %262 = math.tanh %261 : vector<8x128xf32>
    %263 = vector.extract_strided_slice %244 {offsets = [0, 384], sizes = [8, 128], strides = [1, 1]} : vector<8x512xf32> to vector<8x128xf32>
    %cst_107 = arith.constant 5.000000e-01 : f32
    %264 = vector.broadcast %cst_107 : f32 to vector<8x128xf32>
    %265 = arith.mulf %264, %263 : vector<8x128xf32>
    %266 = math.tanh %265 : vector<8x128xf32>
    %cst_108 = arith.constant 5.000000e-01 : f32
    %267 = vector.broadcast %cst_108 : f32 to vector<8x128xf32>
    %268 = arith.mulf %267, %266 : vector<8x128xf32>
    %cst_109 = arith.constant 5.000000e-01 : f32
    %269 = vector.broadcast %cst_109 : f32 to vector<8x128xf32>
    %270 = arith.addf %268, %269 : vector<8x128xf32>
    %271 = arith.mulf %260, %237 : vector<8x128xf32>
    %272 = arith.mulf %252, %262 : vector<8x128xf32>
    %273 = arith.addf %271, %272 : vector<8x128xf32>
    %274 = math.tanh %273 : vector<8x128xf32>
    %275 = arith.mulf %270, %274 : vector<8x128xf32>
    %c56 = arith.constant 56 : index
    %c0_110 = arith.constant 0 : index
    %276 = vector.load %arg18[%c56, %c0_110] : memref<64x1024xf32, #tpu.memory_space<vmem>>, vector<8x512xf32>
    %277 = arith.truncf %275 : vector<8x128xf32> to vector<8x128xbf16>
    %c0_111 = arith.constant 0 : index
    %c0_112 = arith.constant 0 : index
    %278 = vector.load %arg8[%c0_111, %c0_112] : memref<128x512xbf16, #tpu.memory_space<vmem>>, vector<128x512xbf16>
    %cst_113 = arith.constant dense<0.000000e+00> : vector<8x512xf32>
    %279 = tpu.matmul %277, %278, %cst_113 {dimension_numbers = #tpu.dot_dimension_numbers<[1], [0], [0], [1], [0, 0, 1, 1], [], []>} : vector<8x128xbf16>, vector<128x512xbf16>, vector<8x512xf32> -> vector<8x512xf32>
    %280 = arith.addf %276, %279 : vector<8x512xf32>
    %281 = vector.extract_strided_slice %280 {offsets = [0, 0], sizes = [8, 128], strides = [1, 1]} : vector<8x512xf32> to vector<8x128xf32>
    %cst_114 = arith.constant 5.000000e-01 : f32
    %282 = vector.broadcast %cst_114 : f32 to vector<8x128xf32>
    %283 = arith.mulf %282, %281 : vector<8x128xf32>
    %284 = math.tanh %283 : vector<8x128xf32>
    %cst_115 = arith.constant 5.000000e-01 : f32
    %285 = vector.broadcast %cst_115 : f32 to vector<8x128xf32>
    %286 = arith.mulf %285, %284 : vector<8x128xf32>
    %cst_116 = arith.constant 5.000000e-01 : f32
    %287 = vector.broadcast %cst_116 : f32 to vector<8x128xf32>
    %288 = arith.addf %286, %287 : vector<8x128xf32>
    %289 = vector.extract_strided_slice %280 {offsets = [0, 128], sizes = [8, 128], strides = [1, 1]} : vector<8x512xf32> to vector<8x128xf32>
    %cst_117 = arith.constant 5.000000e-01 : f32
    %290 = vector.broadcast %cst_117 : f32 to vector<8x128xf32>
    %291 = arith.mulf %290, %289 : vector<8x128xf32>
    %292 = math.tanh %291 : vector<8x128xf32>
    %cst_118 = arith.constant 5.000000e-01 : f32
    %293 = vector.broadcast %cst_118 : f32 to vector<8x128xf32>
    %294 = arith.mulf %293, %292 : vector<8x128xf32>
    %cst_119 = arith.constant 5.000000e-01 : f32
    %295 = vector.broadcast %cst_119 : f32 to vector<8x128xf32>
    %296 = arith.addf %294, %295 : vector<8x128xf32>
    %297 = vector.extract_strided_slice %280 {offsets = [0, 256], sizes = [8, 128], strides = [1, 1]} : vector<8x512xf32> to vector<8x128xf32>
    %298 = math.tanh %297 : vector<8x128xf32>
    %299 = vector.extract_strided_slice %280 {offsets = [0, 384], sizes = [8, 128], strides = [1, 1]} : vector<8x512xf32> to vector<8x128xf32>
    %cst_120 = arith.constant 5.000000e-01 : f32
    %300 = vector.broadcast %cst_120 : f32 to vector<8x128xf32>
    %301 = arith.mulf %300, %299 : vector<8x128xf32>
    %302 = math.tanh %301 : vector<8x128xf32>
    %cst_121 = arith.constant 5.000000e-01 : f32
    %303 = vector.broadcast %cst_121 : f32 to vector<8x128xf32>
    %304 = arith.mulf %303, %302 : vector<8x128xf32>
    %cst_122 = arith.constant 5.000000e-01 : f32
    %305 = vector.broadcast %cst_122 : f32 to vector<8x128xf32>
    %306 = arith.addf %304, %305 : vector<8x128xf32>
    %307 = arith.mulf %296, %273 : vector<8x128xf32>
    %308 = arith.mulf %288, %298 : vector<8x128xf32>
    %309 = arith.addf %307, %308 : vector<8x128xf32>
    %310 = math.tanh %309 : vector<8x128xf32>
    %311 = arith.mulf %306, %310 : vector<8x128xf32>
    %312 = arith.truncf %311 : vector<8x128xf32> to vector<8x128xbf16>
    %c0_123 = arith.constant 0 : index
    %c0_124 = arith.constant 0 : index
    %313 = vector.load %arg9[%c0_123, %c0_124] : memref<128x128xbf16, #tpu.memory_space<vmem>>, vector<128x128xbf16>
    %cst_125 = arith.constant dense<0.000000e+00> : vector<8x128xf32>
    %314 = tpu.matmul %312, %313, %cst_125 {dimension_numbers = #tpu.dot_dimension_numbers<[1], [0], [0], [1], [0, 0, 1, 1], [], []>} : vector<8x128xbf16>, vector<128x128xbf16>, vector<8x128xf32> -> vector<8x128xf32>
    %c0_126 = arith.constant 0 : index
    %c0_127 = arith.constant 0 : index
    %315 = vector.load %arg10[%c0_126, %c0_127] : memref<1x128xf32, #tpu.memory_space<vmem>>, vector<1x128xf32>
    %316 = vector.broadcast %315 : vector<1x128xf32> to vector<8x128xf32>
    %317 = arith.addf %314, %316 : vector<8x128xf32>
    %c0_128 = arith.constant 0 : index
    %c0_129 = arith.constant 0 : index
    %318 = vector.load %arg17[%c0_128, %c0_129] : memref<8x128xf32, #tpu.memory_space<vmem>>, vector<8x128xf32>
    tpu.vector_store %arg17[%c0_128, %c0_129], %317 {strides = array<i32>} : memref<8x128xf32, #tpu.memory_space<vmem>>, vector<8x128xf32>,
    %319 = arith.truncf %317 : vector<8x128xf32> to vector<8x128xbf16>
    %c0_130 = arith.constant 0 : index
    %c0_131 = arith.constant 0 : index
    %320 = vector.load %arg11[%c0_130, %c0_131] : memref<128x128xbf16, #tpu.memory_space<vmem>>, vector<128x128xbf16>
    %cst_132 = arith.constant dense<0.000000e+00> : vector<8x128xf32>
    %321 = tpu.matmul %319, %320, %cst_132 {dimension_numbers = #tpu.dot_dimension_numbers<[1], [0], [0], [1], [0, 0, 1, 1], [], []>} : vector<8x128xbf16>, vector<128x128xbf16>, vector<8x128xf32> -> vector<8x128xf32>
    %c0_133 = arith.constant 0 : index
    %c0_134 = arith.constant 0 : index
    %322 = vector.load %arg12[%c0_133, %c0_134] : memref<1x128xf32, #tpu.memory_space<vmem>>, vector<1x128xf32>
    %323 = vector.broadcast %322 : vector<1x128xf32> to vector<8x128xf32>
    %324 = arith.addf %321, %323 : vector<8x128xf32>
    %cst_135 = arith.constant 0.000000e+00 : f32
    %325 = vector.broadcast %cst_135 : f32 to vector<8x128xf32>
    %c0_136 = arith.constant 0 : index
    %c512 = arith.constant 512 : index
    %326 = vector.load %arg18[%c0_136, %c512] : memref<64x1024xf32, #tpu.memory_space<vmem>>, vector<8x512xf32>
    %327 = arith.truncf %324 : vector<8x128xf32> to vector<8x128xbf16>
    %c0_137 = arith.constant 0 : index
    %c0_138 = arith.constant 0 : index
    %328 = vector.load %arg13[%c0_137, %c0_138] : memref<128x512xbf16, #tpu.memory_space<vmem>>, vector<128x512xbf16>
    %cst_139 = arith.constant dense<0.000000e+00> : vector<8x512xf32>
    %329 = tpu.matmul %327, %328, %cst_139 {dimension_numbers = #tpu.dot_dimension_numbers<[1], [0], [0], [1], [0, 0, 1, 1], [], []>} : vector<8x128xbf16>, vector<128x512xbf16>, vector<8x512xf32> -> vector<8x512xf32>
    %330 = arith.addf %326, %329 : vector<8x512xf32>
    %331 = vector.extract_strided_slice %330 {offsets = [0, 0], sizes = [8, 128], strides = [1, 1]} : vector<8x512xf32> to vector<8x128xf32>
    %cst_140 = arith.constant 5.000000e-01 : f32
    %332 = vector.broadcast %cst_140 : f32 to vector<8x128xf32>
    %333 = arith.mulf %332, %331 : vector<8x128xf32>
    %334 = math.tanh %333 : vector<8x128xf32>
    %cst_141 = arith.constant 5.000000e-01 : f32
    %335 = vector.broadcast %cst_141 : f32 to vector<8x128xf32>
    %336 = arith.mulf %335, %334 : vector<8x128xf32>
    %cst_142 = arith.constant 5.000000e-01 : f32
    %337 = vector.broadcast %cst_142 : f32 to vector<8x128xf32>
    %338 = arith.addf %336, %337 : vector<8x128xf32>
    %339 = vector.extract_strided_slice %330 {offsets = [0, 128], sizes = [8, 128], strides = [1, 1]} : vector<8x512xf32> to vector<8x128xf32>
    %cst_143 = arith.constant 5.000000e-01 : f32
    %340 = vector.broadcast %cst_143 : f32 to vector<8x128xf32>
    %341 = arith.mulf %340, %339 : vector<8x128xf32>
    %342 = math.tanh %341 : vector<8x128xf32>
    %cst_144 = arith.constant 5.000000e-01 : f32
    %343 = vector.broadcast %cst_144 : f32 to vector<8x128xf32>
    %344 = arith.mulf %343, %342 : vector<8x128xf32>
    %cst_145 = arith.constant 5.000000e-01 : f32
    %345 = vector.broadcast %cst_145 : f32 to vector<8x128xf32>
    %346 = arith.addf %344, %345 : vector<8x128xf32>
    %347 = vector.extract_strided_slice %330 {offsets = [0, 256], sizes = [8, 128], strides = [1, 1]} : vector<8x512xf32> to vector<8x128xf32>
    %348 = math.tanh %347 : vector<8x128xf32>
    %349 = vector.extract_strided_slice %330 {offsets = [0, 384], sizes = [8, 128], strides = [1, 1]} : vector<8x512xf32> to vector<8x128xf32>
    %cst_146 = arith.constant 5.000000e-01 : f32
    %350 = vector.broadcast %cst_146 : f32 to vector<8x128xf32>
    %351 = arith.mulf %350, %349 : vector<8x128xf32>
    %352 = math.tanh %351 : vector<8x128xf32>
    %cst_147 = arith.constant 5.000000e-01 : f32
    %353 = vector.broadcast %cst_147 : f32 to vector<8x128xf32>
    %354 = arith.mulf %353, %352 : vector<8x128xf32>
    %cst_148 = arith.constant 5.000000e-01 : f32
    %355 = vector.broadcast %cst_148 : f32 to vector<8x128xf32>
    %356 = arith.addf %354, %355 : vector<8x128xf32>
    %357 = arith.mulf %346, %325 : vector<8x128xf32>
    %358 = arith.mulf %338, %348 : vector<8x128xf32>
    %359 = arith.addf %357, %358 : vector<8x128xf32>
    %360 = math.tanh %359 : vector<8x128xf32>
    %361 = arith.mulf %356, %360 : vector<8x128xf32>
    %c0_149 = arith.constant 0 : index
    %c0_150 = arith.constant 0 : index
    %362 = vector.load %arg19[%c0_149, %c0_150] : memref<64x128xf32, #tpu.memory_space<vmem>>, vector<8x128xf32>
    tpu.vector_store %arg19[%c0_149, %c0_150], %361 {strides = array<i32>} : memref<64x128xf32, #tpu.memory_space<vmem>>, vector<8x128xf32>,
    %c8_151 = arith.constant 8 : index
    %c512_152 = arith.constant 512 : index
    %363 = vector.load %arg18[%c8_151, %c512_152] : memref<64x1024xf32, #tpu.memory_space<vmem>>, vector<8x512xf32>
    %364 = arith.truncf %361 : vector<8x128xf32> to vector<8x128xbf16>
    %c0_153 = arith.constant 0 : index
    %c0_154 = arith.constant 0 : index
    %365 = vector.load %arg13[%c0_153, %c0_154] : memref<128x512xbf16, #tpu.memory_space<vmem>>, vector<128x512xbf16>
    %cst_155 = arith.constant dense<0.000000e+00> : vector<8x512xf32>
    %366 = tpu.matmul %364, %365, %cst_155 {dimension_numbers = #tpu.dot_dimension_numbers<[1], [0], [0], [1], [0, 0, 1, 1], [], []>} : vector<8x128xbf16>, vector<128x512xbf16>, vector<8x512xf32> -> vector<8x512xf32>
    %367 = arith.addf %363, %366 : vector<8x512xf32>
    %368 = vector.extract_strided_slice %367 {offsets = [0, 0], sizes = [8, 128], strides = [1, 1]} : vector<8x512xf32> to vector<8x128xf32>
    %cst_156 = arith.constant 5.000000e-01 : f32
    %369 = vector.broadcast %cst_156 : f32 to vector<8x128xf32>
    %370 = arith.mulf %369, %368 : vector<8x128xf32>
    %371 = math.tanh %370 : vector<8x128xf32>
    %cst_157 = arith.constant 5.000000e-01 : f32
    %372 = vector.broadcast %cst_157 : f32 to vector<8x128xf32>
    %373 = arith.mulf %372, %371 : vector<8x128xf32>
    %cst_158 = arith.constant 5.000000e-01 : f32
    %374 = vector.broadcast %cst_158 : f32 to vector<8x128xf32>
    %375 = arith.addf %373, %374 : vector<8x128xf32>
    %376 = vector.extract_strided_slice %367 {offsets = [0, 128], sizes = [8, 128], strides = [1, 1]} : vector<8x512xf32> to vector<8x128xf32>
    %cst_159 = arith.constant 5.000000e-01 : f32
    %377 = vector.broadcast %cst_159 : f32 to vector<8x128xf32>
    %378 = arith.mulf %377, %376 : vector<8x128xf32>
    %379 = math.tanh %378 : vector<8x128xf32>
    %cst_160 = arith.constant 5.000000e-01 : f32
    %380 = vector.broadcast %cst_160 : f32 to vector<8x128xf32>
    %381 = arith.mulf %380, %379 : vector<8x128xf32>
    %cst_161 = arith.constant 5.000000e-01 : f32
    %382 = vector.broadcast %cst_161 : f32 to vector<8x128xf32>
    %383 = arith.addf %381, %382 : vector<8x128xf32>
    %384 = vector.extract_strided_slice %367 {offsets = [0, 256], sizes = [8, 128], strides = [1, 1]} : vector<8x512xf32> to vector<8x128xf32>
    %385 = math.tanh %384 : vector<8x128xf32>
    %386 = vector.extract_strided_slice %367 {offsets = [0, 384], sizes = [8, 128], strides = [1, 1]} : vector<8x512xf32> to vector<8x128xf32>
    %cst_162 = arith.constant 5.000000e-01 : f32
    %387 = vector.broadcast %cst_162 : f32 to vector<8x128xf32>
    %388 = arith.mulf %387, %386 : vector<8x128xf32>
    %389 = math.tanh %388 : vector<8x128xf32>
    %cst_163 = arith.constant 5.000000e-01 : f32
    %390 = vector.broadcast %cst_163 : f32 to vector<8x128xf32>
    %391 = arith.mulf %390, %389 : vector<8x128xf32>
    %cst_164 = arith.constant 5.000000e-01 : f32
    %392 = vector.broadcast %cst_164 : f32 to vector<8x128xf32>
    %393 = arith.addf %391, %392 : vector<8x128xf32>
    %394 = arith.mulf %383, %359 : vector<8x128xf32>
    %395 = arith.mulf %375, %385 : vector<8x128xf32>
    %396 = arith.addf %394, %395 : vector<8x128xf32>
    %397 = math.tanh %396 : vector<8x128xf32>
    %398 = arith.mulf %393, %397 : vector<8x128xf32>
    %c8_165 = arith.constant 8 : index
    %c0_166 = arith.constant 0 : index
    %399 = vector.load %arg19[%c8_165, %c0_166] : memref<64x128xf32, #tpu.memory_space<vmem>>, vector<8x128xf32>
    tpu.vector_store %arg19[%c8_165, %c0_166], %398 {strides = array<i32>} : memref<64x128xf32, #tpu.memory_space<vmem>>, vector<8x128xf32>,
    %c16_167 = arith.constant 16 : index
    %c512_168 = arith.constant 512 : index
    %400 = vector.load %arg18[%c16_167, %c512_168] : memref<64x1024xf32, #tpu.memory_space<vmem>>, vector<8x512xf32>
    %401 = arith.truncf %398 : vector<8x128xf32> to vector<8x128xbf16>
    %c0_169 = arith.constant 0 : index
    %c0_170 = arith.constant 0 : index
    %402 = vector.load %arg13[%c0_169, %c0_170] : memref<128x512xbf16, #tpu.memory_space<vmem>>, vector<128x512xbf16>
    %cst_171 = arith.constant dense<0.000000e+00> : vector<8x512xf32>
    %403 = tpu.matmul %401, %402, %cst_171 {dimension_numbers = #tpu.dot_dimension_numbers<[1], [0], [0], [1], [0, 0, 1, 1], [], []>} : vector<8x128xbf16>, vector<128x512xbf16>, vector<8x512xf32> -> vector<8x512xf32>
    %404 = arith.addf %400, %403 : vector<8x512xf32>
    %405 = vector.extract_strided_slice %404 {offsets = [0, 0], sizes = [8, 128], strides = [1, 1]} : vector<8x512xf32> to vector<8x128xf32>
    %cst_172 = arith.constant 5.000000e-01 : f32
    %406 = vector.broadcast %cst_172 : f32 to vector<8x128xf32>
    %407 = arith.mulf %406, %405 : vector<8x128xf32>
    %408 = math.tanh %407 : vector<8x128xf32>
    %cst_173 = arith.constant 5.000000e-01 : f32
    %409 = vector.broadcast %cst_173 : f32 to vector<8x128xf32>
    %410 = arith.mulf %409, %408 : vector<8x128xf32>
    %cst_174 = arith.constant 5.000000e-01 : f32
    %411 = vector.broadcast %cst_174 : f32 to vector<8x128xf32>
    %412 = arith.addf %410, %411 : vector<8x128xf32>
    %413 = vector.extract_strided_slice %404 {offsets = [0, 128], sizes = [8, 128], strides = [1, 1]} : vector<8x512xf32> to vector<8x128xf32>
    %cst_175 = arith.constant 5.000000e-01 : f32
    %414 = vector.broadcast %cst_175 : f32 to vector<8x128xf32>
    %415 = arith.mulf %414, %413 : vector<8x128xf32>
    %416 = math.tanh %415 : vector<8x128xf32>
    %cst_176 = arith.constant 5.000000e-01 : f32
    %417 = vector.broadcast %cst_176 : f32 to vector<8x128xf32>
    %418 = arith.mulf %417, %416 : vector<8x128xf32>
    %cst_177 = arith.constant 5.000000e-01 : f32
    %419 = vector.broadcast %cst_177 : f32 to vector<8x128xf32>
    %420 = arith.addf %418, %419 : vector<8x128xf32>
    %421 = vector.extract_strided_slice %404 {offsets = [0, 256], sizes = [8, 128], strides = [1, 1]} : vector<8x512xf32> to vector<8x128xf32>
    %422 = math.tanh %421 : vector<8x128xf32>
    %423 = vector.extract_strided_slice %404 {offsets = [0, 384], sizes = [8, 128], strides = [1, 1]} : vector<8x512xf32> to vector<8x128xf32>
    %cst_178 = arith.constant 5.000000e-01 : f32
    %424 = vector.broadcast %cst_178 : f32 to vector<8x128xf32>
    %425 = arith.mulf %424, %423 : vector<8x128xf32>
    %426 = math.tanh %425 : vector<8x128xf32>
    %cst_179 = arith.constant 5.000000e-01 : f32
    %427 = vector.broadcast %cst_179 : f32 to vector<8x128xf32>
    %428 = arith.mulf %427, %426 : vector<8x128xf32>
    %cst_180 = arith.constant 5.000000e-01 : f32
    %429 = vector.broadcast %cst_180 : f32 to vector<8x128xf32>
    %430 = arith.addf %428, %429 : vector<8x128xf32>
    %431 = arith.mulf %420, %396 : vector<8x128xf32>
    %432 = arith.mulf %412, %422 : vector<8x128xf32>
    %433 = arith.addf %431, %432 : vector<8x128xf32>
    %434 = math.tanh %433 : vector<8x128xf32>
    %435 = arith.mulf %430, %434 : vector<8x128xf32>
    %c16_181 = arith.constant 16 : index
    %c0_182 = arith.constant 0 : index
    %436 = vector.load %arg19[%c16_181, %c0_182] : memref<64x128xf32, #tpu.memory_space<vmem>>, vector<8x128xf32>
    tpu.vector_store %arg19[%c16_181, %c0_182], %435 {strides = array<i32>} : memref<64x128xf32, #tpu.memory_space<vmem>>, vector<8x128xf32>,
    %c24_183 = arith.constant 24 : index
    %c512_184 = arith.constant 512 : index
    %437 = vector.load %arg18[%c24_183, %c512_184] : memref<64x1024xf32, #tpu.memory_space<vmem>>, vector<8x512xf32>
    %438 = arith.truncf %435 : vector<8x128xf32> to vector<8x128xbf16>
    %c0_185 = arith.constant 0 : index
    %c0_186 = arith.constant 0 : index
    %439 = vector.load %arg13[%c0_185, %c0_186] : memref<128x512xbf16, #tpu.memory_space<vmem>>, vector<128x512xbf16>
    %cst_187 = arith.constant dense<0.000000e+00> : vector<8x512xf32>
    %440 = tpu.matmul %438, %439, %cst_187 {dimension_numbers = #tpu.dot_dimension_numbers<[1], [0], [0], [1], [0, 0, 1, 1], [], []>} : vector<8x128xbf16>, vector<128x512xbf16>, vector<8x512xf32> -> vector<8x512xf32>
    %441 = arith.addf %437, %440 : vector<8x512xf32>
    %442 = vector.extract_strided_slice %441 {offsets = [0, 0], sizes = [8, 128], strides = [1, 1]} : vector<8x512xf32> to vector<8x128xf32>
    %cst_188 = arith.constant 5.000000e-01 : f32
    %443 = vector.broadcast %cst_188 : f32 to vector<8x128xf32>
    %444 = arith.mulf %443, %442 : vector<8x128xf32>
    %445 = math.tanh %444 : vector<8x128xf32>
    %cst_189 = arith.constant 5.000000e-01 : f32
    %446 = vector.broadcast %cst_189 : f32 to vector<8x128xf32>
    %447 = arith.mulf %446, %445 : vector<8x128xf32>
    %cst_190 = arith.constant 5.000000e-01 : f32
    %448 = vector.broadcast %cst_190 : f32 to vector<8x128xf32>
    %449 = arith.addf %447, %448 : vector<8x128xf32>
    %450 = vector.extract_strided_slice %441 {offsets = [0, 128], sizes = [8, 128], strides = [1, 1]} : vector<8x512xf32> to vector<8x128xf32>
    %cst_191 = arith.constant 5.000000e-01 : f32
    %451 = vector.broadcast %cst_191 : f32 to vector<8x128xf32>
    %452 = arith.mulf %451, %450 : vector<8x128xf32>
    %453 = math.tanh %452 : vector<8x128xf32>
    %cst_192 = arith.constant 5.000000e-01 : f32
    %454 = vector.broadcast %cst_192 : f32 to vector<8x128xf32>
    %455 = arith.mulf %454, %453 : vector<8x128xf32>
    %cst_193 = arith.constant 5.000000e-01 : f32
    %456 = vector.broadcast %cst_193 : f32 to vector<8x128xf32>
    %457 = arith.addf %455, %456 : vector<8x128xf32>
    %458 = vector.extract_strided_slice %441 {offsets = [0, 256], sizes = [8, 128], strides = [1, 1]} : vector<8x512xf32> to vector<8x128xf32>
    %459 = math.tanh %458 : vector<8x128xf32>
    %460 = vector.extract_strided_slice %441 {offsets = [0, 384], sizes = [8, 128], strides = [1, 1]} : vector<8x512xf32> to vector<8x128xf32>
    %cst_194 = arith.constant 5.000000e-01 : f32
    %461 = vector.broadcast %cst_194 : f32 to vector<8x128xf32>
    %462 = arith.mulf %461, %460 : vector<8x128xf32>
    %463 = math.tanh %462 : vector<8x128xf32>
    %cst_195 = arith.constant 5.000000e-01 : f32
    %464 = vector.broadcast %cst_195 : f32 to vector<8x128xf32>
    %465 = arith.mulf %464, %463 : vector<8x128xf32>
    %cst_196 = arith.constant 5.000000e-01 : f32
    %466 = vector.broadcast %cst_196 : f32 to vector<8x128xf32>
    %467 = arith.addf %465, %466 : vector<8x128xf32>
    %468 = arith.mulf %457, %433 : vector<8x128xf32>
    %469 = arith.mulf %449, %459 : vector<8x128xf32>
    %470 = arith.addf %468, %469 : vector<8x128xf32>
    %471 = math.tanh %470 : vector<8x128xf32>
    %472 = arith.mulf %467, %471 : vector<8x128xf32>
    %c24_197 = arith.constant 24 : index
    %c0_198 = arith.constant 0 : index
    %473 = vector.load %arg19[%c24_197, %c0_198] : memref<64x128xf32, #tpu.memory_space<vmem>>, vector<8x128xf32>
    tpu.vector_store %arg19[%c24_197, %c0_198], %472 {strides = array<i32>} : memref<64x128xf32, #tpu.memory_space<vmem>>, vector<8x128xf32>,
    %c32_199 = arith.constant 32 : index
    %c512_200 = arith.constant 512 : index
    %474 = vector.load %arg18[%c32_199, %c512_200] : memref<64x1024xf32, #tpu.memory_space<vmem>>, vector<8x512xf32>
    %475 = arith.truncf %472 : vector<8x128xf32> to vector<8x128xbf16>
    %c0_201 = arith.constant 0 : index
    %c0_202 = arith.constant 0 : index
    %476 = vector.load %arg13[%c0_201, %c0_202] : memref<128x512xbf16, #tpu.memory_space<vmem>>, vector<128x512xbf16>
    %cst_203 = arith.constant dense<0.000000e+00> : vector<8x512xf32>
    %477 = tpu.matmul %475, %476, %cst_203 {dimension_numbers = #tpu.dot_dimension_numbers<[1], [0], [0], [1], [0, 0, 1, 1], [], []>} : vector<8x128xbf16>, vector<128x512xbf16>, vector<8x512xf32> -> vector<8x512xf32>
    %478 = arith.addf %474, %477 : vector<8x512xf32>
    %479 = vector.extract_strided_slice %478 {offsets = [0, 0], sizes = [8, 128], strides = [1, 1]} : vector<8x512xf32> to vector<8x128xf32>
    %cst_204 = arith.constant 5.000000e-01 : f32
    %480 = vector.broadcast %cst_204 : f32 to vector<8x128xf32>
    %481 = arith.mulf %480, %479 : vector<8x128xf32>
    %482 = math.tanh %481 : vector<8x128xf32>
    %cst_205 = arith.constant 5.000000e-01 : f32
    %483 = vector.broadcast %cst_205 : f32 to vector<8x128xf32>
    %484 = arith.mulf %483, %482 : vector<8x128xf32>
    %cst_206 = arith.constant 5.000000e-01 : f32
    %485 = vector.broadcast %cst_206 : f32 to vector<8x128xf32>
    %486 = arith.addf %484, %485 : vector<8x128xf32>
    %487 = vector.extract_strided_slice %478 {offsets = [0, 128], sizes = [8, 128], strides = [1, 1]} : vector<8x512xf32> to vector<8x128xf32>
    %cst_207 = arith.constant 5.000000e-01 : f32
    %488 = vector.broadcast %cst_207 : f32 to vector<8x128xf32>
    %489 = arith.mulf %488, %487 : vector<8x128xf32>
    %490 = math.tanh %489 : vector<8x128xf32>
    %cst_208 = arith.constant 5.000000e-01 : f32
    %491 = vector.broadcast %cst_208 : f32 to vector<8x128xf32>
    %492 = arith.mulf %491, %490 : vector<8x128xf32>
    %cst_209 = arith.constant 5.000000e-01 : f32
    %493 = vector.broadcast %cst_209 : f32 to vector<8x128xf32>
    %494 = arith.addf %492, %493 : vector<8x128xf32>
    %495 = vector.extract_strided_slice %478 {offsets = [0, 256], sizes = [8, 128], strides = [1, 1]} : vector<8x512xf32> to vector<8x128xf32>
    %496 = math.tanh %495 : vector<8x128xf32>
    %497 = vector.extract_strided_slice %478 {offsets = [0, 384], sizes = [8, 128], strides = [1, 1]} : vector<8x512xf32> to vector<8x128xf32>
    %cst_210 = arith.constant 5.000000e-01 : f32
    %498 = vector.broadcast %cst_210 : f32 to vector<8x128xf32>
    %499 = arith.mulf %498, %497 : vector<8x128xf32>
    %500 = math.tanh %499 : vector<8x128xf32>
    %cst_211 = arith.constant 5.000000e-01 : f32
    %501 = vector.broadcast %cst_211 : f32 to vector<8x128xf32>
    %502 = arith.mulf %501, %500 : vector<8x128xf32>
    %cst_212 = arith.constant 5.000000e-01 : f32
    %503 = vector.broadcast %cst_212 : f32 to vector<8x128xf32>
    %504 = arith.addf %502, %503 : vector<8x128xf32>
    %505 = arith.mulf %494, %470 : vector<8x128xf32>
    %506 = arith.mulf %486, %496 : vector<8x128xf32>
    %507 = arith.addf %505, %506 : vector<8x128xf32>
    %508 = math.tanh %507 : vector<8x128xf32>
    %509 = arith.mulf %504, %508 : vector<8x128xf32>
    %c32_213 = arith.constant 32 : index
    %c0_214 = arith.constant 0 : index
    %510 = vector.load %arg19[%c32_213, %c0_214] : memref<64x128xf32, #tpu.memory_space<vmem>>, vector<8x128xf32>
    tpu.vector_store %arg19[%c32_213, %c0_214], %509 {strides = array<i32>} : memref<64x128xf32, #tpu.memory_space<vmem>>, vector<8x128xf32>,
    %c40_215 = arith.constant 40 : index
    %c512_216 = arith.constant 512 : index
    %511 = vector.load %arg18[%c40_215, %c512_216] : memref<64x1024xf32, #tpu.memory_space<vmem>>, vector<8x512xf32>
    %512 = arith.truncf %509 : vector<8x128xf32> to vector<8x128xbf16>
    %c0_217 = arith.constant 0 : index
    %c0_218 = arith.constant 0 : index
    %513 = vector.load %arg13[%c0_217, %c0_218] : memref<128x512xbf16, #tpu.memory_space<vmem>>, vector<128x512xbf16>
    %cst_219 = arith.constant dense<0.000000e+00> : vector<8x512xf32>
    %514 = tpu.matmul %512, %513, %cst_219 {dimension_numbers = #tpu.dot_dimension_numbers<[1], [0], [0], [1], [0, 0, 1, 1], [], []>} : vector<8x128xbf16>, vector<128x512xbf16>, vector<8x512xf32> -> vector<8x512xf32>
    %515 = arith.addf %511, %514 : vector<8x512xf32>
    %516 = vector.extract_strided_slice %515 {offsets = [0, 0], sizes = [8, 128], strides = [1, 1]} : vector<8x512xf32> to vector<8x128xf32>
    %cst_220 = arith.constant 5.000000e-01 : f32
    %517 = vector.broadcast %cst_220 : f32 to vector<8x128xf32>
    %518 = arith.mulf %517, %516 : vector<8x128xf32>
    %519 = math.tanh %518 : vector<8x128xf32>
    %cst_221 = arith.constant 5.000000e-01 : f32
    %520 = vector.broadcast %cst_221 : f32 to vector<8x128xf32>
    %521 = arith.mulf %520, %519 : vector<8x128xf32>
    %cst_222 = arith.constant 5.000000e-01 : f32
    %522 = vector.broadcast %cst_222 : f32 to vector<8x128xf32>
    %523 = arith.addf %521, %522 : vector<8x128xf32>
    %524 = vector.extract_strided_slice %515 {offsets = [0, 128], sizes = [8, 128], strides = [1, 1]} : vector<8x512xf32> to vector<8x128xf32>
    %cst_223 = arith.constant 5.000000e-01 : f32
    %525 = vector.broadcast %cst_223 : f32 to vector<8x128xf32>
    %526 = arith.mulf %525, %524 : vector<8x128xf32>
    %527 = math.tanh %526 : vector<8x128xf32>
    %cst_224 = arith.constant 5.000000e-01 : f32
    %528 = vector.broadcast %cst_224 : f32 to vector<8x128xf32>
    %529 = arith.mulf %528, %527 : vector<8x128xf32>
    %cst_225 = arith.constant 5.000000e-01 : f32
    %530 = vector.broadcast %cst_225 : f32 to vector<8x128xf32>
    %531 = arith.addf %529, %530 : vector<8x128xf32>
    %532 = vector.extract_strided_slice %515 {offsets = [0, 256], sizes = [8, 128], strides = [1, 1]} : vector<8x512xf32> to vector<8x128xf32>
    %533 = math.tanh %532 : vector<8x128xf32>
    %534 = vector.extract_strided_slice %515 {offsets = [0, 384], sizes = [8, 128], strides = [1, 1]} : vector<8x512xf32> to vector<8x128xf32>
    %cst_226 = arith.constant 5.000000e-01 : f32
    %535 = vector.broadcast %cst_226 : f32 to vector<8x128xf32>
    %536 = arith.mulf %535, %534 : vector<8x128xf32>
    %537 = math.tanh %536 : vector<8x128xf32>
    %cst_227 = arith.constant 5.000000e-01 : f32
    %538 = vector.broadcast %cst_227 : f32 to vector<8x128xf32>
    %539 = arith.mulf %538, %537 : vector<8x128xf32>
    %cst_228 = arith.constant 5.000000e-01 : f32
    %540 = vector.broadcast %cst_228 : f32 to vector<8x128xf32>
    %541 = arith.addf %539, %540 : vector<8x128xf32>
    %542 = arith.mulf %531, %507 : vector<8x128xf32>
    %543 = arith.mulf %523, %533 : vector<8x128xf32>
    %544 = arith.addf %542, %543 : vector<8x128xf32>
    %545 = math.tanh %544 : vector<8x128xf32>
    %546 = arith.mulf %541, %545 : vector<8x128xf32>
    %c40_229 = arith.constant 40 : index
    %c0_230 = arith.constant 0 : index
    %547 = vector.load %arg19[%c40_229, %c0_230] : memref<64x128xf32, #tpu.memory_space<vmem>>, vector<8x128xf32>
    tpu.vector_store %arg19[%c40_229, %c0_230], %546 {strides = array<i32>} : memref<64x128xf32, #tpu.memory_space<vmem>>, vector<8x128xf32>,
    %c48_231 = arith.constant 48 : index
    %c512_232 = arith.constant 512 : index
    %548 = vector.load %arg18[%c48_231, %c512_232] : memref<64x1024xf32, #tpu.memory_space<vmem>>, vector<8x512xf32>
    %549 = arith.truncf %546 : vector<8x128xf32> to vector<8x128xbf16>
    %c0_233 = arith.constant 0 : index
    %c0_234 = arith.constant 0 : index
    %550 = vector.load %arg13[%c0_233, %c0_234] : memref<128x512xbf16, #tpu.memory_space<vmem>>, vector<128x512xbf16>
    %cst_235 = arith.constant dense<0.000000e+00> : vector<8x512xf32>
    %551 = tpu.matmul %549, %550, %cst_235 {dimension_numbers = #tpu.dot_dimension_numbers<[1], [0], [0], [1], [0, 0, 1, 1], [], []>} : vector<8x128xbf16>, vector<128x512xbf16>, vector<8x512xf32> -> vector<8x512xf32>
    %552 = arith.addf %548, %551 : vector<8x512xf32>
    %553 = vector.extract_strided_slice %552 {offsets = [0, 0], sizes = [8, 128], strides = [1, 1]} : vector<8x512xf32> to vector<8x128xf32>
    %cst_236 = arith.constant 5.000000e-01 : f32
    %554 = vector.broadcast %cst_236 : f32 to vector<8x128xf32>
    %555 = arith.mulf %554, %553 : vector<8x128xf32>
    %556 = math.tanh %555 : vector<8x128xf32>
    %cst_237 = arith.constant 5.000000e-01 : f32
    %557 = vector.broadcast %cst_237 : f32 to vector<8x128xf32>
    %558 = arith.mulf %557, %556 : vector<8x128xf32>
    %cst_238 = arith.constant 5.000000e-01 : f32
    %559 = vector.broadcast %cst_238 : f32 to vector<8x128xf32>
    %560 = arith.addf %558, %559 : vector<8x128xf32>
    %561 = vector.extract_strided_slice %552 {offsets = [0, 128], sizes = [8, 128], strides = [1, 1]} : vector<8x512xf32> to vector<8x128xf32>
    %cst_239 = arith.constant 5.000000e-01 : f32
    %562 = vector.broadcast %cst_239 : f32 to vector<8x128xf32>
    %563 = arith.mulf %562, %561 : vector<8x128xf32>
    %564 = math.tanh %563 : vector<8x128xf32>
    %cst_240 = arith.constant 5.000000e-01 : f32
    %565 = vector.broadcast %cst_240 : f32 to vector<8x128xf32>
    %566 = arith.mulf %565, %564 : vector<8x128xf32>
    %cst_241 = arith.constant 5.000000e-01 : f32
    %567 = vector.broadcast %cst_241 : f32 to vector<8x128xf32>
    %568 = arith.addf %566, %567 : vector<8x128xf32>
    %569 = vector.extract_strided_slice %552 {offsets = [0, 256], sizes = [8, 128], strides = [1, 1]} : vector<8x512xf32> to vector<8x128xf32>
    %570 = math.tanh %569 : vector<8x128xf32>
    %571 = vector.extract_strided_slice %552 {offsets = [0, 384], sizes = [8, 128], strides = [1, 1]} : vector<8x512xf32> to vector<8x128xf32>
    %cst_242 = arith.constant 5.000000e-01 : f32
    %572 = vector.broadcast %cst_242 : f32 to vector<8x128xf32>
    %573 = arith.mulf %572, %571 : vector<8x128xf32>
    %574 = math.tanh %573 : vector<8x128xf32>
    %cst_243 = arith.constant 5.000000e-01 : f32
    %575 = vector.broadcast %cst_243 : f32 to vector<8x128xf32>
    %576 = arith.mulf %575, %574 : vector<8x128xf32>
    %cst_244 = arith.constant 5.000000e-01 : f32
    %577 = vector.broadcast %cst_244 : f32 to vector<8x128xf32>
    %578 = arith.addf %576, %577 : vector<8x128xf32>
    %579 = arith.mulf %568, %544 : vector<8x128xf32>
    %580 = arith.mulf %560, %570 : vector<8x128xf32>
    %581 = arith.addf %579, %580 : vector<8x128xf32>
    %582 = math.tanh %581 : vector<8x128xf32>
    %583 = arith.mulf %578, %582 : vector<8x128xf32>
    %c48_245 = arith.constant 48 : index
    %c0_246 = arith.constant 0 : index
    %584 = vector.load %arg19[%c48_245, %c0_246] : memref<64x128xf32, #tpu.memory_space<vmem>>, vector<8x128xf32>
    tpu.vector_store %arg19[%c48_245, %c0_246], %583 {strides = array<i32>} : memref<64x128xf32, #tpu.memory_space<vmem>>, vector<8x128xf32>,
    %c56_247 = arith.constant 56 : index
    %c512_248 = arith.constant 512 : index
    %585 = vector.load %arg18[%c56_247, %c512_248] : memref<64x1024xf32, #tpu.memory_space<vmem>>, vector<8x512xf32>
    %586 = arith.truncf %583 : vector<8x128xf32> to vector<8x128xbf16>
    %c0_249 = arith.constant 0 : index
    %c0_250 = arith.constant 0 : index
    %587 = vector.load %arg13[%c0_249, %c0_250] : memref<128x512xbf16, #tpu.memory_space<vmem>>, vector<128x512xbf16>
    %cst_251 = arith.constant dense<0.000000e+00> : vector<8x512xf32>
    %588 = tpu.matmul %586, %587, %cst_251 {dimension_numbers = #tpu.dot_dimension_numbers<[1], [0], [0], [1], [0, 0, 1, 1], [], []>} : vector<8x128xbf16>, vector<128x512xbf16>, vector<8x512xf32> -> vector<8x512xf32>
    %589 = arith.addf %585, %588 : vector<8x512xf32>
    %590 = vector.extract_strided_slice %589 {offsets = [0, 0], sizes = [8, 128], strides = [1, 1]} : vector<8x512xf32> to vector<8x128xf32>
    %cst_252 = arith.constant 5.000000e-01 : f32
    %591 = vector.broadcast %cst_252 : f32 to vector<8x128xf32>
    %592 = arith.mulf %591, %590 : vector<8x128xf32>
    %593 = math.tanh %592 : vector<8x128xf32>
    %cst_253 = arith.constant 5.000000e-01 : f32
    %594 = vector.broadcast %cst_253 : f32 to vector<8x128xf32>
    %595 = arith.mulf %594, %593 : vector<8x128xf32>
    %cst_254 = arith.constant 5.000000e-01 : f32
    %596 = vector.broadcast %cst_254 : f32 to vector<8x128xf32>
    %597 = arith.addf %595, %596 : vector<8x128xf32>
    %598 = vector.extract_strided_slice %589 {offsets = [0, 128], sizes = [8, 128], strides = [1, 1]} : vector<8x512xf32> to vector<8x128xf32>
    %cst_255 = arith.constant 5.000000e-01 : f32
    %599 = vector.broadcast %cst_255 : f32 to vector<8x128xf32>
    %600 = arith.mulf %599, %598 : vector<8x128xf32>
    %601 = math.tanh %600 : vector<8x128xf32>
    %cst_256 = arith.constant 5.000000e-01 : f32
    %602 = vector.broadcast %cst_256 : f32 to vector<8x128xf32>
    %603 = arith.mulf %602, %601 : vector<8x128xf32>
    %cst_257 = arith.constant 5.000000e-01 : f32
    %604 = vector.broadcast %cst_257 : f32 to vector<8x128xf32>
    %605 = arith.addf %603, %604 : vector<8x128xf32>
    %606 = vector.extract_strided_slice %589 {offsets = [0, 256], sizes = [8, 128], strides = [1, 1]} : vector<8x512xf32> to vector<8x128xf32>
    %607 = math.tanh %606 : vector<8x128xf32>
    %608 = vector.extract_strided_slice %589 {offsets = [0, 384], sizes = [8, 128], strides = [1, 1]} : vector<8x512xf32> to vector<8x128xf32>
    %cst_258 = arith.constant 5.000000e-01 : f32
    %609 = vector.broadcast %cst_258 : f32 to vector<8x128xf32>
    %610 = arith.mulf %609, %608 : vector<8x128xf32>
    %611 = math.tanh %610 : vector<8x128xf32>
    %cst_259 = arith.constant 5.000000e-01 : f32
    %612 = vector.broadcast %cst_259 : f32 to vector<8x128xf32>
    %613 = arith.mulf %612, %611 : vector<8x128xf32>
    %cst_260 = arith.constant 5.000000e-01 : f32
    %614 = vector.broadcast %cst_260 : f32 to vector<8x128xf32>
    %615 = arith.addf %613, %614 : vector<8x128xf32>
    %616 = arith.mulf %605, %581 : vector<8x128xf32>
    %617 = arith.mulf %597, %607 : vector<8x128xf32>
    %618 = arith.addf %616, %617 : vector<8x128xf32>
    %619 = math.tanh %618 : vector<8x128xf32>
    %620 = arith.mulf %615, %619 : vector<8x128xf32>
    %c56_261 = arith.constant 56 : index
    %c0_262 = arith.constant 0 : index
    %621 = vector.load %arg19[%c56_261, %c0_262] : memref<64x128xf32, #tpu.memory_space<vmem>>, vector<8x128xf32>
    tpu.vector_store %arg19[%c56_261, %c0_262], %620 {strides = array<i32>} : memref<64x128xf32, #tpu.memory_space<vmem>>, vector<8x128xf32>,
    %c0_263 = arith.constant 0 : index
    %c0_264 = arith.constant 0 : index
    %622 = vector.load %arg19[%c0_263, %c0_264] : memref<64x128xf32, #tpu.memory_space<vmem>>, vector<64x128xf32>
    %623 = arith.truncf %622 : vector<64x128xf32> to vector<64x128xbf16>
    %c0_265 = arith.constant 0 : index
    %c0_266 = arith.constant 0 : index
    %624 = vector.load %arg14[%c0_265, %c0_266] : memref<128x128xbf16, #tpu.memory_space<vmem>>, vector<128x128xbf16>
    %cst_267 = arith.constant dense<0.000000e+00> : vector<64x128xf32>
    %625 = tpu.matmul %623, %624, %cst_267 {dimension_numbers = #tpu.dot_dimension_numbers<[1], [0], [0], [1], [0, 0, 1, 1], [], []>} : vector<64x128xbf16>, vector<128x128xbf16>, vector<64x128xf32> -> vector<64x128xf32>
    %c0_268 = arith.constant 0 : index
    %c0_269 = arith.constant 0 : index
    %626 = vector.load %arg15[%c0_268, %c0_269] : memref<1x128xf32, #tpu.memory_space<vmem>>, vector<1x128xf32>
    %627 = vector.broadcast %626 : vector<1x128xf32> to vector<64x128xf32>
    %628 = arith.addf %625, %627 : vector<64x128xf32>
    %c0_270 = arith.constant 0 : index
    %c0_271 = arith.constant 0 : index
    %629 = vector.load %arg16[%c0_270, %c0_271] : memref<64x128xf32, #tpu.memory_space<vmem>>, vector<64x128xf32>
    tpu.vector_store %arg16[%c0_270, %c0_271], %628 {strides = array<i32>} : memref<64x128xf32, #tpu.memory_space<vmem>>, vector<64x128xf32>,
    return
  }
  func.func @transform_0(%arg0: i32) -> (i32, i32) {
    %c0_i32 = arith.constant 0 : i32
    %c0_i32_0 = arith.constant 0 : i32
    %c0_i32_1 = arith.constant 0 : i32
    return %c0_i32, %c0_i32_0 : i32, i32
  }
  func.func @transform_1(%arg0: i32) -> (i32, i32) {
    %c0_i32 = arith.constant 0 : i32
    %c0_i32_0 = arith.constant 0 : i32
    %c0_i32_1 = arith.constant 0 : i32
    return %c0_i32, %c0_i32_0 : i32, i32
  }
  func.func @transform_2(%arg0: i32) -> (i32, i32) {
    %c0_i32 = arith.constant 0 : i32
    %c0_i32_0 = arith.constant 0 : i32
    %c0_i32_1 = arith.constant 0 : i32
    return %c0_i32, %c0_i32_0 : i32, i32
  }
  func.func @transform_3(%arg0: i32) -> (i32, i32) {
    %c0_i32 = arith.constant 0 : i32
    %c0_i32_0 = arith.constant 0 : i32
    %c0_i32_1 = arith.constant 0 : i32
    return %c0_i32, %c0_i32_0 : i32, i32
  }
  func.func @transform_4(%arg0: i32) -> (i32, i32) {
    %c0_i32 = arith.constant 0 : i32
    %c0_i32_0 = arith.constant 0 : i32
    %c0_i32_1 = arith.constant 0 : i32
    return %c0_i32, %c0_i32_0 : i32, i32
  }
  func.func @transform_5(%arg0: i32) -> (i32, i32) {
    %c0_i32 = arith.constant 0 : i32
    %c0_i32_0 = arith.constant 0 : i32
    %c0_i32_1 = arith.constant 0 : i32
    return %c0_i32, %c0_i32_0 : i32, i32
  }
  func.func @transform_6(%arg0: i32) -> (i32, i32) {
    %c0_i32 = arith.constant 0 : i32
    %c0_i32_0 = arith.constant 0 : i32
    %c0_i32_1 = arith.constant 0 : i32
    return %c0_i32, %c0_i32_0 : i32, i32
  }
  func.func @transform_7(%arg0: i32) -> (i32, i32) {
    %c0_i32 = arith.constant 0 : i32
    %c0_i32_0 = arith.constant 0 : i32
    %c0_i32_1 = arith.constant 0 : i32
    return %c0_i32, %c0_i32_0 : i32, i32
  }
  func.func @transform_8(%arg0: i32) -> (i32, i32) {
    %c0_i32 = arith.constant 0 : i32
    %c0_i32_0 = arith.constant 0 : i32
    %c0_i32_1 = arith.constant 0 : i32
    return %c0_i32, %c0_i32_0 : i32, i32
  }
  func.func @transform_9(%arg0: i32) -> (i32, i32) {
    %c0_i32 = arith.constant 0 : i32
    %c0_i32_0 = arith.constant 0 : i32
    %c0_i32_1 = arith.constant 0 : i32
    return %c0_i32, %c0_i32_0 : i32, i32
  }
  func.func @transform_10(%arg0: i32) -> (i32, i32) {
    %c0_i32 = arith.constant 0 : i32
    %c0_i32_0 = arith.constant 0 : i32
    %c0_i32_1 = arith.constant 0 : i32
    return %c0_i32, %c0_i32_0 : i32, i32
  }
  func.func @transform_11(%arg0: i32) -> (i32, i32) {
    %c0_i32 = arith.constant 0 : i32
    %c0_i32_0 = arith.constant 0 : i32
    %c0_i32_1 = arith.constant 0 : i32
    return %c0_i32, %c0_i32_0 : i32, i32
  }
  func.func @transform_12(%arg0: i32) -> (i32, i32) {
    %c0_i32 = arith.constant 0 : i32
    %c0_i32_0 = arith.constant 0 : i32
    %c0_i32_1 = arith.constant 0 : i32
    return %c0_i32, %c0_i32_0 : i32, i32
  }
  func.func @transform_13(%arg0: i32) -> (i32, i32) {
    %c0_i32 = arith.constant 0 : i32
    %c0_i32_0 = arith.constant 0 : i32
    %c0_i32_1 = arith.constant 0 : i32
    return %c0_i32, %c0_i32_0 : i32, i32
  }
  func.func @transform_14(%arg0: i32) -> (i32, i32) {
    %c0_i32 = arith.constant 0 : i32
    %c0_i32_0 = arith.constant 0 : i32
    %c0_i32_1 = arith.constant 0 : i32
    return %c0_i32, %c0_i32_0 : i32, i32
  }
  func.func @transform_15(%arg0: i32) -> (i32, i32) {
    %c0_i32 = arith.constant 0 : i32
    %c0_i32_0 = arith.constant 0 : i32
    %c0_i32_1 = arith.constant 0 : i32
    return %c0_i32, %c0_i32_0 : i32, i32
  }
  func.func @transform_16(%arg0: i32) -> (i32, i32) {
    %c0_i32 = arith.constant 0 : i32
    %c0_i32_0 = arith.constant 0 : i32
    %c0_i32_1 = arith.constant 0 : i32
    return %c0_i32, %c0_i32_0 : i32, i32
  }
}

</mosaic_0001>

<bundles_post_ra>
// kernel: bae_lstm_forward.1
= control target key start
LH: loop header
LB: loop body
LE: loop exit
PB: predicated region body
PF: predicated region fallthrough
CT: control target
= control target key end

     0   :  { %s7458_s0 = inlined_call_operand.vmem [shape: s32[64,1], index: 0, kind: input, shape index: {}]   ;;  %s7459_s1 = inlined_call_operand.vmem [shape: bf16[64,16], index: 1, kind: input, shape index: {}]   ;;  %s7460_s2 = inlined_call_operand.vmem [shape: f32[8,128], index: 2, kind: input, shape index: {}]   ;;  %s7461_s3 = inlined_call_operand.vmem [shape: bf16[128,128], index: 3, kind: input, shape index: {}]   ;;  %s7462_s4 = inlined_call_operand.hbm [shape: f32[1,128], index: 4, kind: input, shape index: {}]   ;;  %s7463_s5 = inlined_call_operand.vmem [shape: bf16[16,1024], index: 5, kind: input, shape index: {}]   ;;  %s7464_s6 = inlined_call_operand.vmem [shape: f32[1,1024], index: 6, kind: input, shape index: {}]   ;;  %s7465_s7 = inlined_call_operand.hbm [shape: bf16[128,512], index: 7, kind: input, shape index: {}]   ;;  %s7466_s8 = inlined_call_operand.hbm [shape: bf16[128,128], index: 8, kind: input, shape index: {}]   ;;  %s7467_s9 = inlined_call_operand.hbm [shape: f32[1,128], index: 9, kind: input, shape index: {}]   ;;  %s7468_s10 = inlined_call_operand.hbm [shape: bf16[128,128], index: 10, kind: input, shape index: {}]   ;;  %s7469_s11 = inlined_call_operand.hbm [shape: f32[1,128], index: 11, kind: input, shape index: {}]   ;;  %s7470_s12 = inlined_call_operand.hbm [shape: bf16[128,512], index: 12, kind: input, shape index: {}]   ;;  %s7471_s13 = inlined_call_operand.hbm [shape: bf16[128,128], index: 13, kind: input, shape index: {}]   ;;  %s7472_s14 = inlined_call_operand.hbm [shape: f32[1,128], index: 14, kind: input, shape index: {}]   ;;  %s7473_s15 = inlined_call_operand.hbm [shape: f32[64,128], index: 15, kind: output, shape index: {0}]   ;;  %s7474_s16 = inlined_call_operand.hbm [shape: f32[8,128], index: 16, kind: output, shape index: {1}]  }
   0x1   :  { %7485 = sst [smem:[#allocation85_spill]] %s7458_s0 }
   0x2   :  { %22 = vsyncpa [#allocation5], 0 }
   0x3   :  { %23 = vsyncpa [#allocation8], 0 }
   0x4   :  { %24 = vsyncpa [#allocation11], 0 }
   0x5   :  { %25 = vsyncpa [#allocation14], 0 }
   0x6   :  { %26 = vsyncpa [#allocation17], 0 }
   0x7   :  { %27 = vsyncpa [#allocation6], 0 }
   0x8   :  { %28 = vsyncpa [#allocation21], 0  ;;  %s5954_s21 = smov [#allocation7]  }
   0x9   :  { %s56_s22 = sshll.u32 %s5954_s21, 4  ;;  %s57_s22 = int_to_ptr.vmem [resolvable:$true] %s56_s22 }
   0xa   :  { %s5728_s23 = scalar_lea.vmem %s57_s22, 4096  ;;  %p5733_p1 = scmp.lt.s32.totalorder %s57_s22, %s57_s22 }
   0xb   :  { %p5729_p0 = scmp.ne.s32.totalorder %s57_s22, %s5728_s23  ;;  %p5734_p2 = scmp.lt.s32.totalorder %s5728_s23, %s5728_s23 }
   0xd   :  { %p5735_p3 = por %p5734_p2, %p5733_p1 }
   0xf   :  { %p5736_p4 = pnand %p5735_p3, %p5729_p0 }
  0x11   :  { %5739 = shalt.err (!%p5736_p4)
}
  0x12   :  { %s5955_s24 = smov 256   ;;  %s5956_s25 = smov 16  }
  0x13   :  { %62 = dma.hbm_to_vmem [thread:$0]  %s7465_s7, 4096, %s57_s22, [#allocation8], %s5955_s24, %s5955_s24, %s5956_s25  }
  0x14   :  { %s5957_s28 = smov [#allocation10]   ;;  %s5958_s30 = smov [#allocation13]  }
  0x15   :  { %s81_s29 = sshll.u32 %s5957_s28, 4  ;;  %s103_s0 = sshll.u32 %s5958_s30, 4  ;;  %s82_s29 = int_to_ptr.vmem [resolvable:$true] %s81_s29  ;;  %s104_s0 = int_to_ptr.vmem [resolvable:$true] %s103_s0 }
  0x16   :  { %s5748_s17 = scalar_lea.vmem %s82_s29, 16  ;;  %s5752_s18 = scalar_lea.vmem %s82_s29, 32 }
  0x17   :  { %p5749_p5 = scmp.ne.s32.totalorder %s82_s29, %s5748_s17  ;;  %p5753_p6 = scmp.lt.s32.totalorder %s82_s29, %s82_s29 }
  0x18   :  { %p5754_p7 = scmp.lt.s32.totalorder %s5752_s18, %s5748_s17 }
  0x1a   :  { %p5755_p8 = por %p5754_p7, %p5753_p6 }
  0x1c   :  { %p5756_p9 = pnand %p5755_p8, %p5749_p5 }
  0x1e   :  { %5759 = shalt.err (!%p5756_p9)
}
  0x1f   :  { %84 = dma.hbm_to_vmem [thread:$0]  %s7467_s9, 16, %s82_s29, [#allocation11]  }
  0x20   :  { %s5768_s21 = scalar_lea.vmem %s104_s0, 16  ;;  %s5772_s7 = scalar_lea.vmem %s104_s0, 32 }
  0x21   :  { %p5769_p10 = scmp.ne.s32.totalorder %s104_s0, %s5768_s21  ;;  %p5773_p11 = scmp.lt.s32.totalorder %s104_s0, %s104_s0 }
  0x22   :  { %p5774_p12 = scmp.lt.s32.totalorder %s5772_s7, %s5768_s21 }
  0x24   :  { %p5775_p13 = por %p5774_p12, %p5773_p11 }
  0x26   :  { %p5776_p0 = pnand %p5775_p13, %p5769_p10 }
  0x28   :  { %5779 = shalt.err (!%p5776_p0)
}
  0x29   :  { %106 = dma.hbm_to_vmem [thread:$0]  %s7469_s11, 16, %s104_s0, [#allocation14]  }
  0x2a   :  { %s5959_s26 = smov [#allocation16]   ;;  %s5960_s28 = smov [#allocation4]  }
  0x2b   :  { %s124_s27 = sshll.u32 %s5959_s26, 4  ;;  %s43_s30 = sshll.u32 %s5960_s28, 4  ;;  %s125_s27 = int_to_ptr.vmem [resolvable:$true] %s124_s27  ;;  %s44_s30 = int_to_ptr.vmem [resolvable:$true] %s43_s30 }
  0x2c   :  { %s5788_s17 = scalar_lea.vmem %s125_s27, 1024  ;;  %p5793_p2 = scmp.lt.s32.totalorder %s125_s27, %s125_s27 }
  0x2d   :  { %p5789_p1 = scmp.ne.s32.totalorder %s125_s27, %s5788_s17  ;;  %p5794_p3 = scmp.lt.s32.totalorder %s5788_s17, %s5788_s17 }
  0x2f   :  { %p5795_p4 = por %p5794_p3, %p5793_p2 }
  0x31   :  { %p5796_p5 = pnand %p5795_p4, %p5789_p1 }
  0x33   :  { %5799 = shalt.err (!%p5796_p5)
}
  0x34   :  { %s5961_s9 = smov 64   ;;  %s5962_s29 = smov 4  }
  0x35   :  { %130 = dma.hbm_to_vmem [thread:$0]  %s7471_s13, 1024, %s125_s27, [#allocation17], %s5961_s9, %s5961_s9, %s5962_s29  }
  0x36   :  { %s5808_s11 = scalar_lea.vmem %s44_s30, 16  ;;  %s5812_s0 = scalar_lea.vmem %s44_s30, 32 }
  0x37   :  { %p5809_p6 = scmp.ne.s32.totalorder %s44_s30, %s5808_s11  ;;  %p5813_p7 = scmp.lt.s32.totalorder %s44_s30, %s44_s30 }
  0x38   :  { %p5814_p8 = scmp.lt.s32.totalorder %s5812_s0, %s5808_s11 }
  0x3a   :  { %p5815_p9 = por %p5814_p8, %p5813_p7 }
  0x3c   :  { %p5816_p10 = pnand %p5815_p9, %p5809_p6 }
  0x3e   :  { %5819 = shalt.err (!%p5816_p10)
}
  0x3f   :  { %46 = dma.hbm_to_vmem [thread:$0]  %s7462_s4, 16, %s44_s30, [#allocation5]  }
  0x40   :  { %s5963_s7 = smov [#allocation9]   ;;  %s5964_s23 = smov [#allocation12]  }
  0x41   :  { %s68_s22 = sshll.u32 %s5963_s7, 4  ;;  %s90_s26 = sshll.u32 %s5964_s23, 4  ;;  %s69_s22 = int_to_ptr.vmem [resolvable:$true] %s68_s22  ;;  %s91_s26 = int_to_ptr.vmem [resolvable:$true] %s90_s26 }
  0x42   :  { %s5828_s28 = scalar_lea.vmem %s69_s22, 1024  ;;  %p5833_p12 = scmp.lt.s32.totalorder %s69_s22, %s69_s22 }
  0x43   :  { %p5829_p11 = scmp.ne.s32.totalorder %s69_s22, %s5828_s28  ;;  %p5834_p13 = scmp.lt.s32.totalorder %s5828_s28, %s5828_s28 }
  0x45   :  { %p5835_p0 = por %p5834_p13, %p5833_p12 }
  0x47   :  { %p5836_p1 = pnand %p5835_p0, %p5829_p11 }
  0x49   :  { %5839 = shalt.err (!%p5836_p1)
}
  0x4a   :  { %74 = dma.hbm_to_vmem [thread:$0]  %s7466_s8, 1024, %s69_s22, [#allocation8], %s5961_s9, %s5961_s9, %s5962_s29  }
  0x4b   :  { %s5848_s4 = scalar_lea.vmem %s91_s26, 1024  ;;  %p5853_p3 = scmp.lt.s32.totalorder %s91_s26, %s91_s26 }
  0x4c   :  { %p5849_p2 = scmp.ne.s32.totalorder %s91_s26, %s5848_s4  ;;  %p5854_p4 = scmp.lt.s32.totalorder %s5848_s4, %s5848_s4 }
  0x4e   :  { %p5855_p5 = por %p5854_p4, %p5853_p3 }
  0x50   :  { %p5856_p6 = pnand %p5855_p5, %p5849_p2 }
  0x52   :  { %5859 = shalt.err (!%p5856_p6)
}
  0x53   :  { %96 = dma.hbm_to_vmem [thread:$0]  %s7468_s10, 1024, %s91_s26, [#allocation11], %s5961_s9, %s5961_s9, %s5962_s29  }
  0x54   :  { %s5965_s18 = smov [#allocation15]   ;;  %s5966_s11 = smov [#allocation18]  }
  0x55   :  { %s112_s19 = sshll.u32 %s5965_s18, 4  ;;  %s137_s8 = sshll.u32 %s5966_s11, 4  ;;  %s113_s19 = int_to_ptr.vmem [resolvable:$true] %s112_s19  ;;  %s138_s8 = int_to_ptr.vmem [resolvable:$true] %s137_s8 }
  0x56   :  { %s5868_s0 = scalar_lea.vmem %s113_s19, 4096  ;;  %p5873_p8 = scmp.lt.s32.totalorder %s113_s19, %s113_s19 }
  0x57   :  { %p5869_p7 = scmp.ne.s32.totalorder %s113_s19, %s5868_s0  ;;  %p5874_p9 = scmp.lt.s32.totalorder %s5868_s0, %s5868_s0 }
  0x59   :  { %p5875_p10 = por %p5874_p9, %p5873_p8 }
  0x5b   :  { %p5876_p11 = pnand %p5875_p10, %p5869_p7 }
  0x5d   :  { %5879 = shalt.err (!%p5876_p11)
}
  0x5e   :  { %118 = dma.hbm_to_vmem [thread:$0]  %s7470_s12, 4096, %s113_s19, [#allocation14], %s5955_s24, %s5955_s24, %s5956_s25  }
  0x5f   :  { %s5888_s10 = scalar_lea.vmem %s138_s8, 16  ;;  %s5892_s9 = scalar_lea.vmem %s138_s8, 32 }
  0x60   :  { %p5889_p12 = scmp.ne.s32.totalorder %s138_s8, %s5888_s10  ;;  %p5893_p13 = scmp.lt.s32.totalorder %s138_s8, %s138_s8 }
  0x61   :  { %p5894_p0 = scmp.lt.s32.totalorder %s5892_s9, %s5888_s10 }
  0x63   :  { %p5895_p1 = por %p5894_p0, %p5893_p13 }
  0x65   :  { %p5896_p2 = pnand %p5895_p1, %p5889_p12 }
  0x67   :  { %5899 = shalt.err (!%p5896_p2)
}
  0x68   :  { %140 = dma.hbm_to_vmem [thread:$0]  %s7472_s14, 16, %s138_s8, [#allocation17]  }
  0x69   :  { %5940 = dma.done.wait [#allocation5], 16  }
  0x6a   :  { %5941 = vsyncadd [#allocation5], 4294967280 }
  0x6b   :  { %5942 = dma.done.wait [#allocation8], 5120  }
  0x6c   :  { %5943 = vsyncadd [#allocation8], 4294962176 }
  0x6d   :  { %5944 = dma.done.wait [#allocation11], 1040  }
  0x6e   :  { %5945 = vsyncadd [#allocation11], 4294966256 }
  0x6f   :  { %5946 = dma.done.wait [#allocation14], 4112  }
  0x70   :  { %5947 = vsyncadd [#allocation14], 4294963184 }
  0x71   :  { %5948 = dma.done.wait [#allocation17], 1040  }
  0x72   :  { %5949 = vsyncadd [#allocation17], 4294966256  ;;  %v7478_v0 = vmov 0   ;;  %s7486_s14 = sld [smem:[#allocation85_spill]]  ;;  %v5348_v5 = vld [vmem:[%s7459_s1 + $0x18] sm:$0xff]   ;;  %v5349_v7 = vld [vmem:[%s7459_s1 + $0x10] sm:$0xff]   ;;  %v177_v13 = vlaneseq }
  0x73   :  { %5347 = vset.pattern.permute.xlu1 %v7478_v0  ;;  %5346 = vset.pattern.permute.xlu0 %v7478_v0  ;;  %v5350_v9 = vld [vmem:[%s7459_s1 + $0x8] sm:$0xff]   ;;  %v5351_v12 = vld [vmem:[%s7459_s1] sm:$0xff]   ;;  %vm263_vm4 = vcmask 523264   ;;  %v7476_v19 = vmov 0.0   ;;  %v348_v44 = vld [vmem:[%s7463_s5 + $0x18] sm:$0xff]  ;;  %vm435_vm9 = vcmask 130048  }
  0x74   :  { %480 = vmatprep.mubr.bf16.mxu1 %v7478_v0  ;;  %5224 = vmatprep.subr.bf16.mxu0 %v5348_v5  ;;  %v178_v14 = vand.u32 127, %v177_v13  ;;  %v345_v36 = vld [vmem:[%s7463_s5] sm:$0xff]  ;;  %v346_v38 = vld [vmem:[%s7463_s5 + $0x8] sm:$0xff]  ;;  %v352_v45 = vld [vmem:[%s7463_s5 + $0x38] sm:$0xff]  ;;  %vm5969_vm10 = vmmov 0  }
  0x75   :  { %5225 = vmatpush3.bf16.msra.mxu0 %v5348_v5  ;;  %v349_v37 = vld [vmem:[%s7463_s5 + $0x20] sm:$0xff]  ;;  %v350_v40 = vld [vmem:[%s7463_s5 + $0x28] sm:$0xff]  ;;  %v4835_v46 = vcombine.low %v348_v44, %v352_v45  ;;  %v4836_v47 = vcombine.high %v348_v44, %v352_v45  ;;  %v347_v51 = vld [vmem:[%s7463_s5 + $0x10] sm:$0xff]  ;;  %v6346_v45 = vshrl.u32 %v177_v13, 7 }
  0x76   :  { %5226 = vmatprep.subr.bf16.mxu0 %v5349_v7  ;;  %v4830_v39 = vcombine.high %v345_v36, %v349_v37  ;;  %v4829_v41 = vcombine.low %v345_v36, %v349_v37  ;;  %v4831_v42 = vcombine.low %v346_v38, %v350_v40  ;;  %v4832_v43 = vcombine.high %v346_v38, %v350_v40  ;;  %v351_v52 = vld [vmem:[%s7463_s5 + $0x30] sm:$0xff]  ;;  %v5356_v5 = vld [vmem:[%s7461_s3 + $0x18] sm:$0xff]  }
  0x77   :  { %v4834_v56 = vcombine.high %v347_v51, %v351_v52  ;;  %v4833_v63 = vcombine.low %v347_v51, %v351_v52  ;;  %v6313_v36 = vld [vmem:[#allocation7 + $0x48] ss:$16 sps:$4 sm:$0xff]   ;;  %v6319_v37 = vld [vmem:[#allocation7 + $0x24] ss:$16 sps:$4 sm:$0xff]   ;;  %v6321_v38 = vld [vmem:[#allocation7 + $0x2c] ss:$16 sps:$4 sm:$0xff]  }
  0x78   :  { %v171_v1 = vld [vmem:[%s7486_s14 + $0x10] sm:$0xff]  ;;  %v169_v2 = vld [vmem:[%s7486_s14] sm:$0xff]  ;;  %v172_v3 = vld [vmem:[%s7486_s14 + $0x18] sm:$0xff]  ;;  %462 = vmatprep.subr.bf16.mxu1 %v4830_v39  ;;  %v361_v51 = vsub.s32 1, %v6346_v45  ;;  %v369_v52 = vsub.s32 3, %v6346_v45 }
  0x79   :  { %186 = vperm.xlu1 %5347, %v171_v1   ;;  %180 = vperm.xlu0 %5346, %v169_v2   ;;  %v170_v4 = vld [vmem:[%s7486_s14 + $0x8] sm:$0xff]  ;;  %v173_v8 = vld [vmem:[%s7486_s14 + $0x20] sm:$0xff]  ;;  %v176_v10 = vld [vmem:[%s7486_s14 + $0x38] sm:$0xff] }
  0x7a   :  { %v174_v6 = vld [vmem:[%s7486_s14 + $0x28] sm:$0xff]  ;;  %v175_v11 = vld [vmem:[%s7486_s14 + $0x30] sm:$0xff]  ;;  %5227 = vmatpush3.bf16.msra.mxu0 %v5349_v7  ;;  %463 = vmatpush1.bf16.msra.mxu1 %v4829_v41  ;;  %v5352_v1 = vld [vmem:[%s7461_s3 + $0x38] sm:$0xff]  }
  0x7b   :  { %5228 = vmatprep.subr.bf16.mxu0 %v5350_v9  ;;  %5324 = vmatprep.subr.bf16.mxu1 %v4832_v43  ;;  %v5353_v2 = vld [vmem:[%s7461_s3 + $0x30] sm:$0xff]   ;;  %v5358_v7 = vld [vmem:[%s7461_s3 + $0x8] sm:$0xff]  }
  0x7c   :  { %v6323_v39 = vld [vmem:[#allocation7 + $0x20] ss:$16 sps:$4 sm:$0xff]   ;;  %v6325_v40 = vld [vmem:[#allocation7 + $0x28] ss:$16 sps:$4 sm:$0xff]   ;;  %v6331_v41 = vld [vmem:[#allocation7 + $0x4] ss:$16 sps:$4 sm:$0xff]  }
  0x7d   :  { %189 = vperm.xlu1 %5347, %v172_v3   ;;  %183 = vperm.xlu0 %5346, %v170_v4   ;;  %v5354_v3 = vld [vmem:[%s7461_s3 + $0x28] sm:$0xff]   ;;  %v5355_v4 = vld [vmem:[%s7461_s3 + $0x20] sm:$0xff]  }
  0x7e   :  { %5229 = vmatpush3.bf16.msra.mxu0 %v5350_v9  ;;  %v804_v9 = vld [vmem:[%s7460_s2] sm:$0xff]  ;;  %v6337_v44 = vld [vmem:[#allocation7 + $0x8] ss:$16 sps:$4 sm:$0xff]  }
  0x7f   :  { %5230 = vmatprep.subr.bf16.mxu0 %v5351_v12 }
  0x81   :  { %195 = vperm.xlu1 %5347, %v174_v6   ;;  %192 = vperm.xlu0 %5346, %v173_v8   ;;  %v5357_v6 = vld [vmem:[%s7461_s3 + $0x10] sm:$0xff]   ;;  %v5359_v8 = vld [vmem:[%s7461_s3] sm:$0xff]  }
  0x82   :  { %5231 = vmatpush3.bf16.msra.mxu0 %v5351_v12  ;;  %v6249_v12 = vld [vmem:[#allocation7 + $0xec] ss:$16 sps:$4 sm:$0xff]  }
  0x83   :  { %535 = vmatprep.subr.bf16.mxu0 %v4832_v43  ;;  %v6335_v43 = vld [vmem:[#allocation7] ss:$16 sps:$4 sm:$0xff]  }
  0x85   :  { %201 = vperm.xlu1 %5347, %v176_v10   ;;  %198 = vperm.xlu0 %5346, %v175_v11   ;;  %v805_v10 = vpack.c.bf16 %v804_v9, %v804_v9  ;;  %v6247_v11 = vld [vmem:[#allocation7 + $0xe4] ss:$16 sps:$4 sm:$0xff]  }
  0xf4   :  { %v187_v15 = vpop.permute.xlu1 %186  ;;  %v181_v16 = vpop.permute.xlu0 %180 }
  0xf5   :  { %vm205_vm0 = vcmp.eq.s32.totalorder %v187_v15, %v178_v14  ;;  %vm203_vm1 = vcmp.eq.s32.totalorder %v181_v16, %v178_v14  ;;  %v6253_v15 = vld [vmem:[#allocation7 + $0xe8] ss:$16 sps:$4 sm:$0xff]   ;;  %v6259_v16 = vld [vmem:[#allocation7 + $0xc4] ss:$16 sps:$4 sm:$0xff]  }
  0xf6   :  { %v4815_v20 = vsel %vm205_vm0, 1.0, %v7476_v19  ;;  %v4813_v21 = vsel %vm203_vm1, 1.0, %v7476_v19 }
  0xf8   :  { %v190_v17 = vpop.permute.xlu1 %189  ;;  %v184_v18 = vpop.permute.xlu0 %183 }
  0xf9   :  { %vm206_vm2 = vcmp.eq.s32.totalorder %v190_v17, %v178_v14  ;;  %vm204_vm3 = vcmp.eq.s32.totalorder %v184_v18, %v178_v14  ;;  %v6261_v17 = vld [vmem:[#allocation7 + $0xcc] ss:$16 sps:$4 sm:$0xff]   ;;  %v6263_v18 = vld [vmem:[#allocation7 + $0xc0] ss:$16 sps:$4 sm:$0xff]  }
  0xfa   :  { %v4816_v22 = vsel %vm206_vm2, 1.0, %v7476_v19  ;;  %v4814_v23 = vsel %vm204_vm3, 1.0, %v7476_v19 }
  0xfb   :  { %v228_v24 = vpack.c.bf16 %v4816_v22, %v4815_v20  ;;  %v227_v25 = vpack.c.bf16 %v4814_v23, %v4813_v21  ;;  %v6265_v20 = vld [vmem:[#allocation7 + $0xc8] ss:$16 sps:$4 sm:$0xff]   ;;  %v6271_v21 = vld [vmem:[#allocation7 + $0xa4] ss:$16 sps:$4 sm:$0xff]   ;;  %v6273_v22 = vld [vmem:[#allocation7 + $0xac] ss:$16 sps:$4 sm:$0xff]  }
  0xfc   :  { %v196_v26 = vpop.permute.xlu1 %195  ;;  %v193_v27 = vpop.permute.xlu0 %192  ;;  %v6275_v23 = vld [vmem:[#allocation7 + $0xa0] ss:$16 sps:$4 sm:$0xff]  }
  0xfd   :  { %vm208_vm5 = vcmp.eq.s32.totalorder %v196_v26, %v178_v14  ;;  %vm207_vm6 = vcmp.eq.s32.totalorder %v193_v27, %v178_v14  ;;  %5232 = vmatprep.mubr.msk.bf16.mxu0 %vm263_vm4, %v227_v25  ;;  %v6283_v25 = vld [vmem:[#allocation7 + $0x84] ss:$16 sps:$4 sm:$0xff]   ;;  %v6285_v26 = vld [vmem:[#allocation7 + $0x8c] ss:$16 sps:$4 sm:$0xff]   ;;  %v6287_v27 = vld [vmem:[#allocation7 + $0x80] ss:$16 sps:$4 sm:$0xff]  }
  0xfe   :  { %v4818_v28 = vsel %vm208_vm5, 1.0, %v7476_v19  ;;  %v4817_v29 = vsel %vm207_vm6, 1.0, %v7476_v19  ;;  %5233 = vmatmul.mubr.msk.bf16.vlgmr.msra.gmra.mxu0 %vm263_vm4, %v228_v24  ;;  %v6277_v24 = vld [vmem:[#allocation7 + $0xa8] ss:$16 sps:$4 sm:$0xff]  }
  0xff   :  { %v229_v30 = vpack.c.bf16 %v4818_v28, %v4817_v29  ;;  %536 = vmatpush1.bf16.msra.mxu0 %v4831_v42  ;;  %v6289_v28 = vld [vmem:[#allocation7 + $0x88] ss:$16 sps:$4 sm:$0xff]   ;;  %v6295_v29 = vld [vmem:[#allocation7 + $0x64] ss:$16 sps:$4 sm:$0xff]  }
 0x100   :  { %v202_v31 = vpop.permute.xlu1 %201  ;;  %v199_v32 = vpop.permute.xlu0 %198  ;;  %681 = vmatprep.subr.bf16.mxu0 %v4836_v47  ;;  %v365_v47 = vsub.s32 2, %v6346_v45 }
 0x101   :  { %vm210_vm7 = vcmp.eq.s32.totalorder %v202_v31, %v178_v14  ;;  %vm209_vm8 = vcmp.eq.s32.totalorder %v199_v32, %v178_v14  ;;  %5236 = vmatprep.mubr.msk.bf16.mxu0 %vm263_vm4, %v229_v30  ;;  %v6251_v14 = vld [vmem:[#allocation7 + $0xe0] ss:$16 sps:$4 sm:$0xff]   ;;  %v6297_v30 = vld [vmem:[#allocation7 + $0x6c] ss:$16 sps:$4 sm:$0xff]   ;;  %v6301_v32 = vld [vmem:[#allocation7 + $0x68] ss:$16 sps:$4 sm:$0xff]  }
 0x102   :  { %v4820_v33 = vsel %vm210_vm7, 1.0, %v7476_v19  ;;  %v4819_v34 = vsel %vm209_vm8, 1.0, %v7476_v19  ;;  %v6299_v31 = vld [vmem:[#allocation7 + $0x60] ss:$16 sps:$4 sm:$0xff]  }
 0x103   :  { %v230_v35 = vpack.c.bf16 %v4820_v33, %v4819_v34  ;;  %v6307_v33 = vld [vmem:[#allocation7 + $0x44] ss:$16 sps:$4 sm:$0xff]   ;;  %v6309_v34 = vld [vmem:[#allocation7 + $0x4c] ss:$16 sps:$4 sm:$0xff]  }
 0x106   :  { %5237 = vmatmul.mubr.msk.bf16.gmra.mxu0 %vm263_vm4, %v230_v35  ;;  %v6311_v35 = vld [vmem:[#allocation7 + $0x40] ss:$16 sps:$4 sm:$0xff]  }
 0x107   :  { %553 = vmatprep.mubr.bf16.mxu0 %v7478_v0 }
 0x1be   :  { %v5234_v48 = vpop.f32.mrf.mxu0 }
 0x1c0   :  { %v310_v49 = vpop.f32.mrf.mxu0 }
 0x1c2   :  { %v5235_v50 = vpop.f32.mrf.mxu0 }
 0x1c3   :  { %v342_v58 = vpack.c.bf16 %v5235_v50, %v5234_v48  ;;  %v6353_v48 = vld [vmem:[%s7464_s6] sm:$0xff]  ;;  %s5970_s6 = smov [#allocation20]  }
 0x1c4   :  { %v313_v53 = vpop.f32.mrf.mxu0  ;;  %s4796_s13 = sshll.u32 %s5970_s6, 4  ;;  %s4797_s13 = int_to_ptr.vmem [resolvable:$true] %s4796_s13 }
 0x1c5   :  { %v341_v54 = vpack.c.bf16 %v313_v53, %v310_v49  ;;  %s5900_s27 = scalar_lea.vmem %s4797_s13, 128  ;;  %p5905_p4 = scmp.lt.s32.totalorder %s4797_s13, %s4797_s13 }
 0x1c6   :  { %v5238_v55 = vpop.f32.mrf.mxu0  ;;  %p5901_p3 = scmp.ne.s32.totalorder %s4797_s13, %s5900_s27  ;;  %p5906_p5 = scmp.lt.s32.totalorder %s5900_s27, %s5900_s27 }
 0x1c7   :  { %4837 = vmatmul.mubr.msk.bf16.vlgmr.msra.gmra.mxu1 %vm435_vm9, %v341_v54  ;;  %4841 = vmatmul.mubr.msk.bf16.vlgmr.msra.gmra.mxu0 %vm435_vm9, %v341_v54 }
 0x1c8   :  { %5325 = vmatpush1.bf16.msra.mxu1 %v4831_v42  ;;  %490 = vmatprep.mubr.bf16.mxu1 %v7478_v0  ;;  %v326_v57 = vpop.f32.mrf.mxu0  ;;  %v6333_v42 = vld [vmem:[#allocation7 + $0xc] ss:$16 sps:$4 sm:$0xff]   ;;  %p5907_p6 = por %p5906_p5, %p5905_p4 }
 0x1c9   :  { %563 = vmatprep.mubr.bf16.mxu0 %v7478_v0  ;;  %682 = vmatpush1.bf16.msra.mxu0 %v4835_v46  ;;  %v357_v46 = vsub.s32 0, %v6346_v45 }
 0x1ca   :  { %608 = vmatprep.subr.bf16.mxu1 %v4834_v56  ;;  %v5239_v59 = vpop.f32.mrf.mxu0  ;;  %1114 = vmatprep.subr.bf16.mxu0 %v6247_v11  ;;  %p5908_p7 = pnand %p5907_p6, %p5901_p3 }
 0x1cb   :  { %v344_v62 = vpack.c.bf16 %v5239_v59, %v5238_v55  ;;  %v6369_v55 = vrot.slane %v6353_v48, %v365_v47  ;;  %v6375_v59 = vrot.slane %v6353_v48, %v369_v52 }
 0x1cc   :  { %v329_v60 = vpop.f32.mrf.mxu0 }
 0x1cd   :  { %v343_v61 = vpack.c.bf16 %v329_v60, %v326_v57 }
 0x1cf   :  { %4838 = vmatmul.mubr.msk.bf16.gmra.mxu1 %vm435_vm9, %v342_v58  ;;  %4842 = vmatmul.mubr.msk.bf16.gmra.mxu0 %vm435_vm9, %v342_v58 }
 0x1d0   :  { %500 = vmatprep.mubr.bf16.mxu1 %v7478_v0  ;;  %699 = vmatprep.mubr.bf16.mxu0 %v7478_v0 }
 0x1d7   :  { %4839 = vmatmul.mubr.msk.bf16.gmra.mxu1 %vm435_vm9, %v343_v61  ;;  %4849 = vmatmul.mubr.msk.bf16.vlgmr.msra.gmra.mxu0 %vm435_vm9, %v341_v54 }
 0x1d8   :  { %510 = vmatprep.mubr.bf16.mxu1 %v7478_v0  ;;  %709 = vmatprep.mubr.bf16.mxu0 %v7478_v0 }
 0x1d9   :  { %1115 = vmatpush1.bf16.msra.mxu0 %v6251_v14 }
 0x1da   :  { %1116 = vmatprep.subr.bf16.mxu0 %v6259_v16 }
 0x1dd   :  { %1117 = vmatpush1.bf16.msra.mxu0 %v6263_v18 }
 0x1de   :  { %1118 = vmatprep.subr.bf16.mxu0 %v6271_v21 }
 0x1df   :  { %4840 = vmatmul.mubr.msk.bf16.gmra.mxu1 %vm435_vm9, %v344_v62  ;;  %4850 = vmatmul.mubr.msk.bf16.gmra.mxu0 %vm435_vm9, %v342_v58 }
 0x1e0   :  { %573 = vmatprep.mubr.bf16.mxu1 %v7478_v0  ;;  %719 = vmatprep.mubr.bf16.mxu0 %v7478_v0 }
 0x1e1   :  { %1119 = vmatpush1.bf16.msra.mxu0 %v6275_v23 }
 0x1e2   :  { %1120 = vmatprep.subr.bf16.mxu0 %v6283_v25 }
 0x1e5   :  { %1121 = vmatpush1.bf16.msra.mxu0 %v6287_v27 }
 0x1e6   :  { %1122 = vmatprep.subr.bf16.mxu0 %v6295_v29 }
 0x1e7   :  { %4843 = vmatmul.mubr.msk.bf16.vlgmr.msra.gmra.mxu1 %vm435_vm9, %v343_v61  ;;  %4851 = vmatmul.mubr.msk.bf16.gmra.mxu0 %vm435_vm9, %v343_v61 }
 0x1e8   :  { %609 = vmatpush1.bf16.msra.mxu1 %v4833_v63  ;;  %583 = vmatprep.mubr.bf16.mxu1 %v7478_v0 }
 0x1e9   :  { %729 = vmatprep.mubr.bf16.mxu0 %v7478_v0  ;;  %5240 = vmatprep.subr.bf16.mxu1 %v7476_v19 }
 0x1ea   :  { %1123 = vmatpush1.bf16.msra.mxu0 %v6299_v31 }
 0x1eb   :  { %1124 = vmatprep.subr.bf16.mxu0 %v6307_v33 }
 0x1ee   :  { %1125 = vmatpush1.bf16.msra.mxu0 %v6311_v35 }
 0x1ef   :  { %4844 = vmatmul.mubr.msk.bf16.gmra.mxu1 %vm435_vm9, %v344_v62  ;;  %4852 = vmatmul.mubr.msk.bf16.gmra.mxu0 %vm435_vm9, %v344_v62 }
 0x1f0   :  { %626 = vmatprep.mubr.bf16.mxu1 %v7478_v0  ;;  %1146 = vmatprep.mubr.bf16.mxu0 %v7478_v0 }
 0x1f1   :  { %1126 = vmatprep.subr.bf16.mxu0 %v6319_v37 }
 0x1f2   :  { %1127 = vmatpush1.bf16.msra.mxu0 %v6323_v39 }
 0x1f3   :  { %1128 = vmatprep.subr.bf16.mxu0 %v6331_v41 }
 0x1f6   :  { %1129 = vmatpush1.bf16.msra.mxu0 %v6335_v43 }
 0x1f7   :  { %4845 = vmatmul.mubr.msk.bf16.vlgmr.msra.gmra.mxu1 %vm435_vm9, %v341_v54  ;;  %1223 = vmatprep.subr.bf16.mxu0 %v6247_v11  ;;  %v6366_v54 = vrot.slane %v6353_v48, %v357_v46 }
 0x1f8   :  { %5241 = vmatpush3.bf16.msra.mxu1 %v5352_v1  ;;  %636 = vmatprep.mubr.bf16.mxu1 %v7478_v0 }
 0x1f9   :  { %5242 = vmatprep.subr.bf16.mxu1 %v7476_v19 }
 0x1fc   :  { %5243 = vmatpush3.bf16.msra.mxu1 %v5353_v2 }
 0x1fd   :  { %5244 = vmatprep.subr.bf16.mxu1 %v7476_v19 }
 0x1ff   :  { %4846 = vmatmul.mubr.msk.bf16.gmra.mxu1 %vm435_vm9, %v342_v58  ;;  %v6372_v58 = vrot.slane %v6353_v48, %v361_v51 }
 0x200   :  { %5245 = vmatpush3.bf16.msra.mxu1 %v5354_v3  ;;  %646 = vmatprep.mubr.bf16.mxu1 %v7478_v0 }
 0x201   :  { %5246 = vmatprep.subr.bf16.mxu1 %v7476_v19 }
 0x204   :  { %5247 = vmatpush3.bf16.msra.mxu1 %v5355_v4 }
 0x205   :  { %5248 = vmatprep.subr.bf16.mxu1 %v7476_v19 }
 0x207   :  { %4847 = vmatmul.mubr.msk.bf16.gmra.mxu1 %vm435_vm9, %v343_v61 }
 0x208   :  { %5249 = vmatpush3.bf16.msra.mxu1 %v5356_v5  ;;  %656 = vmatprep.mubr.bf16.mxu1 %v7478_v0 }
 0x209   :  { %5250 = vmatprep.subr.bf16.mxu1 %v7476_v19 }
 0x20c   :  { %5251 = vmatpush3.bf16.msra.mxu1 %v5357_v6 }
 0x20d   :  { %5252 = vmatprep.subr.bf16.mxu1 %v7476_v19 }
 0x20f   :  { %4848 = vmatmul.mubr.msk.bf16.gmra.mxu1 %vm435_vm9, %v344_v62 }
 0x210   :  { %5253 = vmatpush3.bf16.msra.mxu1 %v5358_v7  ;;  %5256 = vmatprep.mubr.msk.bf16.mxu1 %vm5969_vm10, %v7476_v19 }
 0x211   :  { %5254 = vmatprep.subr.bf16.mxu1 %v7476_v19 }
 0x214   :  { %5255 = vmatpush3.bf16.msra.mxu1 %v5359_v8 }
 0x215   :  { %1155 = vmatprep.subr.bf16.mxu1 %v6249_v12 }
 0x217   :  { %5257 = vmatmul.mubr.bf16.vlgmr.msra.gmra.mxu1 %v805_v10 }
 0x218   :  { %1187 = vmatprep.mubr.bf16.mxu1 %v7478_v0  ;;  %1156 = vmatpush1.bf16.msra.mxu1 %v6253_v15 }
 0x219   :  { %1157 = vmatprep.subr.bf16.mxu1 %v6261_v17 }
 0x21c   :  { %1158 = vmatpush1.bf16.msra.mxu1 %v6265_v20 }
 0x21d   :  { %1159 = vmatprep.subr.bf16.mxu1 %v6273_v22 }
 0x220   :  { %1160 = vmatpush1.bf16.msra.mxu1 %v6277_v24 }
 0x221   :  { %1161 = vmatprep.subr.bf16.mxu1 %v6285_v26 }
 0x224   :  { %1162 = vmatpush1.bf16.msra.mxu1 %v6289_v28 }
 0x225   :  { %1163 = vmatprep.subr.bf16.mxu1 %v6297_v30 }
 0x228   :  { %1164 = vmatpush1.bf16.msra.mxu1 %v6301_v32 }
 0x229   :  { %1165 = vmatprep.subr.bf16.mxu1 %v6309_v34 }
 0x22c   :  { %1166 = vmatpush1.bf16.msra.mxu1 %v6313_v36 }
 0x22d   :  { %1167 = vmatprep.subr.bf16.mxu1 %v6321_v38 }
 0x230   :  { %1168 = vmatpush1.bf16.msra.mxu1 %v6325_v40 }
 0x231   :  { %1169 = vmatprep.subr.bf16.mxu1 %v6333_v42 }
 0x234   :  { %1170 = vmatpush1.bf16.msra.mxu1 %v6337_v44 }
 0x235   :  { %1264 = vmatprep.subr.bf16.mxu1 %v6249_v12 }
 0x287   :  { %v6355_v49 = vpop.f32.mrf.mxu1  ;;  %v6357_v50 = vpop.f32.mrf.mxu0 }
 0x289   :  { %v6361_v53 = vpop.f32.mrf.mxu1  ;;  %v6363_v13 = vpop.f32.mrf.mxu0 }
 0x28b   :  { %v486_v56 = vpop.f32.mrf.mxu1  ;;  %v559_v57 = vpop.f32.mrf.mxu0 }
 0x28c   :  { %v6378_v60 = vadd.f32 %v486_v56, %v6366_v54  ;;  %v6381_v61 = vadd.f32 %v559_v57, %v6369_v55 }
 0x28d   :  { %v488_v62 = vpop.f32.mrf.mxu1  ;;  %v561_v63 = vpop.f32.mrf.mxu0 }
 0x28e   :  { %v6384_v1 = vadd.f32 %v488_v62, %v6372_v58  ;;  %v6387_v2 = vadd.f32 %v561_v63, %v6375_v59 }
 0x28f   :  { %v492_v3 = vpop.f32.mrf.mxu1  ;;  %v565_v4 = vpop.f32.mrf.mxu0 }
 0x290   :  { %v6390_v5 = vadd.f32 %v492_v3, %v6366_v54  ;;  %v6393_v6 = vadd.f32 %v565_v4, %v6369_v55  ;;  %v381_v3 = vsub.s32 6, %v6346_v45 }
 0x291   :  { %v494_v7 = vpop.f32.mrf.mxu1  ;;  %v567_v8 = vpop.f32.mrf.mxu0 }
 0x292   :  { %v6396_v9 = vadd.f32 %v494_v7, %v6372_v58  ;;  %v6399_v10 = vadd.f32 %v567_v8, %v6375_v59  ;;  %v6423_v0 = vrot.slane %v6353_v48, %v381_v3 }
 0x293   :  { %v496_v46 = vpop.f32.mrf.mxu1  ;;  %v569_v47 = vpop.f32.mrf.mxu0 }
 0x294   :  { %v6402_v51 = vadd.f32 %v496_v46, %v6366_v54  ;;  %v6405_v52 = vadd.f32 %v569_v47, %v6369_v55  ;;  %v385_v46 = vsub.s32 7, %v6346_v45  ;;  %7494 = vst [vmem:[#allocation36_spill] sm:$0xff] %v6423_v0 }
 0x295   :  { %v498_v56 = vpop.f32.mrf.mxu1  ;;  %v571_v57 = vpop.f32.mrf.mxu0 }
 0x296   :  { %7487 = vst [vmem:[#allocation29_spill] sm:$0xff] %v6402_v51  ;;  %7488 = vst [vmem:[#allocation30_spill] sm:$0xff] %v6405_v52  ;;  %v6408_v62 = vadd.f32 %v498_v56, %v6372_v58  ;;  %v6411_v63 = vadd.f32 %v571_v57, %v6375_v59  ;;  %v6429_v52 = vrot.slane %v6353_v48, %v385_v46 }
 0x297   :  { %v502_v4 = vpop.f32.mrf.mxu1  ;;  %v6414_v7 = vpop.f32.mrf.mxu0 }
 0x298   :  { %7489 = vst [vmem:[#allocation31_spill] sm:$0xff] %v6408_v62  ;;  %7490 = vst [vmem:[#allocation32_spill] sm:$0xff] %v6411_v63  ;;  %v6417_v8 = vadd.f32 %v502_v4, %v6366_v54 }
 0x299   :  { %7491 = vst [vmem:[#allocation33_spill] sm:$0xff] %v6414_v7  ;;  %v504_v47 = vpop.f32.mrf.mxu1  ;;  %v6420_v19 = vpop.f32.mrf.mxu0  ;;  %7496 = vst [vmem:[#allocation38_spill] sm:$0xff] %v6429_v52 }
 0x29a   :  { %7492 = vst [vmem:[#allocation34_spill] sm:$0xff] %v6417_v8  ;;  %7493 = vst [vmem:[#allocation35_spill] sm:$0xff] %v6420_v19  ;;  %v6426_v56 = vadd.f32 %v504_v47, %v6372_v58 }
 0x29b   :  { %v506_v57 = vpop.f32.mrf.mxu1  ;;  %v705_v63 = vpop.f32.mrf.mxu0 }
 0x29c   :  { %7495 = vst [vmem:[#allocation37_spill] sm:$0xff] %v6426_v56  ;;  %v6432_v7 = vadd.f32 %v506_v57, %v6366_v54  ;;  %v6435_v4 = vadd.f32 %v705_v63, %v6423_v0 }
 0x29d   :  { %v508_v8 = vpop.f32.mrf.mxu1  ;;  %v707_v62 = vpop.f32.mrf.mxu0 }
 0x29e   :  { %7497 = vst [vmem:[#allocation39_spill] sm:$0xff] %v6432_v7  ;;  %7498 = vst [vmem:[#allocation40_spill] sm:$0xff] %v6435_v4  ;;  %v6438_v19 = vadd.f32 %v508_v8, %v6372_v58  ;;  %v6441_v3 = vadd.f32 %v707_v62, %v6429_v52 }
 0x29f   :  { %v512_v47 = vpop.f32.mrf.mxu1  ;;  %v711_v56 = vpop.f32.mrf.mxu0 }
 0x2a0   :  { %7499 = vst [vmem:[#allocation41_spill] sm:$0xff] %v6438_v19  ;;  %7500 = vst [vmem:[#allocation42_spill] sm:$0xff] %v6441_v3  ;;  %v6444_v51 = vadd.f32 %v512_v47, %v6366_v54  ;;  %v6447_v46 = vadd.f32 %v711_v56, %v6423_v0 }
 0x2a1   :  { %v514_v57 = vpop.f32.mrf.mxu1  ;;  %v713_v7 = vpop.f32.mrf.mxu0 }
 0x2a2   :  { %7501 = vst [vmem:[#allocation43_spill] sm:$0xff] %v6444_v51  ;;  %7502 = vst [vmem:[#allocation44_spill] sm:$0xff] %v6447_v46  ;;  %v6450_v63 = vadd.f32 %v514_v57, %v6372_v58  ;;  %v6453_v4 = vadd.f32 %v713_v7, %v6429_v52 }
 0x2a3   :  { %v516_v8 = vpop.f32.mrf.mxu1  ;;  %v715_v19 = vpop.f32.mrf.mxu0 }
 0x2a4   :  { %7503 = vst [vmem:[#allocation45_spill] sm:$0xff] %v6450_v63  ;;  %7504 = vst [vmem:[#allocation46_spill] sm:$0xff] %v6453_v4  ;;  %v6456_v62 = vadd.f32 %v516_v8, %v6366_v54  ;;  %v6459_v3 = vadd.f32 %v715_v19, %v6423_v0 }
 0x2a5   :  { %v518_v47 = vpop.f32.mrf.mxu1  ;;  %v717_v51 = vpop.f32.mrf.mxu0 }
 0x2a6   :  { %7505 = vst [vmem:[#allocation47_spill] sm:$0xff] %v6456_v62  ;;  %7506 = vst [vmem:[#allocation48_spill] sm:$0xff] %v6459_v3  ;;  %v6462_v56 = vadd.f32 %v518_v47, %v6372_v58  ;;  %v6465_v46 = vadd.f32 %v717_v51, %v6429_v52 }
 0x2a7   :  { %v575_v57 = vpop.f32.mrf.mxu1  ;;  %v721_v63 = vpop.f32.mrf.mxu0 }
 0x2a8   :  { %7507 = vst [vmem:[#allocation49_spill] sm:$0xff] %v6462_v56  ;;  %7508 = vst [vmem:[#allocation50_spill] sm:$0xff] %v6465_v46  ;;  %v6468_v7 = vadd.f32 %v575_v57, %v6369_v55  ;;  %v6471_v4 = vadd.f32 %v721_v63, %v6423_v0 }
 0x2a9   :  { %v577_v8 = vpop.f32.mrf.mxu1  ;;  %v723_v62 = vpop.f32.mrf.mxu0 }
 0x2aa   :  { %7509 = vst [vmem:[#allocation51_spill] sm:$0xff] %v6468_v7  ;;  %7510 = vst [vmem:[#allocation52_spill] sm:$0xff] %v6471_v4  ;;  %v6474_v19 = vadd.f32 %v577_v8, %v6375_v59  ;;  %v6477_v3 = vadd.f32 %v723_v62, %v6429_v52 }
 0x2ab   :  { %v579_v47 = vpop.f32.mrf.mxu1  ;;  %v725_v56 = vpop.f32.mrf.mxu0 }
 0x2ac   :  { %7511 = vst [vmem:[#allocation53_spill] sm:$0xff] %v6474_v19  ;;  %7512 = vst [vmem:[#allocation54_spill] sm:$0xff] %v6477_v3  ;;  %v6480_v51 = vadd.f32 %v579_v47, %v6369_v55  ;;  %v6483_v46 = vadd.f32 %v725_v56, %v6423_v0 }
 0x2ad   :  { %v581_v57 = vpop.f32.mrf.mxu1  ;;  %v727_v7 = vpop.f32.mrf.mxu0 }
 0x2ae   :  { %7513 = vst [vmem:[#allocation55_spill] sm:$0xff] %v6480_v51  ;;  %7514 = vst [vmem:[#allocation56_spill] sm:$0xff] %v6483_v46  ;;  %v6486_v63 = vadd.f32 %v581_v57, %v6375_v59  ;;  %v6489_v4 = vadd.f32 %v727_v7, %v6429_v52 }
 0x2af   :  { %v585_v8 = vpop.f32.mrf.mxu1  ;;  %v731_v19 = vpop.f32.mrf.mxu0 }
 0x2b0   :  { %7515 = vst [vmem:[#allocation57_spill] sm:$0xff] %v6486_v63  ;;  %7516 = vst [vmem:[#allocation58_spill] sm:$0xff] %v6489_v4  ;;  %v6492_v62 = vadd.f32 %v585_v8, %v6369_v55  ;;  %v6495_v3 = vadd.f32 %v731_v19, %v6423_v0 }
 0x2b1   :  { %v587_v47 = vpop.f32.mrf.mxu1  ;;  %v733_v51 = vpop.f32.mrf.mxu0 }
 0x2b2   :  { %7517 = vst [vmem:[#allocation59_spill] sm:$0xff] %v6492_v62  ;;  %7518 = vst [vmem:[#allocation60_spill] sm:$0xff] %v6495_v3  ;;  %v6498_v56 = vadd.f32 %v587_v47, %v6375_v59  ;;  %v6501_v46 = vadd.f32 %v733_v51, %v6429_v52  ;;  %v373_v3 = vsub.s32 4, %v6346_v45  ;;  %v377_v47 = vsub.s32 5, %v6346_v45 }
 0x2b3   :  { %v589_v57 = vpop.f32.mrf.mxu1  ;;  %v735_v63 = vpop.f32.mrf.mxu0 }
 0x2b4   :  { %7519 = vst [vmem:[#allocation61_spill] sm:$0xff] %v6498_v56  ;;  %7520 = vst [vmem:[#allocation62_spill] sm:$0xff] %v6501_v46  ;;  %v6504_v7 = vadd.f32 %v589_v57, %v6369_v55  ;;  %v6507_v4 = vadd.f32 %v735_v63, %v6423_v0  ;;  %v6519_v46 = vrot.slane %v6353_v48, %v373_v3 }
 0x2b5   :  { %v591_v8 = vpop.f32.mrf.mxu1  ;;  %v6522_v52 = vrot.slane %v6353_v48, %v377_v47 }
 0x2b6   :  { %7521 = vst [vmem:[#allocation63_spill] sm:$0xff] %v6504_v7  ;;  %7522 = vst [vmem:[#allocation64_spill] sm:$0xff] %v6507_v4  ;;  %v6510_v19 = vadd.f32 %v591_v8, %v6375_v59 }
 0x2b7   :  { %v6513_v62 = vpop.f32.mrf.mxu1  ;;  %7526 = vst [vmem:[#allocation68_spill] sm:$0xff] %v6519_v46  ;;  %7527 = vst [vmem:[#allocation69_spill] sm:$0xff] %v6522_v52 }
 0x2b8   :  { %7523 = vst [vmem:[#allocation65_spill] sm:$0xff] %v6510_v19  ;;  %7524 = vst [vmem:[#allocation66_spill] sm:$0xff] %v6513_v62 }
 0x2b9   :  { %v6516_v51 = vpop.f32.mrf.mxu1 }
 0x2ba   :  { %7525 = vst [vmem:[#allocation67_spill] sm:$0xff] %v6516_v51 }
 0x2bb   :  { %v632_v57 = vpop.f32.mrf.mxu1 }
 0x2bc   :  { %v6525_v63 = vadd.f32 %v632_v57, %v6519_v46 }
 0x2bd   :  { %v634_v8 = vpop.f32.mrf.mxu1 }
 0x2be   :  { %7528 = vst [vmem:[#allocation70_spill] sm:$0xff] %v6525_v63  ;;  %v6528_v4 = vadd.f32 %v634_v8, %v6522_v52  ;;  %v4853_v63 = vld [vmem:[#allocation4] ss:$0 sm:$0xff] }
 0x2bf   :  { %v638_v0 = vpop.f32.mrf.mxu1 }
 0x2c0   :  { %7529 = vst [vmem:[#allocation71_spill] sm:$0xff] %v6528_v4  ;;  %v6531_v62 = vadd.f32 %v638_v0, %v6519_v46 }
 0x2c1   :  { %v640_v45 = vpop.f32.mrf.mxu1 }
 0x2c2   :  { %7530 = vst [vmem:[#allocation72_spill] sm:$0xff] %v6531_v62  ;;  %v6534_v51 = vadd.f32 %v640_v45, %v6522_v52 }
 0x2c3   :  { %v642_v3 = vpop.f32.mrf.mxu1 }
 0x2c4   :  { %7531 = vst [vmem:[#allocation73_spill] sm:$0xff] %v6534_v51  ;;  %v6537_v19 = vadd.f32 %v642_v3, %v6519_v46 }
 0x2c5   :  { %v644_v48 = vpop.f32.mrf.mxu1 }
 0x2c6   :  { %7532 = vst [vmem:[#allocation74_spill] sm:$0xff] %v6537_v19  ;;  %v6540_v47 = vadd.f32 %v644_v48, %v6522_v52 }
 0x2c7   :  { %v648_v57 = vpop.f32.mrf.mxu1 }
 0x2c8   :  { %7533 = vst [vmem:[#allocation75_spill] sm:$0xff] %v6540_v47  ;;  %v6543_v8 = vadd.f32 %v648_v57, %v6519_v46 }
 0x2c9   :  { %v650_v4 = vpop.f32.mrf.mxu1 }
 0x2ca   :  { %7534 = vst [vmem:[#allocation76_spill] sm:$0xff] %v6543_v8  ;;  %v6546_v0 = vadd.f32 %v650_v4, %v6522_v52 }
 0x2cb   :  { %v652_v62 = vpop.f32.mrf.mxu1 }
 0x2cc   :  { %7535 = vst [vmem:[#allocation77_spill] sm:$0xff] %v6546_v0  ;;  %v6549_v45 = vadd.f32 %v652_v62, %v6519_v46 }
 0x2cd   :  { %v654_v51 = vpop.f32.mrf.mxu1 }
 0x2ce   :  { %7536 = vst [vmem:[#allocation78_spill] sm:$0xff] %v6549_v45  ;;  %v6552_v3 = vadd.f32 %v654_v51, %v6522_v52 }
 0x2cf   :  { %v658_v19 = vpop.f32.mrf.mxu1 }
 0x2d0   :  { %7537 = vst [vmem:[#allocation79_spill] sm:$0xff] %v6552_v3  ;;  %v6555_v48 = vadd.f32 %v658_v19, %v6519_v46 }
 0x2d1   :  { %v660_v47 = vpop.f32.mrf.mxu1 }
 0x2d2   :  { %7538 = vst [vmem:[#allocation80_spill] sm:$0xff] %v6555_v48  ;;  %v6558_v57 = vadd.f32 %v660_v47, %v6522_v52  ;;  %v7542_v47 = vmov 0   ;;  %v556_v48 = vadd.f32 %v6357_v50, %v6369_v55 }
 0x2d3   :  { %v662_v8 = vpop.f32.mrf.mxu1 }
 0x2d4   :  { %7539 = vst [vmem:[#allocation81_spill] sm:$0xff] %v6558_v57  ;;  %v6561_v4 = vadd.f32 %v662_v8, %v6519_v46 }
 0x2d5   :  { %v664_v0 = vpop.f32.mrf.mxu1 }
 0x2d6   :  { %7540 = vst [vmem:[#allocation82_spill] sm:$0xff] %v6561_v4  ;;  %v6564_v62 = vadd.f32 %v664_v0, %v6522_v52  ;;  %v485_v0 = vadd.f32 %v6361_v53, %v6372_v58 }
 0x2d7   :  { %v911_v45 = vpop.f32.mrf.mxu1 }
 0x2d8   :  { %7541 = vst [vmem:[#allocation83_spill] sm:$0xff] %v6564_v62  ;;  %v912_v51 = vadd.f32 %v4853_v63, %v911_v45 }
 0x2d9   :  { %v5258_v3 = vpop.f32.mrf.mxu1 }
 0x2da   :  { %v921_v7 = vpack.c.bf16 %v912_v51, %v912_v51 }
 0x2db   :  { %v914_v56 = vpop.f32.mrf.mxu1 }
 0x2dc   :  { %1147 = vmatmul.mubr.bf16.vlgmr.msra.gmra.mxu0 %v921_v7  ;;  %1188 = vmatmul.mubr.bf16.vlgmr.msra.gmra.mxu1 %v921_v7  ;;  %v6600_v56 = vpop.f32.mrf.mxu0  ;;  %v483_v7 = vadd.f32 %v6355_v49, %v6366_v54  ;;  %v558_v54 = vadd.f32 %v6363_v13, %v6375_v59 }
 0x2dd   :  { %v5259_v19 = vpop.f32.mrf.mxu1  ;;  %1224 = vmatpush1.bf16.msra.mxu0 %v6251_v14  ;;  %1265 = vmatpush1.bf16.msra.mxu1 %v6253_v15  ;;  %7543 = vst [vmem:[#allocation84_spill] sm:$0xff] %v6600_v56 }
 0x2de   :  { %1225 = vmatprep.subr.bf16.mxu0 %v6259_v16  ;;  %1266 = vmatprep.subr.bf16.mxu1 %v6261_v17 }
 0x2df   :  { %1255 = vmatprep.mubr.bf16.mxu0 %v7542_v47  ;;  %1296 = vmatprep.mubr.bf16.mxu1 %v7542_v47 }
 0x2e1   :  { %1226 = vmatpush1.bf16.msra.mxu0 %v6263_v18  ;;  %1267 = vmatpush1.bf16.msra.mxu1 %v6265_v20 }
 0x2e2   :  { %1227 = vmatprep.subr.bf16.mxu0 %v6271_v21  ;;  %1268 = vmatprep.subr.bf16.mxu1 %v6273_v22 }
 0x2e5   :  { %1228 = vmatpush1.bf16.msra.mxu0 %v6275_v23  ;;  %1269 = vmatpush1.bf16.msra.mxu1 %v6277_v24 }
 0x2e6   :  { %1229 = vmatprep.subr.bf16.mxu0 %v6283_v25  ;;  %1270 = vmatprep.subr.bf16.mxu1 %v6285_v26 }
 0x2e9   :  { %1230 = vmatpush1.bf16.msra.mxu0 %v6287_v27  ;;  %1271 = vmatpush1.bf16.msra.mxu1 %v6289_v28 }
 0x2ea   :  { %1231 = vmatprep.subr.bf16.mxu0 %v6295_v29  ;;  %1272 = vmatprep.subr.bf16.mxu1 %v6297_v30 }
 0x2ed   :  { %1232 = vmatpush1.bf16.msra.mxu0 %v6299_v31  ;;  %1273 = vmatpush1.bf16.msra.mxu1 %v6301_v32 }
 0x2ee   :  { %1233 = vmatprep.subr.bf16.mxu0 %v6307_v33  ;;  %1274 = vmatprep.subr.bf16.mxu1 %v6309_v34 }
 0x2f1   :  { %1234 = vmatpush1.bf16.msra.mxu0 %v6311_v35  ;;  %1275 = vmatpush1.bf16.msra.mxu1 %v6313_v36 }
 0x2f2   :  { %1235 = vmatprep.subr.bf16.mxu0 %v6319_v37  ;;  %1276 = vmatprep.subr.bf16.mxu1 %v6321_v38 }
 0x2f5   :  { %1236 = vmatpush1.bf16.msra.mxu0 %v6323_v39  ;;  %1277 = vmatpush1.bf16.msra.mxu1 %v6325_v40 }
 0x2f6   :  { %1237 = vmatprep.subr.bf16.mxu0 %v6331_v41  ;;  %1278 = vmatprep.subr.bf16.mxu1 %v6333_v42 }
 0x2f9   :  { %1238 = vmatpush1.bf16.msra.mxu0 %v6335_v43  ;;  %1279 = vmatpush1.bf16.msra.mxu1 %v6337_v44 }
 0x2fa   :  { %1332 = vmatprep.subr.bf16.mxu0 %v6247_v11  ;;  %1373 = vmatprep.subr.bf16.mxu1 %v6249_v12 }
 0x39c   :  { %v1148_v63 = vpop.f32.mrf.mxu0  ;;  %v1189_v8 = vpop.f32.mrf.mxu1 }
 0x39d   :  { %v1196_v45 = vadd.f32 %v1148_v63, %v483_v7  ;;  %v1198_v49 = vadd.f32 %v1189_v8, %v556_v48 }
 0x39e   :  { %v1150_v3 = vpop.f32.mrf.mxu0  ;;  %v1191_v51 = vpop.f32.mrf.mxu1 }
 0x39f   :  { %v1200_v19 = vmul.f32 0.5, %v1196_v45  ;;  %v1197_v62 = vadd.f32 %v1150_v3, %v485_v0  ;;  %v1199_v53 = vadd.f32 %v1191_v51, %v558_v54 }
 0x3a0   :  { %v1152_v4 = vpop.f32.mrf.mxu0  ;;  %v1193_v57 = vpop.f32.mrf.mxu1 }
 0x3a1   :  { %5528 = vtanh.f32 %v1200_v19  ;;  %v1204_v56 = vmul.f32 0.5, %v1197_v62  ;;  %v1209_v58 = vmul.f32 0.5, %v1199_v53 }
 0x3a2   :  { %v1153_v52 = vpop.f32.mrf.mxu0  ;;  %v1194_v46 = vpop.f32.mrf.mxu1 }
 0x3a3   :  { %5530 = vtanh.f32 %v1204_v56 }
 0x3a4   :  { %5532 = vtanh.f32 %v1198_v49 }
 0x3a5   :  { %5534 = vtanh.f32 %v1209_v58 }
 0x3ae   :  { %v5529_v7 = vpop.eup %5528 }
 0x3af   :  { %v1202_v63 = vmul.f32 0.5, %v5529_v7 }
 0x3b0   :  { %v5531_v0 = vpop.eup %5530 }
 0x3b1   :  { %v1203_v4 = vadd.f32 0.5, %v1202_v63  ;;  %v1206_v57 = vmul.f32 0.5, %v5531_v0  ;;  %v5533_v50 = vpop.eup %5532 }
 0x3b2   :  { %v5535_v46 = vpop.eup %5534 }
 0x3b3   :  { %v1207_v45 = vadd.f32 0.5, %v1206_v57  ;;  %v1214_v62 = vmul.f32 %v5533_v50, %v1203_v4  ;;  %v1211_v48 = vmul.f32 0.5, %v5535_v46 }
 0x3b5   :  { %v1213_v55 = vmul.f32 0.0, %v1207_v45  ;;  %v1212_v13 = vadd.f32 0.5, %v1211_v48 }
 0x3b7   :  { %v6610_v52 = vadd.f32 %v1214_v62, %v1213_v55 }
 0x3b9   :  { %5536 = vtanh.f32 %v6610_v52 }
 0x3c6   :  { %v5537_v59 = vpop.eup %5536 }
 0x3c7   :  { %v1217_v56 = vmul.f32 %v5537_v59, %v1212_v13 }
 0x3c9   :  { %v1222_v8 = vpack.c.bf16 %v1217_v56, %v1217_v56 }
 0x3cb   :  { %1256 = vmatmul.mubr.bf16.vlgmr.msra.gmra.mxu0 %v1222_v8  ;;  %1297 = vmatmul.mubr.bf16.vlgmr.msra.gmra.mxu1 %v1222_v8 }
 0x3cc   :  { %1333 = vmatpush1.bf16.msra.mxu0 %v6251_v14  ;;  %1374 = vmatpush1.bf16.msra.mxu1 %v6253_v15 }
 0x3cd   :  { %1334 = vmatprep.subr.bf16.mxu0 %v6259_v16  ;;  %1375 = vmatprep.subr.bf16.mxu1 %v6261_v17 }
 0x3ce   :  { %1364 = vmatprep.mubr.bf16.mxu0 %v7542_v47  ;;  %1405 = vmatprep.mubr.bf16.mxu1 %v7542_v47 }
 0x3d0   :  { %1335 = vmatpush1.bf16.msra.mxu0 %v6263_v18  ;;  %1376 = vmatpush1.bf16.msra.mxu1 %v6265_v20 }
 0x3d1   :  { %1336 = vmatprep.subr.bf16.mxu0 %v6271_v21  ;;  %1377 = vmatprep.subr.bf16.mxu1 %v6273_v22 }
 0x3d4   :  { %1337 = vmatpush1.bf16.msra.mxu0 %v6275_v23  ;;  %1378 = vmatpush1.bf16.msra.mxu1 %v6277_v24 }
 0x3d5   :  { %1338 = vmatprep.subr.bf16.mxu0 %v6283_v25  ;;  %1379 = vmatprep.subr.bf16.mxu1 %v6285_v26 }
 0x3d8   :  { %1339 = vmatpush1.bf16.msra.mxu0 %v6287_v27  ;;  %1380 = vmatpush1.bf16.msra.mxu1 %v6289_v28 }
 0x3d9   :  { %1340 = vmatprep.subr.bf16.mxu0 %v6295_v29  ;;  %1381 = vmatprep.subr.bf16.mxu1 %v6297_v30 }
 0x3dc   :  { %1341 = vmatpush1.bf16.msra.mxu0 %v6299_v31  ;;  %1382 = vmatpush1.bf16.msra.mxu1 %v6301_v32 }
 0x3dd   :  { %1342 = vmatprep.subr.bf16.mxu0 %v6307_v33  ;;  %1383 = vmatprep.subr.bf16.mxu1 %v6309_v34 }
 0x3e0   :  { %1343 = vmatpush1.bf16.msra.mxu0 %v6311_v35  ;;  %1384 = vmatpush1.bf16.msra.mxu1 %v6313_v36 }
 0x3e1   :  { %1344 = vmatprep.subr.bf16.mxu0 %v6319_v37  ;;  %1385 = vmatprep.subr.bf16.mxu1 %v6321_v38 }
 0x3e4   :  { %1345 = vmatpush1.bf16.msra.mxu0 %v6323_v39  ;;  %1386 = vmatpush1.bf16.msra.mxu1 %v6325_v40 }
 0x3e5   :  { %1346 = vmatprep.subr.bf16.mxu0 %v6331_v41  ;;  %1387 = vmatprep.subr.bf16.mxu1 %v6333_v42 }
 0x3e8   :  { %1347 = vmatpush1.bf16.msra.mxu0 %v6335_v43  ;;  %1388 = vmatpush1.bf16.msra.mxu1 %v6337_v44 }
 0x3e9   :  { %1441 = vmatprep.subr.bf16.mxu0 %v6247_v11  ;;  %1482 = vmatprep.subr.bf16.mxu1 %v6249_v12 }
 0x48b   :  { %v1257_v3 = vpop.f32.mrf.mxu0  ;;  %v1298_v51 = vpop.f32.mrf.mxu1 }
 0x48c   :  { %v1305_v19 = vadd.f32 %v1257_v3, %v6378_v60  ;;  %v1307_v0 = vadd.f32 %v1298_v51, %v6381_v61 }
 0x48d   :  { %v1259_v49 = vpop.f32.mrf.mxu0  ;;  %v1300_v54 = vpop.f32.mrf.mxu1 }
 0x48e   :  { %v1309_v53 = vmul.f32 0.5, %v1305_v19  ;;  %v1306_v58 = vadd.f32 %v1259_v49, %v6384_v1  ;;  %v1308_v50 = vadd.f32 %v1300_v54, %v6387_v2 }
 0x48f   :  { %v1261_v7 = vpop.f32.mrf.mxu0  ;;  %v1302_v63 = vpop.f32.mrf.mxu1 }
 0x490   :  { %5538 = vtanh.f32 %v1309_v53  ;;  %v1313_v4 = vmul.f32 0.5, %v1306_v58  ;;  %v1318_v55 = vmul.f32 0.5, %v1308_v50 }
 0x491   :  { %v1262_v57 = vpop.f32.mrf.mxu0  ;;  %v1303_v45 = vpop.f32.mrf.mxu1 }
 0x492   :  { %5540 = vtanh.f32 %v1313_v4 }
 0x493   :  { %5542 = vtanh.f32 %v1307_v0 }
 0x494   :  { %5544 = vtanh.f32 %v1318_v55 }
 0x49d   :  { %v5539_v62 = vpop.eup %5538 }
 0x49e   :  { %v1311_v60 = vmul.f32 0.5, %v5539_v62 }
 0x49f   :  { %v5541_v46 = vpop.eup %5540 }
 0x4a0   :  { %v1312_v48 = vadd.f32 0.5, %v1311_v60  ;;  %v1315_v13 = vmul.f32 0.5, %v5541_v46  ;;  %v5543_v1 = vpop.eup %5542 }
 0x4a1   :  { %v5545_v3 = vpop.eup %5544 }
 0x4a2   :  { %v1316_v59 = vadd.f32 0.5, %v1315_v13  ;;  %v1323_v56 = vmul.f32 %v5543_v1, %v1312_v48  ;;  %v1320_v51 = vmul.f32 0.5, %v5545_v3 }
 0x4a4   :  { %v1322_v8 = vmul.f32 %v1316_v59, %v6610_v52  ;;  %v1321_v19 = vadd.f32 0.5, %v1320_v51 }
 0x4a6   :  { %v6652_v61 = vadd.f32 %v1323_v56, %v1322_v8 }
 0x4a8   :  { %5546 = vtanh.f32 %v6652_v61 }
 0x4b5   :  { %v5547_v2 = vpop.eup %5546 }
 0x4b6   :  { %v1326_v49 = vmul.f32 %v5547_v2, %v1321_v19 }
 0x4b8   :  { %v1331_v54 = vpack.c.bf16 %v1326_v49, %v1326_v49 }
 0x4ba   :  { %1365 = vmatmul.mubr.bf16.vlgmr.msra.gmra.mxu0 %v1331_v54  ;;  %1406 = vmatmul.mubr.bf16.vlgmr.msra.gmra.mxu1 %v1331_v54 }
 0x4bb   :  { %1442 = vmatpush1.bf16.msra.mxu0 %v6251_v14  ;;  %1483 = vmatpush1.bf16.msra.mxu1 %v6253_v15 }
 0x4bc   :  { %1443 = vmatprep.subr.bf16.mxu0 %v6259_v16  ;;  %1484 = vmatprep.subr.bf16.mxu1 %v6261_v17 }
 0x4bd   :  { %1473 = vmatprep.mubr.bf16.mxu0 %v7542_v47  ;;  %1514 = vmatprep.mubr.bf16.mxu1 %v7542_v47 }
 0x4bf   :  { %1444 = vmatpush1.bf16.msra.mxu0 %v6263_v18  ;;  %1485 = vmatpush1.bf16.msra.mxu1 %v6265_v20 }
 0x4c0   :  { %1445 = vmatprep.subr.bf16.mxu0 %v6271_v21  ;;  %1486 = vmatprep.subr.bf16.mxu1 %v6273_v22 }
 0x4c3   :  { %1446 = vmatpush1.bf16.msra.mxu0 %v6275_v23  ;;  %1487 = vmatpush1.bf16.msra.mxu1 %v6277_v24 }
 0x4c4   :  { %1447 = vmatprep.subr.bf16.mxu0 %v6283_v25  ;;  %1488 = vmatprep.subr.bf16.mxu1 %v6285_v26 }
 0x4c7   :  { %1448 = vmatpush1.bf16.msra.mxu0 %v6287_v27  ;;  %1489 = vmatpush1.bf16.msra.mxu1 %v6289_v28 }
 0x4c8   :  { %1449 = vmatprep.subr.bf16.mxu0 %v6295_v29  ;;  %1490 = vmatprep.subr.bf16.mxu1 %v6297_v30 }
 0x4cb   :  { %1450 = vmatpush1.bf16.msra.mxu0 %v6299_v31  ;;  %1491 = vmatpush1.bf16.msra.mxu1 %v6301_v32 }
 0x4cc   :  { %1451 = vmatprep.subr.bf16.mxu0 %v6307_v33  ;;  %1492 = vmatprep.subr.bf16.mxu1 %v6309_v34 }
 0x4cf   :  { %1452 = vmatpush1.bf16.msra.mxu0 %v6311_v35  ;;  %1493 = vmatpush1.bf16.msra.mxu1 %v6313_v36 }
 0x4d0   :  { %1453 = vmatprep.subr.bf16.mxu0 %v6319_v37  ;;  %1494 = vmatprep.subr.bf16.mxu1 %v6321_v38 }
 0x4d3   :  { %1454 = vmatpush1.bf16.msra.mxu0 %v6323_v39  ;;  %1495 = vmatpush1.bf16.msra.mxu1 %v6325_v40 }
 0x4d4   :  { %1455 = vmatprep.subr.bf16.mxu0 %v6331_v41  ;;  %1496 = vmatprep.subr.bf16.mxu1 %v6333_v42 }
 0x4d7   :  { %1456 = vmatpush1.bf16.msra.mxu0 %v6335_v43  ;;  %1497 = vmatpush1.bf16.msra.mxu1 %v6337_v44 }
 0x4d8   :  { %1550 = vmatprep.subr.bf16.mxu0 %v6247_v11  ;;  %1591 = vmatprep.subr.bf16.mxu1 %v6249_v12 }
 0x57a   :  { %v1366_v52 = vpop.f32.mrf.mxu0  ;;  %v1407_v53 = vpop.f32.mrf.mxu1 }
 0x57b   :  { %v1414_v58 = vadd.f32 %v1366_v52, %v6390_v5  ;;  %v1416_v50 = vadd.f32 %v1407_v53, %v6393_v6 }
 0x57c   :  { %v1368_v7 = vpop.f32.mrf.mxu0  ;;  %v1409_v63 = vpop.f32.mrf.mxu1 }
 0x57d   :  { %v1418_v0 = vmul.f32 0.5, %v1414_v58  ;;  %v1415_v4 = vadd.f32 %v1368_v7, %v6396_v9  ;;  %v1417_v46 = vadd.f32 %v1409_v63, %v6399_v10  ;;  %v7544_v58 = vld [vmem:[#allocation29_spill] sm:$0xff] }
 0x57e   :  { %v1370_v57 = vpop.f32.mrf.mxu0  ;;  %v1411_v45 = vpop.f32.mrf.mxu1 }
 0x57f   :  { %5548 = vtanh.f32 %v1418_v0  ;;  %v1422_v55 = vmul.f32 0.5, %v1415_v4  ;;  %v1427_v48 = vmul.f32 0.5, %v1417_v46  ;;  %v7545_v57 = vld [vmem:[#allocation31_spill] sm:$0xff] }
 0x580   :  { %v1371_v62 = vpop.f32.mrf.mxu0  ;;  %v1412_v60 = vpop.f32.mrf.mxu1 }
 0x581   :  { %5550 = vtanh.f32 %v1422_v55  ;;  %v7546_v62 = vld [vmem:[#allocation30_spill] sm:$0xff] }
 0x582   :  { %5552 = vtanh.f32 %v1416_v50 }
 0x583   :  { %5554 = vtanh.f32 %v1427_v48 }
 0x58c   :  { %v5549_v13 = vpop.eup %5548 }
 0x58d   :  { %v1420_v5 = vmul.f32 0.5, %v5549_v13 }
 0x58e   :  { %v5551_v1 = vpop.eup %5550 }
 0x58f   :  { %v1421_v59 = vadd.f32 0.5, %v1420_v5  ;;  %v1424_v56 = vmul.f32 0.5, %v5551_v1  ;;  %v5553_v9 = vpop.eup %5552 }
 0x590   :  { %v5555_v19 = vpop.eup %5554 }
 0x591   :  { %v1425_v8 = vadd.f32 0.5, %v1424_v56  ;;  %v1432_v3 = vmul.f32 %v5553_v9, %v1421_v59  ;;  %v1429_v2 = vmul.f32 0.5, %v5555_v19 }
 0x593   :  { %v1431_v51 = vmul.f32 %v1425_v8, %v6652_v61  ;;  %v1430_v49 = vadd.f32 0.5, %v1429_v2 }
 0x595   :  { %v6694_v6 = vadd.f32 %v1432_v3, %v1431_v51 }
 0x597   :  { %5556 = vtanh.f32 %v6694_v6 }
 0x5a4   :  { %v5557_v10 = vpop.eup %5556 }
 0x5a5   :  { %v1435_v54 = vmul.f32 %v5557_v10, %v1430_v49 }
 0x5a7   :  { %v1440_v52 = vpack.c.bf16 %v1435_v54, %v1435_v54 }
 0x5a9   :  { %1474 = vmatmul.mubr.bf16.vlgmr.msra.gmra.mxu0 %v1440_v52  ;;  %1515 = vmatmul.mubr.bf16.vlgmr.msra.gmra.mxu1 %v1440_v52 }
 0x5aa   :  { %1551 = vmatpush1.bf16.msra.mxu0 %v6251_v14  ;;  %1592 = vmatpush1.bf16.msra.mxu1 %v6253_v15 }
 0x5ab   :  { %1552 = vmatprep.subr.bf16.mxu0 %v6259_v16  ;;  %1593 = vmatprep.subr.bf16.mxu1 %v6261_v17 }
 0x5ac   :  { %1582 = vmatprep.mubr.bf16.mxu0 %v7542_v47  ;;  %1623 = vmatprep.mubr.bf16.mxu1 %v7542_v47 }
 0x5ae   :  { %1553 = vmatpush1.bf16.msra.mxu0 %v6263_v18  ;;  %1594 = vmatpush1.bf16.msra.mxu1 %v6265_v20 }
 0x5af   :  { %1554 = vmatprep.subr.bf16.mxu0 %v6271_v21  ;;  %1595 = vmatprep.subr.bf16.mxu1 %v6273_v22 }
 0x5b2   :  { %1555 = vmatpush1.bf16.msra.mxu0 %v6275_v23  ;;  %1596 = vmatpush1.bf16.msra.mxu1 %v6277_v24 }
 0x5b3   :  { %1556 = vmatprep.subr.bf16.mxu0 %v6283_v25  ;;  %1597 = vmatprep.subr.bf16.mxu1 %v6285_v26 }
 0x5b6   :  { %1557 = vmatpush1.bf16.msra.mxu0 %v6287_v27  ;;  %1598 = vmatpush1.bf16.msra.mxu1 %v6289_v28 }
 0x5b7   :  { %1558 = vmatprep.subr.bf16.mxu0 %v6295_v29  ;;  %1599 = vmatprep.subr.bf16.mxu1 %v6297_v30 }
 0x5ba   :  { %1559 = vmatpush1.bf16.msra.mxu0 %v6299_v31  ;;  %1600 = vmatpush1.bf16.msra.mxu1 %v6301_v32 }
 0x5bb   :  { %1560 = vmatprep.subr.bf16.mxu0 %v6307_v33  ;;  %1601 = vmatprep.subr.bf16.mxu1 %v6309_v34 }
 0x5be   :  { %1561 = vmatpush1.bf16.msra.mxu0 %v6311_v35  ;;  %1602 = vmatpush1.bf16.msra.mxu1 %v6313_v36 }
 0x5bf   :  { %1562 = vmatprep.subr.bf16.mxu0 %v6319_v37  ;;  %1603 = vmatprep.subr.bf16.mxu1 %v6321_v38 }
 0x5c2   :  { %1563 = vmatpush1.bf16.msra.mxu0 %v6323_v39  ;;  %1604 = vmatpush1.bf16.msra.mxu1 %v6325_v40 }
 0x5c3   :  { %1564 = vmatprep.subr.bf16.mxu0 %v6331_v41  ;;  %1605 = vmatprep.subr.bf16.mxu1 %v6333_v42 }
 0x5c6   :  { %1565 = vmatpush1.bf16.msra.mxu0 %v6335_v43  ;;  %1606 = vmatpush1.bf16.msra.mxu1 %v6337_v44 }
 0x5c7   :  { %1659 = vmatprep.subr.bf16.mxu0 %v6247_v11  ;;  %1700 = vmatprep.subr.bf16.mxu1 %v6249_v12  ;;  %v7547_v11 = vld [vmem:[#allocation32_spill] sm:$0xff] }
 0x669   :  { %v1475_v61 = vpop.f32.mrf.mxu0  ;;  %v1516_v53 = vpop.f32.mrf.mxu1 }
 0x66a   :  { %v1523_v7 = vadd.f32 %v1475_v61, %v7544_v58  ;;  %v1525_v60 = vadd.f32 %v1516_v53, %v7546_v62  ;;  %v6791_v62 = vld [vmem:[#allocation7 + $0xc4] ss:$16 sps:$4 sm:$0xff]  }
 0x66b   :  { %v1477_v63 = vpop.f32.mrf.mxu0  ;;  %v1518_v0 = vpop.f32.mrf.mxu1 }
 0x66c   :  { %v1527_v4 = vmul.f32 0.5, %v1523_v7  ;;  %v1524_v45 = vadd.f32 %v1477_v63, %v7545_v57  ;;  %v1526_v12 = vadd.f32 %v1518_v0, %v7547_v11  ;;  %v6808_v11 = vld [vmem:[#allocation7 + $0xac] ss:$16 sps:$4 sm:$0xff]  }
 0x66d   :  { %v1479_v50 = vpop.f32.mrf.mxu0  ;;  %v1520_v55 = vpop.f32.mrf.mxu1 }
 0x66e   :  { %5558 = vtanh.f32 %v1527_v4  ;;  %v1531_v46 = vmul.f32 0.5, %v1524_v45  ;;  %v1536_v5 = vmul.f32 0.5, %v1526_v12  ;;  %v6785_v50 = vld [vmem:[#allocation7 + $0xe0] ss:$16 sps:$4 sm:$0xff]   ;;  %v6788_v55 = vld [vmem:[#allocation7 + $0xe8] ss:$16 sps:$4 sm:$0xff]  }
 0x66f   :  { %v1480_v48 = vpop.f32.mrf.mxu0  ;;  %v1521_v13 = vpop.f32.mrf.mxu1  ;;  %v6811_v12 = vld [vmem:[#allocation7 + $0xa0] ss:$16 sps:$4 sm:$0xff]  }
 0x670   :  { %5560 = vtanh.f32 %v1531_v46  ;;  %v6799_v46 = vld [vmem:[#allocation7 + $0xc0] ss:$16 sps:$4 sm:$0xff]   ;;  %v6802_v48 = vld [vmem:[#allocation7 + $0xc8] ss:$16 sps:$4 sm:$0xff]   ;;  %v6805_v13 = vld [vmem:[#allocation7 + $0xa4] ss:$16 sps:$4 sm:$0xff]  }
 0x671   :  { %5562 = vtanh.f32 %v1525_v60  ;;  %v6794_v60 = vld [vmem:[#allocation7 + $0xcc] ss:$16 sps:$4 sm:$0xff]  }
 0x672   :  { %5564 = vtanh.f32 %v1536_v5  ;;  %v6814_v5 = vld [vmem:[#allocation7 + $0xa8] ss:$16 sps:$4 sm:$0xff]  }
 0x67b   :  { %v5559_v1 = vpop.eup %5558 }
 0x67c   :  { %v1529_v59 = vmul.f32 0.5, %v5559_v1  ;;  %v6817_v1 = vld [vmem:[#allocation7 + $0x84] ss:$16 sps:$4 sm:$0xff]  }
 0x67d   :  { %v5561_v56 = vpop.eup %5560 }
 0x67e   :  { %v1530_v9 = vadd.f32 0.5, %v1529_v59  ;;  %v1533_v8 = vmul.f32 0.5, %v5561_v56  ;;  %v5563_v3 = vpop.eup %5562  ;;  %v6820_v59 = vld [vmem:[#allocation7 + $0x8c] ss:$16 sps:$4 sm:$0xff]   ;;  %v6823_v56 = vld [vmem:[#allocation7 + $0x80] ss:$16 sps:$4 sm:$0xff]  }
 0x67f   :  { %v5565_v10 = vpop.eup %5564 }
 0x680   :  { %v1534_v51 = vadd.f32 0.5, %v1533_v8  ;;  %v1541_v19 = vmul.f32 %v5563_v3, %v1530_v9  ;;  %v1538_v54 = vmul.f32 0.5, %v5565_v10  ;;  %v6826_v9 = vld [vmem:[#allocation7 + $0x88] ss:$16 sps:$4 sm:$0xff]   ;;  %v6829_v8 = vld [vmem:[#allocation7 + $0x64] ss:$16 sps:$4 sm:$0xff]  }
 0x681   :  { %v6832_v3 = vld [vmem:[#allocation7 + $0x6c] ss:$16 sps:$4 sm:$0xff]   ;;  %v6847_v10 = vld [vmem:[#allocation7 + $0x40] ss:$16 sps:$4 sm:$0xff]  }
 0x682   :  { %v1540_v2 = vmul.f32 %v1534_v51, %v6694_v6  ;;  %v1539_v52 = vadd.f32 0.5, %v1538_v54  ;;  %v6835_v51 = vld [vmem:[#allocation7 + $0x60] ss:$16 sps:$4 sm:$0xff]   ;;  %v6850_v54 = vld [vmem:[#allocation7 + $0x48] ss:$16 sps:$4 sm:$0xff]  }
 0x684   :  { %v6736_v49 = vadd.f32 %v1541_v19, %v1540_v2  ;;  %v6838_v19 = vld [vmem:[#allocation7 + $0x68] ss:$16 sps:$4 sm:$0xff]   ;;  %v6841_v2 = vld [vmem:[#allocation7 + $0x44] ss:$16 sps:$4 sm:$0xff]  }
 0x686   :  { %5566 = vtanh.f32 %v6736_v49 }
 0x693   :  { %v5567_v61 = vpop.eup %5566 }
 0x694   :  { %v1544_v53 = vmul.f32 %v5567_v61, %v1539_v52  ;;  %v6853_v52 = vld [vmem:[#allocation7 + $0x24] ss:$16 sps:$4 sm:$0xff]   ;;  %v6856_v61 = vld [vmem:[#allocation7 + $0x2c] ss:$16 sps:$4 sm:$0xff]  }
 0x696   :  { %v1549_v58 = vpack.c.bf16 %v1544_v53, %v1544_v53  ;;  %v6859_v53 = vld [vmem:[#allocation7 + $0x20] ss:$16 sps:$4 sm:$0xff]  }
 0x698   :  { %1583 = vmatmul.mubr.bf16.vlgmr.msra.gmra.mxu0 %v1549_v58  ;;  %1624 = vmatmul.mubr.bf16.vlgmr.msra.gmra.mxu1 %v1549_v58  ;;  %v6862_v58 = vld [vmem:[#allocation7 + $0x28] ss:$16 sps:$4 sm:$0xff]  }
 0x699   :  { %1660 = vmatpush1.bf16.msra.mxu0 %v6251_v14  ;;  %1701 = vmatpush1.bf16.msra.mxu1 %v6253_v15  ;;  %v6771_v14 = vld [vmem:[#allocation7 + $0xe4] ss:$16 sps:$4 sm:$0xff]   ;;  %v6774_v15 = vld [vmem:[#allocation7 + $0xec] ss:$16 sps:$4 sm:$0xff]  }
 0x69a   :  { %1661 = vmatprep.subr.bf16.mxu0 %v6259_v16  ;;  %1702 = vmatprep.subr.bf16.mxu1 %v6261_v17 }
 0x69b   :  { %1691 = vmatprep.mubr.bf16.mxu0 %v7542_v47  ;;  %1732 = vmatprep.mubr.bf16.mxu1 %v7542_v47 }
 0x69d   :  { %1662 = vmatpush1.bf16.msra.mxu0 %v6263_v18  ;;  %1703 = vmatpush1.bf16.msra.mxu1 %v6265_v20  ;;  %v7548_v18 = vld [vmem:[#allocation34_spill] sm:$0xff] }
 0x69e   :  { %1663 = vmatprep.subr.bf16.mxu0 %v6271_v21  ;;  %1704 = vmatprep.subr.bf16.mxu1 %v6273_v22 }
 0x6a1   :  { %1664 = vmatpush1.bf16.msra.mxu0 %v6275_v23  ;;  %1705 = vmatpush1.bf16.msra.mxu1 %v6277_v24  ;;  %v7549_v24 = vld [vmem:[#allocation37_spill] sm:$0xff] }
 0x6a2   :  { %1665 = vmatprep.subr.bf16.mxu0 %v6283_v25  ;;  %1706 = vmatprep.subr.bf16.mxu1 %v6285_v26 }
 0x6a5   :  { %1666 = vmatpush1.bf16.msra.mxu0 %v6287_v27  ;;  %1707 = vmatpush1.bf16.msra.mxu1 %v6289_v28  ;;  %v7550_v28 = vld [vmem:[#allocation51_spill] sm:$0xff] }
 0x6a6   :  { %1667 = vmatprep.subr.bf16.mxu0 %v6295_v29  ;;  %1708 = vmatprep.subr.bf16.mxu1 %v6297_v30 }
 0x6a9   :  { %1668 = vmatpush1.bf16.msra.mxu0 %v6299_v31  ;;  %1709 = vmatpush1.bf16.msra.mxu1 %v6301_v32 }
 0x6aa   :  { %1669 = vmatprep.subr.bf16.mxu0 %v6307_v33  ;;  %1710 = vmatprep.subr.bf16.mxu1 %v6309_v34  ;;  %v7551_v33 = vld [vmem:[#allocation53_spill] sm:$0xff] }
 0x6ad   :  { %1670 = vmatpush1.bf16.msra.mxu0 %v6311_v35  ;;  %1711 = vmatpush1.bf16.msra.mxu1 %v6313_v36 }
 0x6ae   :  { %1671 = vmatprep.subr.bf16.mxu0 %v6319_v37  ;;  %1712 = vmatprep.subr.bf16.mxu1 %v6321_v38 }
 0x6b1   :  { %1672 = vmatpush1.bf16.msra.mxu0 %v6323_v39  ;;  %1713 = vmatpush1.bf16.msra.mxu1 %v6325_v40 }
 0x6b2   :  { %1673 = vmatprep.subr.bf16.mxu0 %v6331_v41  ;;  %1714 = vmatprep.subr.bf16.mxu1 %v6333_v42 }
 0x6b5   :  { %1674 = vmatpush1.bf16.msra.mxu0 %v6335_v43  ;;  %1715 = vmatpush1.bf16.msra.mxu1 %v6337_v44 }
 0x6b6   :  { %1768 = vmatprep.subr.bf16.mxu0 %v6771_v14  ;;  %1809 = vmatprep.subr.bf16.mxu1 %v6774_v15 }
 0x758   :  { %v1584_v16 = vpop.f32.mrf.mxu0  ;;  %v1625_v17 = vpop.f32.mrf.mxu1 }
 0x759   :  { %v1632_v20 = vadd.f32 %v1584_v16, %v7548_v18  ;;  %v1634_v29 = vadd.f32 %v1625_v17, %v7550_v28  ;;  %v6865_v16 = vld [vmem:[#allocation7 + $0x4] ss:$16 sps:$4 sm:$0xff]   ;;  %v6868_v17 = vld [vmem:[#allocation7 + $0xc] ss:$16 sps:$4 sm:$0xff]   ;;  %v6871_v18 = vld [vmem:[#allocation7] ss:$16 sps:$4 sm:$0xff]  }
 0x75a   :  { %v1586_v21 = vpop.f32.mrf.mxu0  ;;  %v1627_v22 = vpop.f32.mrf.mxu1  ;;  %v7553_v28 = vld [vmem:[#allocation41_spill] sm:$0xff] }
 0x75b   :  { %v1636_v23 = vmul.f32 0.5, %v1632_v20  ;;  %v1633_v25 = vadd.f32 %v1586_v21, %v7549_v24  ;;  %v1635_v34 = vadd.f32 %v1627_v22, %v7551_v33  ;;  %v6874_v20 = vld [vmem:[#allocation7 + $0x8] ss:$16 sps:$4 sm:$0xff]  }
 0x75c   :  { %v1588_v26 = vpop.f32.mrf.mxu0  ;;  %v1629_v27 = vpop.f32.mrf.mxu1 }
 0x75d   :  { %5568 = vtanh.f32 %v1636_v23  ;;  %v1640_v30 = vmul.f32 0.5, %v1633_v25  ;;  %v1645_v35 = vmul.f32 0.5, %v1635_v34  ;;  %v7552_v23 = vld [vmem:[#allocation39_spill] sm:$0xff] }
 0x75e   :  { %v1589_v31 = vpop.f32.mrf.mxu0  ;;  %v1630_v32 = vpop.f32.mrf.mxu1 }
 0x75f   :  { %5570 = vtanh.f32 %v1640_v30  ;;  %v7554_v32 = vld [vmem:[#allocation55_spill] sm:$0xff] }
 0x760   :  { %5572 = vtanh.f32 %v1634_v29 }
 0x761   :  { %5574 = vtanh.f32 %v1645_v35 }
 0x76a   :  { %v5569_v36 = vpop.eup %5568 }
 0x76b   :  { %v1638_v37 = vmul.f32 0.5, %v5569_v36 }
 0x76c   :  { %v5571_v38 = vpop.eup %5570 }
 0x76d   :  { %v1639_v39 = vadd.f32 0.5, %v1638_v37  ;;  %v1642_v40 = vmul.f32 0.5, %v5571_v38  ;;  %v5573_v41 = vpop.eup %5572 }
 0x76e   :  { %v5575_v7 = vpop.eup %5574 }
 0x76f   :  { %v1643_v42 = vadd.f32 0.5, %v1642_v40  ;;  %v1650_v43 = vmul.f32 %v5573_v41, %v1639_v39  ;;  %v1647_v63 = vmul.f32 0.5, %v5575_v7 }
 0x771   :  { %v1649_v44 = vmul.f32 %v1643_v42, %v6736_v49  ;;  %v1648_v0 = vadd.f32 0.5, %v1647_v63  ;;  %v6844_v49 = vld [vmem:[#allocation7 + $0x4c] ss:$16 sps:$4 sm:$0xff]  }
 0x773   :  { %v6782_v6 = vadd.f32 %v1650_v43, %v1649_v44 }
 0x775   :  { %5576 = vtanh.f32 %v6782_v6 }
 0x782   :  { %v5577_v4 = vpop.eup %5576 }
 0x783   :  { %v1653_v57 = vmul.f32 %v5577_v4, %v1648_v0 }
 0x785   :  { %v1658_v45 = vpack.c.bf16 %v1653_v57, %v1653_v57 }
 0x787   :  { %1692 = vmatmul.mubr.bf16.vlgmr.msra.gmra.mxu0 %v1658_v45  ;;  %1733 = vmatmul.mubr.bf16.vlgmr.msra.gmra.mxu1 %v1658_v45 }
 0x788   :  { %1769 = vmatpush1.bf16.msra.mxu0 %v6785_v50  ;;  %1810 = vmatpush1.bf16.msra.mxu1 %v6788_v55 }
 0x789   :  { %1770 = vmatprep.subr.bf16.mxu0 %v6791_v62  ;;  %1811 = vmatprep.subr.bf16.mxu1 %v6794_v60 }
 0x78a   :  { %1800 = vmatprep.mubr.bf16.mxu0 %v7542_v47  ;;  %1841 = vmatprep.mubr.bf16.mxu1 %v7542_v47 }
 0x78c   :  { %1771 = vmatpush1.bf16.msra.mxu0 %v6799_v46  ;;  %1812 = vmatpush1.bf16.msra.mxu1 %v6802_v48 }
 0x78d   :  { %1772 = vmatprep.subr.bf16.mxu0 %v6805_v13  ;;  %1813 = vmatprep.subr.bf16.mxu1 %v6808_v11 }
 0x790   :  { %1773 = vmatpush1.bf16.msra.mxu0 %v6811_v12  ;;  %1814 = vmatpush1.bf16.msra.mxu1 %v6814_v5 }
 0x791   :  { %1774 = vmatprep.subr.bf16.mxu0 %v6817_v1  ;;  %1815 = vmatprep.subr.bf16.mxu1 %v6820_v59 }
 0x794   :  { %1775 = vmatpush1.bf16.msra.mxu0 %v6823_v56  ;;  %1816 = vmatpush1.bf16.msra.mxu1 %v6826_v9 }
 0x795   :  { %1776 = vmatprep.subr.bf16.mxu0 %v6829_v8  ;;  %1817 = vmatprep.subr.bf16.mxu1 %v6832_v3 }
 0x798   :  { %1777 = vmatpush1.bf16.msra.mxu0 %v6835_v51  ;;  %1818 = vmatpush1.bf16.msra.mxu1 %v6838_v19 }
 0x799   :  { %1778 = vmatprep.subr.bf16.mxu0 %v6841_v2  ;;  %1819 = vmatprep.subr.bf16.mxu1 %v6844_v49 }
 0x79c   :  { %1779 = vmatpush1.bf16.msra.mxu0 %v6847_v10  ;;  %1820 = vmatpush1.bf16.msra.mxu1 %v6850_v54 }
 0x79d   :  { %1780 = vmatprep.subr.bf16.mxu0 %v6853_v52  ;;  %1821 = vmatprep.subr.bf16.mxu1 %v6856_v61 }
 0x7a0   :  { %1781 = vmatpush1.bf16.msra.mxu0 %v6859_v53  ;;  %1822 = vmatpush1.bf16.msra.mxu1 %v6862_v58 }
 0x7a1   :  { %1782 = vmatprep.subr.bf16.mxu0 %v6865_v16  ;;  %1823 = vmatprep.subr.bf16.mxu1 %v6868_v17 }
 0x7a4   :  { %1783 = vmatpush1.bf16.msra.mxu0 %v6871_v18  ;;  %1824 = vmatpush1.bf16.msra.mxu1 %v6874_v20 }
 0x7a5   :  { %1877 = vmatprep.subr.bf16.mxu0 %v6771_v14  ;;  %1918 = vmatprep.subr.bf16.mxu1 %v6774_v15  ;;  %v7555_v14 = vld [vmem:[#allocation57_spill] sm:$0xff] }
 0x847   :  { %v1693_v21 = vpop.f32.mrf.mxu0  ;;  %v1734_v22 = vpop.f32.mrf.mxu1 }
 0x848   :  { %v1741_v24 = vadd.f32 %v1693_v21, %v7552_v23  ;;  %v1743_v33 = vadd.f32 %v1734_v22, %v7554_v32  ;;  %v5411_v32 = vld [vmem:[#allocation9 + $0x20] sm:$0xff]  }
 0x849   :  { %v1695_v25 = vpop.f32.mrf.mxu0  ;;  %v1736_v26 = vpop.f32.mrf.mxu1 }
 0x84a   :  { %v1745_v27 = vmul.f32 0.5, %v1741_v24  ;;  %v1742_v29 = vadd.f32 %v1695_v25, %v7553_v28  ;;  %v1744_v15 = vadd.f32 %v1736_v26, %v7555_v14  ;;  %v5416_v14 = vld [vmem:[#allocation12 + $0x38] sm:$0xff]  }
 0x84b   :  { %v1697_v30 = vpop.f32.mrf.mxu0  ;;  %v1738_v31 = vpop.f32.mrf.mxu1 }
 0x84c   :  { %5578 = vtanh.f32 %v1745_v27  ;;  %v1749_v34 = vmul.f32 0.5, %v1742_v29  ;;  %v1754_v37 = vmul.f32 0.5, %v1744_v15  ;;  %v5408_v29 = vld [vmem:[#allocation9 + $0x38] sm:$0xff]   ;;  %v5409_v30 = vld [vmem:[#allocation9 + $0x30] sm:$0xff]   ;;  %v5410_v31 = vld [vmem:[#allocation9 + $0x28] sm:$0xff]  }
 0x84d   :  { %v1698_v35 = vpop.f32.mrf.mxu0  ;;  %v1739_v36 = vpop.f32.mrf.mxu1  ;;  %v5417_v15 = vld [vmem:[#allocation12 + $0x30] sm:$0xff]  }
 0x84e   :  { %5580 = vtanh.f32 %v1749_v34  ;;  %v5413_v34 = vld [vmem:[#allocation9 + $0x10] sm:$0xff]   ;;  %v5414_v35 = vld [vmem:[#allocation9 + $0x8] sm:$0xff]   ;;  %v5415_v36 = vld [vmem:[#allocation9] sm:$0xff]  }
 0x84f   :  { %5582 = vtanh.f32 %v1743_v33  ;;  %v5412_v33 = vld [vmem:[#allocation9 + $0x18] sm:$0xff]  }
 0x850   :  { %5584 = vtanh.f32 %v1754_v37  ;;  %v5418_v37 = vld [vmem:[#allocation12 + $0x28] sm:$0xff]  }
 0x859   :  { %v5579_v38 = vpop.eup %5578 }
 0x85a   :  { %v1747_v39 = vmul.f32 0.5, %v5579_v38  ;;  %v5419_v38 = vld [vmem:[#allocation12 + $0x20] sm:$0xff]  }
 0x85b   :  { %v5581_v40 = vpop.eup %5580 }
 0x85c   :  { %v1748_v41 = vadd.f32 0.5, %v1747_v39  ;;  %v1751_v42 = vmul.f32 0.5, %v5581_v40  ;;  %v5583_v43 = vpop.eup %5582  ;;  %v5420_v39 = vld [vmem:[#allocation12 + $0x18] sm:$0xff]   ;;  %v5421_v40 = vld [vmem:[#allocation12 + $0x10] sm:$0xff]  }
 0x85d   :  { %v5585_v4 = vpop.eup %5584 }
 0x85e   :  { %v1752_v44 = vadd.f32 0.5, %v1751_v42  ;;  %v1759_v7 = vmul.f32 %v5583_v43, %v1748_v41  ;;  %v1756_v57 = vmul.f32 0.5, %v5585_v4  ;;  %v5422_v41 = vld [vmem:[#allocation12 + $0x8] sm:$0xff]  }
 0x860   :  { %v1758_v63 = vmul.f32 %v1752_v44, %v6782_v6  ;;  %v1757_v45 = vadd.f32 0.5, %v1756_v57  ;;  %v7556_v6 = vmov 0.0   ;;  %v7561_v44 = vld [vmem:[#allocation47_spill] sm:$0xff]  ;;  %v7562_v57 = vld [vmem:[#allocation49_spill] sm:$0xff] }
 0x862   :  { %v6884_v0 = vadd.f32 %v1759_v7, %v1758_v63 }
 0x864   :  { %5586 = vtanh.f32 %v6884_v0 }
 0x871   :  { %v5587_v21 = vpop.eup %5586 }
 0x872   :  { %v1762_v22 = vmul.f32 %v5587_v21, %v1757_v45 }
 0x874   :  { %v1767_v23 = vpack.c.bf16 %v1762_v22, %v1762_v22 }
 0x876   :  { %1801 = vmatmul.mubr.bf16.vlgmr.msra.gmra.mxu0 %v1767_v23  ;;  %1842 = vmatmul.mubr.bf16.vlgmr.msra.gmra.mxu1 %v1767_v23  ;;  %v7563_v23 = vld [vmem:[#allocation63_spill] sm:$0xff] }
 0x877   :  { %1878 = vmatpush1.bf16.msra.mxu0 %v6785_v50  ;;  %1919 = vmatpush1.bf16.msra.mxu1 %v6788_v55 }
 0x878   :  { %1879 = vmatprep.subr.bf16.mxu0 %v6791_v62  ;;  %1920 = vmatprep.subr.bf16.mxu1 %v6794_v60  ;;  %v7557_v62 = vld [vmem:[#allocation43_spill] sm:$0xff] }
 0x879   :  { %1909 = vmatprep.mubr.bf16.mxu0 %v7542_v47  ;;  %1950 = vmatprep.mubr.bf16.mxu1 %v7542_v47 }
 0x87b   :  { %1880 = vmatpush1.bf16.msra.mxu0 %v6799_v46  ;;  %1921 = vmatpush1.bf16.msra.mxu1 %v6802_v48 }
 0x87c   :  { %1881 = vmatprep.subr.bf16.mxu0 %v6805_v13  ;;  %1922 = vmatprep.subr.bf16.mxu1 %v6808_v11  ;;  %v7558_v11 = vld [vmem:[#allocation45_spill] sm:$0xff] }
 0x87f   :  { %1882 = vmatpush1.bf16.msra.mxu0 %v6811_v12  ;;  %1923 = vmatpush1.bf16.msra.mxu1 %v6814_v5 }
 0x880   :  { %1883 = vmatprep.subr.bf16.mxu0 %v6817_v1  ;;  %1924 = vmatprep.subr.bf16.mxu1 %v6820_v59  ;;  %v7559_v59 = vld [vmem:[#allocation59_spill] sm:$0xff] }
 0x883   :  { %1884 = vmatpush1.bf16.msra.mxu0 %v6823_v56  ;;  %1925 = vmatpush1.bf16.msra.mxu1 %v6826_v9 }
 0x884   :  { %1885 = vmatprep.subr.bf16.mxu0 %v6829_v8  ;;  %1926 = vmatprep.subr.bf16.mxu1 %v6832_v3 }
 0x887   :  { %1886 = vmatpush1.bf16.msra.mxu0 %v6835_v51  ;;  %1927 = vmatpush1.bf16.msra.mxu1 %v6838_v19  ;;  %v7560_v51 = vld [vmem:[#allocation61_spill] sm:$0xff] }
 0x888   :  { %1887 = vmatprep.subr.bf16.mxu0 %v6841_v2  ;;  %1928 = vmatprep.subr.bf16.mxu1 %v6844_v49 }
 0x88b   :  { %1888 = vmatpush1.bf16.msra.mxu0 %v6847_v10  ;;  %1929 = vmatpush1.bf16.msra.mxu1 %v6850_v54 }
 0x88c   :  { %1889 = vmatprep.subr.bf16.mxu0 %v6853_v52  ;;  %1930 = vmatprep.subr.bf16.mxu1 %v6856_v61 }
 0x88f   :  { %1890 = vmatpush1.bf16.msra.mxu0 %v6859_v53  ;;  %1931 = vmatpush1.bf16.msra.mxu1 %v6862_v58 }
 0x890   :  { %1891 = vmatprep.subr.bf16.mxu0 %v6865_v16  ;;  %1932 = vmatprep.subr.bf16.mxu1 %v6868_v17 }
 0x893   :  { %1892 = vmatpush1.bf16.msra.mxu0 %v6871_v18  ;;  %1933 = vmatpush1.bf16.msra.mxu1 %v6874_v20 }
 0x894   :  { %5260 = vmatprep.subr.bf16.mxu0 %v7556_v6  ;;  %5280 = vmatprep.subr.bf16.mxu1 %v7556_v6 }
 0x936   :  { %v1802_v50 = vpop.f32.mrf.mxu0  ;;  %v1843_v55 = vpop.f32.mrf.mxu1 }
 0x937   :  { %v1850_v60 = vadd.f32 %v1802_v50, %v7557_v62  ;;  %v1852_v56 = vadd.f32 %v1843_v55, %v7559_v59 }
 0x938   :  { %v1804_v46 = vpop.f32.mrf.mxu0  ;;  %v1845_v48 = vpop.f32.mrf.mxu1 }
 0x939   :  { %v1854_v13 = vmul.f32 0.5, %v1850_v60  ;;  %v1851_v12 = vadd.f32 %v1804_v46, %v7558_v11  ;;  %v1853_v19 = vadd.f32 %v1845_v48, %v7560_v51 }
 0x93a   :  { %v1806_v5 = vpop.f32.mrf.mxu0  ;;  %v1847_v1 = vpop.f32.mrf.mxu1 }
 0x93b   :  { %5588 = vtanh.f32 %v1854_v13  ;;  %v1858_v9 = vmul.f32 0.5, %v1851_v12  ;;  %v1863_v2 = vmul.f32 0.5, %v1853_v19 }
 0x93c   :  { %v1807_v8 = vpop.f32.mrf.mxu0  ;;  %v1848_v3 = vpop.f32.mrf.mxu1 }
 0x93d   :  { %5590 = vtanh.f32 %v1858_v9 }
 0x93e   :  { %5592 = vtanh.f32 %v1852_v56 }
 0x93f   :  { %5594 = vtanh.f32 %v1863_v2 }
 0x948   :  { %v5589_v49 = vpop.eup %5588 }
 0x949   :  { %v1856_v10 = vmul.f32 0.5, %v5589_v49 }
 0x94a   :  { %v5591_v54 = vpop.eup %5590 }
 0x94b   :  { %v1857_v52 = vadd.f32 0.5, %v1856_v10  ;;  %v1860_v61 = vmul.f32 0.5, %v5591_v54  ;;  %v5593_v53 = vpop.eup %5592 }
 0x94c   :  { %v5595_v20 = vpop.eup %5594 }
 0x94d   :  { %v1861_v58 = vadd.f32 0.5, %v1860_v61  ;;  %v1868_v16 = vmul.f32 %v5593_v53, %v1857_v52  ;;  %v1865_v24 = vmul.f32 0.5, %v5595_v20  ;;  %v5423_v52 = vld [vmem:[#allocation12] sm:$0xff]  }
 0x94e   :  { %v6953_v61 = vld [vmem:[#allocation15 + $0xe0] ss:$16 sps:$4 sm:$0xff]   ;;  %v6955_v53 = vld [vmem:[#allocation15 + $0xe4] ss:$16 sps:$4 sm:$0xff]  }
 0x94f   :  { %v1867_v17 = vmul.f32 %v1861_v58, %v6884_v0  ;;  %v1866_v25 = vadd.f32 0.5, %v1865_v24  ;;  %v6957_v58 = vld [vmem:[#allocation15 + $0xec] ss:$16 sps:$4 sm:$0xff]   ;;  %v6970_v20 = vld [vmem:[#allocation15 + $0xa0] ss:$16 sps:$4 sm:$0xff]  }
 0x950   :  { %v6973_v24 = vld [vmem:[#allocation15 + $0x84] ss:$16 sps:$4 sm:$0xff]  }
 0x951   :  { %v6926_v18 = vadd.f32 %v1868_v16, %v1867_v17  ;;  %v6959_v16 = vld [vmem:[#allocation15 + $0xc4] ss:$16 sps:$4 sm:$0xff]   ;;  %v6964_v17 = vld [vmem:[#allocation15 + $0xc0] ss:$16 sps:$4 sm:$0xff]  }
 0x953   :  { %5596 = vtanh.f32 %v6926_v18 }
 0x960   :  { %v5597_v26 = vpop.eup %5596 }
 0x961   :  { %v1871_v27 = vmul.f32 %v5597_v26, %v1866_v25  ;;  %v6976_v25 = vld [vmem:[#allocation15 + $0x80] ss:$16 sps:$4 sm:$0xff]   ;;  %v6979_v26 = vld [vmem:[#allocation15 + $0x64] ss:$16 sps:$4 sm:$0xff]  }
 0x963   :  { %v1876_v28 = vpack.c.bf16 %v1871_v27, %v1871_v27  ;;  %v6982_v27 = vld [vmem:[#allocation15 + $0x60] ss:$16 sps:$4 sm:$0xff]  }
 0x965   :  { %1910 = vmatmul.mubr.bf16.vlgmr.msra.gmra.mxu0 %v1876_v28  ;;  %1951 = vmatmul.mubr.bf16.vlgmr.msra.gmra.mxu1 %v1876_v28  ;;  %v6985_v28 = vld [vmem:[#allocation15 + $0x44] ss:$16 sps:$4 sm:$0xff]  }
 0x966   :  { %5276 = vmatprep.mubr.msk.bf16.mxu0 %vm5969_vm10, %v7556_v6  ;;  %5296 = vmatprep.mubr.msk.bf16.mxu1 %vm5969_vm10, %v7556_v6 }
 0x967   :  { %5261 = vmatpush3.bf16.msra.mxu0 %v5408_v29  ;;  %5281 = vmatpush3.bf16.msra.mxu1 %v5416_v14  ;;  %v6988_v29 = vld [vmem:[#allocation15 + $0x40] ss:$16 sps:$4 sm:$0xff]  }
 0x968   :  { %5262 = vmatprep.subr.bf16.mxu0 %v7556_v6  ;;  %5282 = vmatprep.subr.bf16.mxu1 %v7556_v6 }
 0x96b   :  { %5263 = vmatpush3.bf16.msra.mxu0 %v5409_v30  ;;  %5283 = vmatpush3.bf16.msra.mxu1 %v5417_v15  ;;  %v6991_v30 = vld [vmem:[#allocation15 + $0x24] ss:$16 sps:$4 sm:$0xff]   ;;  %v7000_v15 = vld [vmem:[#allocation15 + $0xcc] ss:$16 sps:$4 sm:$0xff]  }
 0x96c   :  { %5264 = vmatprep.subr.bf16.mxu0 %v7556_v6  ;;  %5284 = vmatprep.subr.bf16.mxu1 %v7556_v6 }
 0x96f   :  { %5265 = vmatpush3.bf16.msra.mxu0 %v5410_v31  ;;  %5285 = vmatpush3.bf16.msra.mxu1 %v5418_v37  ;;  %v6994_v31 = vld [vmem:[#allocation15 + $0x20] ss:$16 sps:$4 sm:$0xff]  }
 0x970   :  { %5266 = vmatprep.subr.bf16.mxu0 %v7556_v6  ;;  %5286 = vmatprep.subr.bf16.mxu1 %v7556_v6 }
 0x973   :  { %5267 = vmatpush3.bf16.msra.mxu0 %v5411_v32  ;;  %5287 = vmatpush3.bf16.msra.mxu1 %v5419_v38  ;;  %v4894_v32 = vld [vmem:[#allocation10] ss:$0 sm:$0xff] }
 0x974   :  { %5268 = vmatprep.subr.bf16.mxu0 %v7556_v6  ;;  %5288 = vmatprep.subr.bf16.mxu1 %v7556_v6 }
 0x977   :  { %5269 = vmatpush3.bf16.msra.mxu0 %v5412_v33  ;;  %5289 = vmatpush3.bf16.msra.mxu1 %v5420_v39  ;;  %v7003_v39 = vld [vmem:[#allocation15 + $0xc8] ss:$16 sps:$4 sm:$0xff]  }
 0x978   :  { %5270 = vmatprep.subr.bf16.mxu0 %v7556_v6  ;;  %5290 = vmatprep.subr.bf16.mxu1 %v7556_v6 }
 0x97b   :  { %5271 = vmatpush3.bf16.msra.mxu0 %v5413_v34  ;;  %5291 = vmatpush3.bf16.msra.mxu1 %v5421_v40  ;;  %v7007_v40 = vld [vmem:[#allocation15 + $0xac] ss:$16 sps:$4 sm:$0xff]  }
 0x97c   :  { %5272 = vmatprep.subr.bf16.mxu0 %v7556_v6  ;;  %5292 = vmatprep.subr.bf16.mxu1 %v7556_v6 }
 0x97f   :  { %5273 = vmatpush3.bf16.msra.mxu0 %v5414_v35  ;;  %5293 = vmatpush3.bf16.msra.mxu1 %v5422_v41  ;;  %v7010_v41 = vld [vmem:[#allocation15 + $0xa8] ss:$16 sps:$4 sm:$0xff]  }
 0x980   :  { %5274 = vmatprep.subr.bf16.mxu0 %v7556_v6  ;;  %5294 = vmatprep.subr.bf16.mxu1 %v7556_v6  ;;  %v7564_v6 = vld [vmem:[#allocation65_spill] sm:$0xff] }
 0x983   :  { %5275 = vmatpush3.bf16.msra.mxu0 %v5415_v36  ;;  %5295 = vmatpush3.bf16.msra.mxu1 %v5423_v52  ;;  %v6998_v36 = vld [vmem:[#allocation15 + $0xe8] ss:$16 sps:$4 sm:$0xff]  }
 0x984   :  { %2403 = vmatprep.subr.bf16.mxu0 %v6955_v53  ;;  %2444 = vmatprep.subr.bf16.mxu1 %v6957_v58 }
 0xa25   :  { %v1911_v42 = vpop.f32.mrf.mxu0  ;;  %v1952_v43 = vpop.f32.mrf.mxu1 }
 0xa26   :  { %v1959_v7 = vadd.f32 %v1911_v42, %v7561_v44  ;;  %v1961_v50 = vadd.f32 %v1952_v43, %v7563_v23  ;;  %v7013_v42 = vld [vmem:[#allocation15 + $0x8c] ss:$16 sps:$4 sm:$0xff]   ;;  %v7016_v43 = vld [vmem:[#allocation15 + $0x88] ss:$16 sps:$4 sm:$0xff]  }
 0xa27   :  { %v1913_v63 = vpop.f32.mrf.mxu0  ;;  %v1954_v0 = vpop.f32.mrf.mxu1  ;;  %v7019_v44 = vld [vmem:[#allocation15 + $0x6c] ss:$16 sps:$4 sm:$0xff]   ;;  %v7044_v23 = vld [vmem:[#allocation15 + $0x8] ss:$16 sps:$4 sm:$0xff]  }
 0xa28   :  { %v1963_v4 = vmul.f32 0.5, %v1959_v7  ;;  %v1960_v45 = vadd.f32 %v1913_v63, %v7562_v57  ;;  %v1962_v46 = vadd.f32 %v1954_v0, %v7564_v6  ;;  %v7022_v7 = vld [vmem:[#allocation15 + $0x68] ss:$16 sps:$4 sm:$0xff]   ;;  %v7025_v63 = vld [vmem:[#allocation15 + $0x4c] ss:$16 sps:$4 sm:$0xff]  }
 0xa29   :  { %v1915_v21 = vpop.f32.mrf.mxu0  ;;  %v1956_v22 = vpop.f32.mrf.mxu1  ;;  %v7028_v0 = vld [vmem:[#allocation15 + $0x48] ss:$16 sps:$4 sm:$0xff]  }
 0xa2a   :  { %5598 = vtanh.f32 %v1963_v4  ;;  %v1967_v55 = vmul.f32 0.5, %v1960_v45  ;;  %v1972_v48 = vmul.f32 0.5, %v1962_v46  ;;  %v7031_v4 = vld [vmem:[#allocation15 + $0x2c] ss:$16 sps:$4 sm:$0xff]   ;;  %v7034_v57 = vld [vmem:[#allocation15 + $0x28] ss:$16 sps:$4 sm:$0xff]  }
 0xa2b   :  { %v1916_v62 = vpop.f32.mrf.mxu0  ;;  %v1957_v60 = vpop.f32.mrf.mxu1  ;;  %v7038_v45 = vld [vmem:[#allocation15 + $0x4] ss:$16 sps:$4 sm:$0xff]   ;;  %v7040_v21 = vld [vmem:[#allocation15 + $0xc] ss:$16 sps:$4 sm:$0xff]   ;;  %v7042_v22 = vld [vmem:[#allocation15] ss:$16 sps:$4 sm:$0xff]  }
 0xa2c   :  { %5600 = vtanh.f32 %v1967_v55 }
 0xa2d   :  { %5602 = vtanh.f32 %v1961_v50  ;;  %v4903_v50 = vld [vmem:[#allocation13] ss:$0 sm:$0xff] }
 0xa2e   :  { %5604 = vtanh.f32 %v1972_v48 }
 0xa37   :  { %v5599_v13 = vpop.eup %5598 }
 0xa38   :  { %v1965_v11 = vmul.f32 0.5, %v5599_v13  ;;  %v7565_v13 = vld [vmem:[#allocation68_spill] sm:$0xff] }
 0xa39   :  { %v5601_v12 = vpop.eup %5600 }
 0xa3a   :  { %v1966_v5 = vadd.f32 0.5, %v1965_v11  ;;  %v1969_v1 = vmul.f32 0.5, %v5601_v12  ;;  %v5603_v59 = vpop.eup %5602  ;;  %v7566_v11 = vld [vmem:[#allocation66_spill] sm:$0xff] }
 0xa3b   :  { %v5605_v51 = vpop.eup %5604  ;;  %v629_v12 = vadd.f32 %v7566_v11, %v7565_v13 }
 0xa3c   :  { %v1970_v56 = vadd.f32 0.5, %v1969_v1  ;;  %v1977_v9 = vmul.f32 %v5603_v59, %v1966_v5  ;;  %v1974_v19 = vmul.f32 0.5, %v5605_v51  ;;  %v7567_v59 = vld [vmem:[#allocation69_spill] sm:$0xff] }
 0xa3e   :  { %v1976_v8 = vmul.f32 %v1970_v56, %v6926_v18  ;;  %v1975_v2 = vadd.f32 0.5, %v1974_v19  ;;  %v6967_v18 = vld [vmem:[#allocation15 + $0xa4] ss:$16 sps:$4 sm:$0xff]   ;;  %v7568_v56 = vld [vmem:[#allocation67_spill] sm:$0xff] }
 0xa3f   :  { %v7569_v19 = vld [vmem:[#allocation36_spill] sm:$0xff] }
 0xa40   :  { %v1978_v3 = vadd.f32 %v1977_v9, %v1976_v8  ;;  %v631_v9 = vadd.f32 %v7568_v56, %v7567_v59 }
 0xa42   :  { %5606 = vtanh.f32 %v1978_v3 }
 0xa4f   :  { %v5607_v49 = vpop.eup %5606 }
 0xa50   :  { %v1980_v10 = vmul.f32 %v5607_v49, %v1975_v2  ;;  %v7570_v2 = vld [vmem:[#allocation33_spill] sm:$0xff] }
 0xa51   :  { %v702_v49 = vadd.f32 %v7570_v2, %v7569_v19 }
 0xa52   :  { %v1981_v54 = vpack.c.bf16 %v1980_v10, %v1980_v10 }
 0xa54   :  { %5277 = vmatmul.mubr.bf16.vlgmr.msra.gmra.mxu0 %v1981_v54 }
 0xa55   :  { %2435 = vmatprep.mubr.bf16.mxu0 %v7542_v47  ;;  %2404 = vmatpush1.bf16.msra.mxu0 %v6953_v61 }
 0xa56   :  { %2405 = vmatprep.subr.bf16.mxu0 %v6959_v16 }
 0xa59   :  { %2406 = vmatpush1.bf16.msra.mxu0 %v6964_v17 }
 0xa5a   :  { %2407 = vmatprep.subr.bf16.mxu0 %v6967_v18 }
 0xa5d   :  { %2408 = vmatpush1.bf16.msra.mxu0 %v6970_v20 }
 0xa5e   :  { %2409 = vmatprep.subr.bf16.mxu0 %v6973_v24 }
 0xa61   :  { %2410 = vmatpush1.bf16.msra.mxu0 %v6976_v25 }
 0xa62   :  { %2411 = vmatprep.subr.bf16.mxu0 %v6979_v26 }
 0xa65   :  { %2412 = vmatpush1.bf16.msra.mxu0 %v6982_v27 }
 0xa66   :  { %2413 = vmatprep.subr.bf16.mxu0 %v6985_v28 }
 0xa69   :  { %2414 = vmatpush1.bf16.msra.mxu0 %v6988_v29 }
 0xa6a   :  { %2415 = vmatprep.subr.bf16.mxu0 %v6991_v30 }
 0xa6d   :  { %2416 = vmatpush1.bf16.msra.mxu0 %v6994_v31 }
 0xa6e   :  { %2417 = vmatprep.subr.bf16.mxu0 %v7038_v45 }
 0xa71   :  { %2418 = vmatpush1.bf16.msra.mxu0 %v7042_v22 }
 0xa72   :  { %2705 = vmatprep.subr.bf16.mxu0 %v6955_v53 }
 0xb14   :  { %v2087_v33 = vpop.f32.mrf.mxu0 }
 0xb15   :  { %v2088_v34 = vadd.f32 %v4894_v32, %v2087_v33 }
 0xb16   :  { %v5278_v35 = vpop.f32.mrf.mxu0 }
 0xb17   :  { %v2094_v14 = vpack.c.bf16 %v2088_v34, %v2088_v34  ;;  %2093 = vst [vmem:[#allocation20] sm:$0xff] %v2088_v34 }
 0xb18   :  { %v2090_v37 = vpop.f32.mrf.mxu0 }
 0xb19   :  { %5297 = vmatmul.mubr.bf16.vlgmr.msra.gmra.mxu1 %v2094_v14  ;;  %v7571_v37 = vld [vmem:[#allocation38_spill] sm:$0xff] }
 0xb1a   :  { %v5279_v38 = vpop.f32.mrf.mxu0  ;;  %2445 = vmatpush1.bf16.msra.mxu1 %v6998_v36  ;;  %2476 = vmatprep.mubr.bf16.mxu1 %v7542_v47 }
 0xb1b   :  { %2446 = vmatprep.subr.bf16.mxu1 %v7000_v15  ;;  %v7572_v38 = vld [vmem:[#allocation35_spill] sm:$0xff] }
 0xb1e   :  { %2447 = vmatpush1.bf16.msra.mxu1 %v7003_v39 }
 0xb1f   :  { %2448 = vmatprep.subr.bf16.mxu1 %v7007_v40 }
 0xb22   :  { %2449 = vmatpush1.bf16.msra.mxu1 %v7010_v41 }
 0xb23   :  { %2450 = vmatprep.subr.bf16.mxu1 %v7013_v42 }
 0xb26   :  { %2451 = vmatpush1.bf16.msra.mxu1 %v7016_v43 }
 0xb27   :  { %2452 = vmatprep.subr.bf16.mxu1 %v7019_v44 }
 0xb2a   :  { %2453 = vmatpush1.bf16.msra.mxu1 %v7022_v7 }
 0xb2b   :  { %2454 = vmatprep.subr.bf16.mxu1 %v7025_v63 }
 0xb2e   :  { %2455 = vmatpush1.bf16.msra.mxu1 %v7028_v0 }
 0xb2f   :  { %2456 = vmatprep.subr.bf16.mxu1 %v7031_v4 }
 0xb32   :  { %2457 = vmatpush1.bf16.msra.mxu1 %v7034_v57 }
 0xb33   :  { %2458 = vmatprep.subr.bf16.mxu1 %v7040_v21 }
 0xb36   :  { %2459 = vmatpush1.bf16.msra.mxu1 %v7044_v23 }
 0xb37   :  { %2746 = vmatprep.subr.bf16.mxu1 %v6957_v58 }
 0xbd9   :  { %v2200_v55 = vpop.f32.mrf.mxu1 }
 0xbda   :  { %v2201_v62 = vadd.f32 %v4903_v50, %v2200_v55  ;;  %v704_v50 = vadd.f32 %v7572_v38, %v7571_v37 }
 0xbdb   :  { %v5298_v60 = vpop.f32.mrf.mxu1 }
 0xbdc   :  { %v2210_v6 = vpack.c.bf16 %v2201_v62, %v2201_v62 }
 0xbdd   :  { %v2203_v46 = vpop.f32.mrf.mxu1 }
 0xbde   :  { %2436 = vmatmul.mubr.bf16.vlgmr.msra.gmra.mxu0 %v2210_v6  ;;  %2477 = vmatmul.mubr.bf16.vlgmr.msra.gmra.mxu1 %v2210_v6 }
 0xbdf   :  { %v5299_v48 = vpop.f32.mrf.mxu1  ;;  %2706 = vmatpush1.bf16.msra.mxu0 %v6953_v61  ;;  %2747 = vmatpush1.bf16.msra.mxu1 %v6998_v36 }
 0xbe0   :  { %2707 = vmatprep.subr.bf16.mxu0 %v6959_v16  ;;  %2748 = vmatprep.subr.bf16.mxu1 %v7000_v15 }
 0xbe1   :  { %2737 = vmatprep.mubr.bf16.mxu0 %v7542_v47  ;;  %2778 = vmatprep.mubr.bf16.mxu1 %v7542_v47 }
 0xbe3   :  { %2708 = vmatpush1.bf16.msra.mxu0 %v6964_v17  ;;  %2749 = vmatpush1.bf16.msra.mxu1 %v7003_v39 }
 0xbe4   :  { %2709 = vmatprep.subr.bf16.mxu0 %v6967_v18  ;;  %2750 = vmatprep.subr.bf16.mxu1 %v7007_v40 }
 0xbe7   :  { %2710 = vmatpush1.bf16.msra.mxu0 %v6970_v20  ;;  %2751 = vmatpush1.bf16.msra.mxu1 %v7010_v41 }
 0xbe8   :  { %2711 = vmatprep.subr.bf16.mxu0 %v6973_v24  ;;  %2752 = vmatprep.subr.bf16.mxu1 %v7013_v42 }
 0xbeb   :  { %2712 = vmatpush1.bf16.msra.mxu0 %v6976_v25  ;;  %2753 = vmatpush1.bf16.msra.mxu1 %v7016_v43 }
 0xbec   :  { %2713 = vmatprep.subr.bf16.mxu0 %v6979_v26  ;;  %2754 = vmatprep.subr.bf16.mxu1 %v7019_v44 }
 0xbef   :  { %2714 = vmatpush1.bf16.msra.mxu0 %v6982_v27  ;;  %2755 = vmatpush1.bf16.msra.mxu1 %v7022_v7 }
 0xbf0   :  { %2715 = vmatprep.subr.bf16.mxu0 %v6985_v28  ;;  %2756 = vmatprep.subr.bf16.mxu1 %v7025_v63 }
 0xbf3   :  { %2716 = vmatpush1.bf16.msra.mxu0 %v6988_v29  ;;  %2757 = vmatpush1.bf16.msra.mxu1 %v7028_v0 }
 0xbf4   :  { %2717 = vmatprep.subr.bf16.mxu0 %v6991_v30  ;;  %2758 = vmatprep.subr.bf16.mxu1 %v7031_v4 }
 0xbf7   :  { %2718 = vmatpush1.bf16.msra.mxu0 %v6994_v31  ;;  %2759 = vmatpush1.bf16.msra.mxu1 %v7034_v57 }
 0xbf8   :  { %2719 = vmatprep.subr.bf16.mxu0 %v7038_v45  ;;  %2760 = vmatprep.subr.bf16.mxu1 %v7040_v21 }
 0xbfb   :  { %2720 = vmatpush1.bf16.msra.mxu0 %v7042_v22  ;;  %2761 = vmatpush1.bf16.msra.mxu1 %v7044_v23 }
 0xbfc   :  { %3007 = vmatprep.subr.bf16.mxu0 %v6955_v53  ;;  %3048 = vmatprep.subr.bf16.mxu1 %v6957_v58 }
 0xc9e   :  { %v2437_v5 = vpop.f32.mrf.mxu0  ;;  %v2478_v1 = vpop.f32.mrf.mxu1 }
 0xc9f   :  { %v2485_v8 = vadd.f32 %v2437_v5, %v629_v12  ;;  %v2487_v33 = vadd.f32 %v2478_v1, %v702_v49 }
 0xca0   :  { %v2439_v3 = vpop.f32.mrf.mxu0  ;;  %v2480_v51 = vpop.f32.mrf.mxu1 }
 0xca1   :  { %v2489_v10 = vmul.f32 0.5, %v2485_v8  ;;  %v2486_v54 = vadd.f32 %v2439_v3, %v631_v9  ;;  %v2488_v55 = vadd.f32 %v2480_v51, %v704_v50  ;;  %v7575_v50 = vld [vmem:[#allocation40_spill] sm:$0xff] }
 0xca2   :  { %v2441_v52 = vpop.f32.mrf.mxu0  ;;  %v2482_v32 = vpop.f32.mrf.mxu1 }
 0xca3   :  { %5608 = vtanh.f32 %v2489_v10  ;;  %v2493_v34 = vmul.f32 0.5, %v2486_v54  ;;  %v2498_v62 = vmul.f32 0.5, %v2488_v55  ;;  %v7573_v10 = vld [vmem:[#allocation70_spill] sm:$0xff] }
 0xca4   :  { %v2442_v35 = vpop.f32.mrf.mxu0  ;;  %v2483_v14 = vpop.f32.mrf.mxu1 }
 0xca5   :  { %5610 = vtanh.f32 %v2493_v34  ;;  %v7574_v34 = vld [vmem:[#allocation71_spill] sm:$0xff] }
 0xca6   :  { %5612 = vtanh.f32 %v2487_v33 }
 0xca7   :  { %5614 = vtanh.f32 %v2498_v62 }
 0xcb0   :  { %v5609_v60 = vpop.eup %5608 }
 0xcb1   :  { %v2491_v6 = vmul.f32 0.5, %v5609_v60 }
 0xcb2   :  { %v5611_v46 = vpop.eup %5610 }
 0xcb3   :  { %v2492_v48 = vadd.f32 0.5, %v2491_v6  ;;  %v2495_v13 = vmul.f32 0.5, %v5611_v46  ;;  %v5613_v11 = vpop.eup %5612 }
 0xcb4   :  { %v5615_v56 = vpop.eup %5614 }
 0xcb5   :  { %v2496_v12 = vadd.f32 0.5, %v2495_v13  ;;  %v2503_v5 = vmul.f32 %v5613_v11, %v2492_v48  ;;  %v2500_v9 = vmul.f32 0.5, %v5615_v56 }
 0xcb7   :  { %v2502_v1 = vmul.f32 0.0, %v2496_v12  ;;  %v2501_v8 = vadd.f32 0.5, %v2500_v9 }
 0xcb9   :  { %v7094_v59 = vadd.f32 %v2503_v5, %v2502_v1 }
 0xcbb   :  { %5616 = vtanh.f32 %v7094_v59 }
 0xcc8   :  { %v5617_v3 = vpop.eup %5616 }
 0xcc9   :  { %v7097_v51 = vmul.f32 %v5617_v3, %v2501_v8 }
 0xccb   :  { %v2512_v19 = vpack.c.bf16 %v7097_v51, %v7097_v51 }
 0xccd   :  { %2738 = vmatmul.mubr.bf16.vlgmr.msra.gmra.mxu0 %v2512_v19  ;;  %2779 = vmatmul.mubr.bf16.vlgmr.msra.gmra.mxu1 %v2512_v19 }
 0xcce   :  { %3008 = vmatpush1.bf16.msra.mxu0 %v6953_v61  ;;  %3049 = vmatpush1.bf16.msra.mxu1 %v6998_v36 }
 0xccf   :  { %3009 = vmatprep.subr.bf16.mxu0 %v6959_v16  ;;  %3050 = vmatprep.subr.bf16.mxu1 %v7000_v15 }
 0xcd0   :  { %3039 = vmatprep.mubr.bf16.mxu0 %v7542_v47  ;;  %3080 = vmatprep.mubr.bf16.mxu1 %v7542_v47 }
 0xcd2   :  { %3010 = vmatpush1.bf16.msra.mxu0 %v6964_v17  ;;  %3051 = vmatpush1.bf16.msra.mxu1 %v7003_v39 }
 0xcd3   :  { %3011 = vmatprep.subr.bf16.mxu0 %v6967_v18  ;;  %3052 = vmatprep.subr.bf16.mxu1 %v7007_v40 }
 0xcd6   :  { %3012 = vmatpush1.bf16.msra.mxu0 %v6970_v20  ;;  %3053 = vmatpush1.bf16.msra.mxu1 %v7010_v41 }
 0xcd7   :  { %3013 = vmatprep.subr.bf16.mxu0 %v6973_v24  ;;  %3054 = vmatprep.subr.bf16.mxu1 %v7013_v42 }
 0xcda   :  { %3014 = vmatpush1.bf16.msra.mxu0 %v6976_v25  ;;  %3055 = vmatpush1.bf16.msra.mxu1 %v7016_v43 }
 0xcdb   :  { %3015 = vmatprep.subr.bf16.mxu0 %v6979_v26  ;;  %3056 = vmatprep.subr.bf16.mxu1 %v7019_v44 }
 0xcde   :  { %3016 = vmatpush1.bf16.msra.mxu0 %v6982_v27  ;;  %3057 = vmatpush1.bf16.msra.mxu1 %v7022_v7 }
 0xcdf   :  { %3017 = vmatprep.subr.bf16.mxu0 %v6985_v28  ;;  %3058 = vmatprep.subr.bf16.mxu1 %v7025_v63 }
 0xce2   :  { %3018 = vmatpush1.bf16.msra.mxu0 %v6988_v29  ;;  %3059 = vmatpush1.bf16.msra.mxu1 %v7028_v0 }
 0xce3   :  { %3019 = vmatprep.subr.bf16.mxu0 %v6991_v30  ;;  %3060 = vmatprep.subr.bf16.mxu1 %v7031_v4 }
 0xce6   :  { %3020 = vmatpush1.bf16.msra.mxu0 %v6994_v31  ;;  %3061 = vmatpush1.bf16.msra.mxu1 %v7034_v57 }
 0xce7   :  { %3021 = vmatprep.subr.bf16.mxu0 %v7038_v45  ;;  %3062 = vmatprep.subr.bf16.mxu1 %v7040_v21 }
 0xcea   :  { %3022 = vmatpush1.bf16.msra.mxu0 %v7042_v22  ;;  %3063 = vmatpush1.bf16.msra.mxu1 %v7044_v23 }
 0xceb   :  { %3309 = vmatprep.subr.bf16.mxu0 %v6955_v53  ;;  %3350 = vmatprep.subr.bf16.mxu1 %v6957_v58  ;;  %v7576_v53 = vld [vmem:[#allocation42_spill] sm:$0xff] }
 0xd8d   :  { %v2739_v2 = vpop.f32.mrf.mxu0  ;;  %v2780_v49 = vpop.f32.mrf.mxu1 }
 0xd8e   :  { %v2787_v54 = vadd.f32 %v2739_v2, %v7573_v10  ;;  %v2789_v55 = vadd.f32 %v2780_v49, %v7575_v50  ;;  %v7197_v50 = vld [vmem:[#allocation15 + $0xe0] ss:$16 sps:$4 sm:$0xff]  }
 0xd8f   :  { %v2741_v52 = vpop.f32.mrf.mxu0  ;;  %v2782_v32 = vpop.f32.mrf.mxu1 }
 0xd90   :  { %v2791_v33 = vmul.f32 0.5, %v2787_v54  ;;  %v2788_v35 = vadd.f32 %v2741_v52, %v7574_v34  ;;  %v2790_v58 = vadd.f32 %v2782_v32, %v7576_v53  ;;  %v7211_v53 = vld [vmem:[#allocation15 + $0xc8] ss:$16 sps:$4 sm:$0xff]  }
 0xd91   :  { %v2743_v14 = vpop.f32.mrf.mxu0  ;;  %v2784_v38 = vpop.f32.mrf.mxu1 }
 0xd92   :  { %5618 = vtanh.f32 %v2791_v33  ;;  %v2795_v62 = vmul.f32 0.5, %v2788_v35  ;;  %v2800_v46 = vmul.f32 0.5, %v2790_v58  ;;  %v7193_v14 = vld [vmem:[#allocation15 + $0xe4] ss:$16 sps:$4 sm:$0xff]   ;;  %v7195_v38 = vld [vmem:[#allocation15 + $0xec] ss:$16 sps:$4 sm:$0xff]  }
 0xd93   :  { %v2744_v60 = vpop.f32.mrf.mxu0  ;;  %v2785_v6 = vpop.f32.mrf.mxu1  ;;  %v7217_v58 = vld [vmem:[#allocation15 + $0xa4] ss:$16 sps:$4 sm:$0xff]  }
 0xd94   :  { %5620 = vtanh.f32 %v2795_v62  ;;  %v7205_v62 = vld [vmem:[#allocation15 + $0xc4] ss:$16 sps:$4 sm:$0xff]   ;;  %v7207_v60 = vld [vmem:[#allocation15 + $0xcc] ss:$16 sps:$4 sm:$0xff]   ;;  %v7209_v6 = vld [vmem:[#allocation15 + $0xc0] ss:$16 sps:$4 sm:$0xff]  }
 0xd95   :  { %5622 = vtanh.f32 %v2789_v55  ;;  %v7199_v55 = vld [vmem:[#allocation15 + $0xe8] ss:$16 sps:$4 sm:$0xff]  }
 0xd96   :  { %5624 = vtanh.f32 %v2800_v46  ;;  %v7219_v46 = vld [vmem:[#allocation15 + $0xac] ss:$16 sps:$4 sm:$0xff]  }
 0xd9f   :  { %v5619_v48 = vpop.eup %5618 }
 0xda0   :  { %v2793_v13 = vmul.f32 0.5, %v5619_v48  ;;  %v7221_v48 = vld [vmem:[#allocation15 + $0xa0] ss:$16 sps:$4 sm:$0xff]  }
 0xda1   :  { %v5621_v11 = vpop.eup %5620 }
 0xda2   :  { %v2794_v12 = vadd.f32 0.5, %v2793_v13  ;;  %v2797_v5 = vmul.f32 0.5, %v5621_v11  ;;  %v5623_v1 = vpop.eup %5622  ;;  %v7223_v13 = vld [vmem:[#allocation15 + $0xa8] ss:$16 sps:$4 sm:$0xff]   ;;  %v7229_v11 = vld [vmem:[#allocation15 + $0x84] ss:$16 sps:$4 sm:$0xff]  }
 0xda3   :  { %v5625_v19 = vpop.eup %5624 }
 0xda4   :  { %v2798_v56 = vadd.f32 0.5, %v2797_v5  ;;  %v2805_v9 = vmul.f32 %v5623_v1, %v2794_v12  ;;  %v2802_v2 = vmul.f32 0.5, %v5625_v19  ;;  %v7231_v12 = vld [vmem:[#allocation15 + $0x8c] ss:$16 sps:$4 sm:$0xff]   ;;  %v7233_v5 = vld [vmem:[#allocation15 + $0x80] ss:$16 sps:$4 sm:$0xff]  }
 0xda5   :  { %v7235_v1 = vld [vmem:[#allocation15 + $0x88] ss:$16 sps:$4 sm:$0xff]   ;;  %v7253_v19 = vld [vmem:[#allocation15 + $0x44] ss:$16 sps:$4 sm:$0xff]  }
 0xda6   :  { %v2804_v8 = vmul.f32 %v2798_v56, %v7094_v59  ;;  %v2803_v49 = vadd.f32 0.5, %v2802_v2  ;;  %v7241_v56 = vld [vmem:[#allocation15 + $0x64] ss:$16 sps:$4 sm:$0xff]   ;;  %v7255_v2 = vld [vmem:[#allocation15 + $0x4c] ss:$16 sps:$4 sm:$0xff]  }
 0xda8   :  { %v7140_v3 = vadd.f32 %v2805_v9, %v2804_v8  ;;  %v7243_v9 = vld [vmem:[#allocation15 + $0x6c] ss:$16 sps:$4 sm:$0xff]   ;;  %v7245_v8 = vld [vmem:[#allocation15 + $0x60] ss:$16 sps:$4 sm:$0xff]  }
 0xdaa   :  { %5626 = vtanh.f32 %v7140_v3 }
 0xdb7   :  { %v5627_v10 = vpop.eup %5626 }
 0xdb8   :  { %v7143_v54 = vmul.f32 %v5627_v10, %v2803_v49  ;;  %v7257_v49 = vld [vmem:[#allocation15 + $0x40] ss:$16 sps:$4 sm:$0xff]   ;;  %v7259_v10 = vld [vmem:[#allocation15 + $0x48] ss:$16 sps:$4 sm:$0xff]  }
 0xdba   :  { %v2814_v52 = vpack.c.bf16 %v7143_v54, %v7143_v54 }
 0xdbc   :  { %3040 = vmatmul.mubr.bf16.vlgmr.msra.gmra.mxu0 %v2814_v52  ;;  %3081 = vmatmul.mubr.bf16.vlgmr.msra.gmra.mxu1 %v2814_v52  ;;  %v7265_v52 = vld [vmem:[#allocation15 + $0x24] ss:$16 sps:$4 sm:$0xff]  }
 0xdbd   :  { %3310 = vmatpush1.bf16.msra.mxu0 %v6953_v61  ;;  %3351 = vmatpush1.bf16.msra.mxu1 %v6998_v36 }
 0xdbe   :  { %3311 = vmatprep.subr.bf16.mxu0 %v6959_v16  ;;  %3352 = vmatprep.subr.bf16.mxu1 %v7000_v15 }
 0xdbf   :  { %3341 = vmatprep.mubr.bf16.mxu0 %v7542_v47  ;;  %3382 = vmatprep.mubr.bf16.mxu1 %v7542_v47 }
 0xdc1   :  { %3312 = vmatpush1.bf16.msra.mxu0 %v6964_v17  ;;  %3353 = vmatpush1.bf16.msra.mxu1 %v7003_v39  ;;  %v7577_v17 = vld [vmem:[#allocation72_spill] sm:$0xff] }
 0xdc2   :  { %3313 = vmatprep.subr.bf16.mxu0 %v6967_v18  ;;  %3354 = vmatprep.subr.bf16.mxu1 %v7007_v40  ;;  %v7580_v40 = vld [vmem:[#allocation46_spill] sm:$0xff] }
 0xdc5   :  { %3314 = vmatpush1.bf16.msra.mxu0 %v6970_v20  ;;  %3355 = vmatpush1.bf16.msra.mxu1 %v7010_v41 }
 0xdc6   :  { %3315 = vmatprep.subr.bf16.mxu0 %v6973_v24  ;;  %3356 = vmatprep.subr.bf16.mxu1 %v7013_v42 }
 0xdc9   :  { %3316 = vmatpush1.bf16.msra.mxu0 %v6976_v25  ;;  %3357 = vmatpush1.bf16.msra.mxu1 %v7016_v43 }
 0xdca   :  { %3317 = vmatprep.subr.bf16.mxu0 %v6979_v26  ;;  %3358 = vmatprep.subr.bf16.mxu1 %v7019_v44  ;;  %v7578_v26 = vld [vmem:[#allocation73_spill] sm:$0xff] }
 0xdcd   :  { %3318 = vmatpush1.bf16.msra.mxu0 %v6982_v27  ;;  %3359 = vmatpush1.bf16.msra.mxu1 %v7022_v7 }
 0xdce   :  { %3319 = vmatprep.subr.bf16.mxu0 %v6985_v28  ;;  %3360 = vmatprep.subr.bf16.mxu1 %v7025_v63 }
 0xdd1   :  { %3320 = vmatpush1.bf16.msra.mxu0 %v6988_v29  ;;  %3361 = vmatpush1.bf16.msra.mxu1 %v7028_v0 }
 0xdd2   :  { %3321 = vmatprep.subr.bf16.mxu0 %v6991_v30  ;;  %3362 = vmatprep.subr.bf16.mxu1 %v7031_v4  ;;  %v7579_v30 = vld [vmem:[#allocation44_spill] sm:$0xff] }
 0xdd5   :  { %3322 = vmatpush1.bf16.msra.mxu0 %v6994_v31  ;;  %3363 = vmatpush1.bf16.msra.mxu1 %v7034_v57 }
 0xdd6   :  { %3323 = vmatprep.subr.bf16.mxu0 %v7038_v45  ;;  %3364 = vmatprep.subr.bf16.mxu1 %v7040_v21 }
 0xdd9   :  { %3324 = vmatpush1.bf16.msra.mxu0 %v7042_v22  ;;  %3365 = vmatpush1.bf16.msra.mxu1 %v7044_v23 }
 0xdda   :  { %3611 = vmatprep.subr.bf16.mxu0 %v7193_v14  ;;  %3652 = vmatprep.subr.bf16.mxu1 %v7195_v38 }
 0xe7c   :  { %v3041_v61 = vpop.f32.mrf.mxu0  ;;  %v3082_v16 = vpop.f32.mrf.mxu1 }
 0xe7d   :  { %v3089_v18 = vadd.f32 %v3041_v61, %v7577_v17  ;;  %v3091_v31 = vadd.f32 %v3082_v16, %v7579_v30  ;;  %v7267_v61 = vld [vmem:[#allocation15 + $0x2c] ss:$16 sps:$4 sm:$0xff]   ;;  %v7269_v16 = vld [vmem:[#allocation15 + $0x20] ss:$16 sps:$4 sm:$0xff]   ;;  %v7271_v17 = vld [vmem:[#allocation15 + $0x28] ss:$16 sps:$4 sm:$0xff]  }
 0xe7e   :  { %v3043_v20 = vpop.f32.mrf.mxu0  ;;  %v3084_v24 = vpop.f32.mrf.mxu1 }
 0xe7f   :  { %v3093_v25 = vmul.f32 0.5, %v3089_v18  ;;  %v3090_v27 = vadd.f32 %v3043_v20, %v7578_v26  ;;  %v3092_v41 = vadd.f32 %v3084_v24, %v7580_v40  ;;  %v7277_v18 = vld [vmem:[#allocation15 + $0x4] ss:$16 sps:$4 sm:$0xff]   ;;  %v7279_v20 = vld [vmem:[#allocation15 + $0xc] ss:$16 sps:$4 sm:$0xff]  }
 0xe80   :  { %v3045_v28 = vpop.f32.mrf.mxu0  ;;  %v3086_v29 = vpop.f32.mrf.mxu1  ;;  %v7281_v24 = vld [vmem:[#allocation15] ss:$16 sps:$4 sm:$0xff]  }
 0xe81   :  { %5628 = vtanh.f32 %v3093_v25  ;;  %v3097_v36 = vmul.f32 0.5, %v3090_v27  ;;  %v3102_v42 = vmul.f32 0.5, %v3092_v41  ;;  %v7283_v25 = vld [vmem:[#allocation15 + $0x8] ss:$16 sps:$4 sm:$0xff]  }
 0xe82   :  { %v3046_v15 = vpop.f32.mrf.mxu0  ;;  %v3087_v39 = vpop.f32.mrf.mxu1  ;;  %v7581_v28 = vld [vmem:[#allocation74_spill] sm:$0xff] }
 0xe83   :  { %5630 = vtanh.f32 %v3097_v36  ;;  %v7582_v15 = vld [vmem:[#allocation75_spill] sm:$0xff] }
 0xe84   :  { %5632 = vtanh.f32 %v3091_v31 }
 0xe85   :  { %5634 = vtanh.f32 %v3102_v42  ;;  %v7583_v42 = vld [vmem:[#allocation48_spill] sm:$0xff] }
 0xe8e   :  { %v5629_v43 = vpop.eup %5628 }
 0xe8f   :  { %v3095_v44 = vmul.f32 0.5, %v5629_v43 }
 0xe90   :  { %v5631_v7 = vpop.eup %5630 }
 0xe91   :  { %v3096_v63 = vadd.f32 0.5, %v3095_v44  ;;  %v3099_v0 = vmul.f32 0.5, %v5631_v7  ;;  %v5633_v4 = vpop.eup %5632 }
 0xe92   :  { %v5635_v23 = vpop.eup %5634 }
 0xe93   :  { %v3100_v57 = vadd.f32 0.5, %v3099_v0  ;;  %v3107_v45 = vmul.f32 %v5633_v4, %v3096_v63  ;;  %v3104_v59 = vmul.f32 0.5, %v5635_v23  ;;  %v7584_v0 = vld [vmem:[#allocation50_spill] sm:$0xff] }
 0xe95   :  { %v3106_v21 = vmul.f32 %v3100_v57, %v7140_v3  ;;  %v3105_v32 = vadd.f32 0.5, %v3104_v59  ;;  %v7247_v3 = vld [vmem:[#allocation15 + $0x68] ss:$16 sps:$4 sm:$0xff]  }
 0xe97   :  { %v7184_v22 = vadd.f32 %v3107_v45, %v3106_v21 }
 0xe99   :  { %5636 = vtanh.f32 %v7184_v22 }
 0xea6   :  { %v5637_v33 = vpop.eup %5636 }
 0xea7   :  { %v7187_v34 = vmul.f32 %v5637_v33, %v3105_v32 }
 0xea9   :  { %v3116_v35 = vpack.c.bf16 %v7187_v34, %v7187_v34 }
 0xeab   :  { %3342 = vmatmul.mubr.bf16.vlgmr.msra.gmra.mxu0 %v3116_v35  ;;  %3383 = vmatmul.mubr.bf16.vlgmr.msra.gmra.mxu1 %v3116_v35 }
 0xeac   :  { %3643 = vmatprep.mubr.bf16.mxu0 %v7542_v47  ;;  %3684 = vmatprep.mubr.bf16.mxu1 %v7542_v47 }
 0xead   :  { %3612 = vmatpush1.bf16.msra.mxu0 %v7197_v50  ;;  %3653 = vmatpush1.bf16.msra.mxu1 %v7199_v55 }
 0xeae   :  { %3613 = vmatprep.subr.bf16.mxu0 %v7205_v62  ;;  %3654 = vmatprep.subr.bf16.mxu1 %v7207_v60 }
 0xeb1   :  { %3614 = vmatpush1.bf16.msra.mxu0 %v7209_v6  ;;  %3655 = vmatpush1.bf16.msra.mxu1 %v7211_v53 }
 0xeb2   :  { %3615 = vmatprep.subr.bf16.mxu0 %v7217_v58  ;;  %3656 = vmatprep.subr.bf16.mxu1 %v7219_v46 }
 0xeb5   :  { %3616 = vmatpush1.bf16.msra.mxu0 %v7221_v48  ;;  %3657 = vmatpush1.bf16.msra.mxu1 %v7223_v13 }
 0xeb6   :  { %3617 = vmatprep.subr.bf16.mxu0 %v7229_v11  ;;  %3658 = vmatprep.subr.bf16.mxu1 %v7231_v12 }
 0xeb9   :  { %3618 = vmatpush1.bf16.msra.mxu0 %v7233_v5  ;;  %3659 = vmatpush1.bf16.msra.mxu1 %v7235_v1 }
 0xeba   :  { %3619 = vmatprep.subr.bf16.mxu0 %v7241_v56  ;;  %3660 = vmatprep.subr.bf16.mxu1 %v7243_v9 }
 0xebd   :  { %3620 = vmatpush1.bf16.msra.mxu0 %v7245_v8  ;;  %3661 = vmatpush1.bf16.msra.mxu1 %v7247_v3 }
 0xebe   :  { %3621 = vmatprep.subr.bf16.mxu0 %v7253_v19  ;;  %3662 = vmatprep.subr.bf16.mxu1 %v7255_v2 }
 0xec1   :  { %3622 = vmatpush1.bf16.msra.mxu0 %v7257_v49  ;;  %3663 = vmatpush1.bf16.msra.mxu1 %v7259_v10 }
 0xec2   :  { %3623 = vmatprep.subr.bf16.mxu0 %v7265_v52  ;;  %3664 = vmatprep.subr.bf16.mxu1 %v7267_v61 }
 0xec5   :  { %3624 = vmatpush1.bf16.msra.mxu0 %v7269_v16  ;;  %3665 = vmatpush1.bf16.msra.mxu1 %v7271_v17 }
 0xec6   :  { %3625 = vmatprep.subr.bf16.mxu0 %v7277_v18  ;;  %3666 = vmatprep.subr.bf16.mxu1 %v7279_v20 }
 0xec9   :  { %3626 = vmatpush1.bf16.msra.mxu0 %v7281_v24  ;;  %3667 = vmatpush1.bf16.msra.mxu1 %v7283_v25 }
 0xeca   :  { %3913 = vmatprep.subr.bf16.mxu0 %v7193_v14  ;;  %3954 = vmatprep.subr.bf16.mxu1 %v7195_v38 }
 0xf6b   :  { %v3343_v26 = vpop.f32.mrf.mxu0  ;;  %v3384_v27 = vpop.f32.mrf.mxu1 }
 0xf6c   :  { %v3391_v29 = vadd.f32 %v3343_v26, %v7581_v28  ;;  %v3393_v43 = vadd.f32 %v3384_v27, %v7583_v42 }
 0xf6d   :  { %v3345_v30 = vpop.f32.mrf.mxu0  ;;  %v3386_v31 = vpop.f32.mrf.mxu1 }
 0xf6e   :  { %v3395_v36 = vmul.f32 0.5, %v3391_v29  ;;  %v3392_v39 = vadd.f32 %v3345_v30, %v7582_v15  ;;  %v3394_v4 = vadd.f32 %v3386_v31, %v7584_v0 }
 0xf6f   :  { %v3347_v40 = vpop.f32.mrf.mxu0  ;;  %v3388_v41 = vpop.f32.mrf.mxu1 }
 0xf70   :  { %5638 = vtanh.f32 %v3395_v36  ;;  %v3399_v44 = vmul.f32 0.5, %v3392_v39  ;;  %v3404_v57 = vmul.f32 0.5, %v3394_v4  ;;  %v7585_v41 = vld [vmem:[#allocation76_spill] sm:$0xff] }
 0xf71   :  { %v3348_v7 = vpop.f32.mrf.mxu0  ;;  %v3389_v63 = vpop.f32.mrf.mxu1 }
 0xf72   :  { %5640 = vtanh.f32 %v3399_v44  ;;  %v7586_v63 = vld [vmem:[#allocation77_spill] sm:$0xff] }
 0xf73   :  { %5642 = vtanh.f32 %v3393_v43 }
 0xf74   :  { %5644 = vtanh.f32 %v3404_v57 }
 0xf7d   :  { %v5639_v45 = vpop.eup %5638 }
 0xf7e   :  { %v3397_v21 = vmul.f32 0.5, %v5639_v45  ;;  %v7587_v45 = vld [vmem:[#allocation52_spill] sm:$0xff] }
 0xf7f   :  { %v5641_v23 = vpop.eup %5640 }
 0xf80   :  { %v3398_v59 = vadd.f32 0.5, %v3397_v21  ;;  %v3401_v32 = vmul.f32 0.5, %v5641_v23  ;;  %v5643_v33 = vpop.eup %5642 }
 0xf81   :  { %v5645_v29 = vpop.eup %5644 }
 0xf82   :  { %v3402_v35 = vadd.f32 0.5, %v3401_v32  ;;  %v3409_v26 = vmul.f32 %v5643_v33, %v3398_v59  ;;  %v3406_v30 = vmul.f32 0.5, %v5645_v29  ;;  %v7588_v33 = vld [vmem:[#allocation54_spill] sm:$0xff] }
 0xf84   :  { %v3408_v28 = vmul.f32 %v3402_v35, %v7184_v22  ;;  %v3407_v36 = vadd.f32 0.5, %v3406_v30 }
 0xf86   :  { %v7296_v27 = vadd.f32 %v3409_v26, %v3408_v28 }
 0xf88   :  { %5646 = vtanh.f32 %v7296_v27 }
 0xf95   :  { %v5647_v31 = vpop.eup %5646 }
 0xf96   :  { %v7299_v15 = vmul.f32 %v5647_v31, %v3407_v36 }
 0xf98   :  { %v3418_v39 = vpack.c.bf16 %v7299_v15, %v7299_v15 }
 0xf9a   :  { %3644 = vmatmul.mubr.bf16.vlgmr.msra.gmra.mxu0 %v3418_v39  ;;  %3685 = vmatmul.mubr.bf16.vlgmr.msra.gmra.mxu1 %v3418_v39 }
 0xf9b   :  { %3914 = vmatpush1.bf16.msra.mxu0 %v7197_v50  ;;  %3955 = vmatpush1.bf16.msra.mxu1 %v7199_v55 }
 0xf9c   :  { %3915 = vmatprep.subr.bf16.mxu0 %v7205_v62  ;;  %3956 = vmatprep.subr.bf16.mxu1 %v7207_v60 }
 0xf9d   :  { %3945 = vmatprep.mubr.bf16.mxu0 %v7542_v47  ;;  %3986 = vmatprep.mubr.bf16.mxu1 %v7542_v47 }
 0xf9f   :  { %3916 = vmatpush1.bf16.msra.mxu0 %v7209_v6  ;;  %3957 = vmatpush1.bf16.msra.mxu1 %v7211_v53 }
 0xfa0   :  { %3917 = vmatprep.subr.bf16.mxu0 %v7217_v58  ;;  %3958 = vmatprep.subr.bf16.mxu1 %v7219_v46 }
 0xfa3   :  { %3918 = vmatpush1.bf16.msra.mxu0 %v7221_v48  ;;  %3959 = vmatpush1.bf16.msra.mxu1 %v7223_v13 }
 0xfa4   :  { %3919 = vmatprep.subr.bf16.mxu0 %v7229_v11  ;;  %3960 = vmatprep.subr.bf16.mxu1 %v7231_v12 }
 0xfa7   :  { %3920 = vmatpush1.bf16.msra.mxu0 %v7233_v5  ;;  %3961 = vmatpush1.bf16.msra.mxu1 %v7235_v1 }
 0xfa8   :  { %3921 = vmatprep.subr.bf16.mxu0 %v7241_v56  ;;  %3962 = vmatprep.subr.bf16.mxu1 %v7243_v9 }
 0xfab   :  { %3922 = vmatpush1.bf16.msra.mxu0 %v7245_v8  ;;  %3963 = vmatpush1.bf16.msra.mxu1 %v7247_v3 }
 0xfac   :  { %3923 = vmatprep.subr.bf16.mxu0 %v7253_v19  ;;  %3964 = vmatprep.subr.bf16.mxu1 %v7255_v2 }
 0xfaf   :  { %3924 = vmatpush1.bf16.msra.mxu0 %v7257_v49  ;;  %3965 = vmatpush1.bf16.msra.mxu1 %v7259_v10 }
 0xfb0   :  { %3925 = vmatprep.subr.bf16.mxu0 %v7265_v52  ;;  %3966 = vmatprep.subr.bf16.mxu1 %v7267_v61 }
 0xfb3   :  { %3926 = vmatpush1.bf16.msra.mxu0 %v7269_v16  ;;  %3967 = vmatpush1.bf16.msra.mxu1 %v7271_v17 }
 0xfb4   :  { %3927 = vmatprep.subr.bf16.mxu0 %v7277_v18  ;;  %3968 = vmatprep.subr.bf16.mxu1 %v7279_v20 }
 0xfb7   :  { %3928 = vmatpush1.bf16.msra.mxu0 %v7281_v24  ;;  %3969 = vmatpush1.bf16.msra.mxu1 %v7283_v25 }
 0xfb8   :  { %4215 = vmatprep.subr.bf16.mxu0 %v7193_v14  ;;  %4256 = vmatprep.subr.bf16.mxu1 %v7195_v38 }
0x105a   :  { %v3645_v22 = vpop.f32.mrf.mxu0  ;;  %v3686_v40 = vpop.f32.mrf.mxu1 }
0x105b   :  { %v3693_v42 = vadd.f32 %v3645_v22, %v7585_v41  ;;  %v3695_v21 = vadd.f32 %v3686_v40, %v7587_v45  ;;  %v7589_v45 = vld [vmem:[#allocation78_spill] sm:$0xff] }
0x105c   :  { %v3647_v43 = vpop.f32.mrf.mxu0  ;;  %v3688_v44 = vpop.f32.mrf.mxu1 }
0x105d   :  { %v3697_v7 = vmul.f32 0.5, %v3693_v42  ;;  %v3694_v0 = vadd.f32 %v3647_v43, %v7586_v63  ;;  %v3696_v35 = vadd.f32 %v3688_v44, %v7588_v33  ;;  %v7590_v33 = vld [vmem:[#allocation79_spill] sm:$0xff] }
0x105e   :  { %v3649_v4 = vpop.f32.mrf.mxu0  ;;  %v3690_v57 = vpop.f32.mrf.mxu1 }
0x105f   :  { %5648 = vtanh.f32 %v3697_v7  ;;  %v3701_v23 = vmul.f32 0.5, %v3694_v0  ;;  %v3706_v26 = vmul.f32 0.5, %v3696_v35 }
0x1060   :  { %v3650_v59 = vpop.f32.mrf.mxu0  ;;  %v3691_v32 = vpop.f32.mrf.mxu1 }
0x1061   :  { %5650 = vtanh.f32 %v3701_v23 }
0x1062   :  { %5652 = vtanh.f32 %v3695_v21 }
0x1063   :  { %5654 = vtanh.f32 %v3706_v26 }
0x106c   :  { %v5649_v28 = vpop.eup %5648 }
0x106d   :  { %v3699_v29 = vmul.f32 0.5, %v5649_v28 }
0x106e   :  { %v5651_v30 = vpop.eup %5650 }
0x106f   :  { %v3700_v36 = vadd.f32 0.5, %v3699_v29  ;;  %v3703_v31 = vmul.f32 0.5, %v5651_v30  ;;  %v5653_v39 = vpop.eup %5652  ;;  %v7591_v29 = vld [vmem:[#allocation56_spill] sm:$0xff] }
0x1070   :  { %v5655_v43 = vpop.eup %5654 }
0x1071   :  { %v3704_v22 = vadd.f32 0.5, %v3703_v31  ;;  %v3711_v41 = vmul.f32 %v5653_v39, %v3700_v36  ;;  %v3708_v7 = vmul.f32 0.5, %v5655_v43 }
0x1073   :  { %v3710_v42 = vmul.f32 %v3704_v22, %v7296_v27  ;;  %v3709_v63 = vadd.f32 0.5, %v3708_v7 }
0x1075   :  { %v7342_v40 = vadd.f32 %v3711_v41, %v3710_v42 }
0x1077   :  { %5656 = vtanh.f32 %v7342_v40 }
0x1084   :  { %v5657_v44 = vpop.eup %5656 }
0x1085   :  { %v7345_v0 = vmul.f32 %v5657_v44, %v3709_v63 }
0x1087   :  { %v3720_v4 = vpack.c.bf16 %v7345_v0, %v7345_v0 }
0x1089   :  { %3946 = vmatmul.mubr.bf16.vlgmr.msra.gmra.mxu0 %v3720_v4  ;;  %3987 = vmatmul.mubr.bf16.vlgmr.msra.gmra.mxu1 %v3720_v4 }
0x108a   :  { %4216 = vmatpush1.bf16.msra.mxu0 %v7197_v50  ;;  %4257 = vmatpush1.bf16.msra.mxu1 %v7199_v55 }
0x108b   :  { %4217 = vmatprep.subr.bf16.mxu0 %v7205_v62  ;;  %4258 = vmatprep.subr.bf16.mxu1 %v7207_v60 }
0x108c   :  { %4247 = vmatprep.mubr.bf16.mxu0 %v7542_v47  ;;  %4288 = vmatprep.mubr.bf16.mxu1 %v7542_v47 }
0x108e   :  { %4218 = vmatpush1.bf16.msra.mxu0 %v7209_v6  ;;  %4259 = vmatpush1.bf16.msra.mxu1 %v7211_v53 }
0x108f   :  { %4219 = vmatprep.subr.bf16.mxu0 %v7217_v58  ;;  %4260 = vmatprep.subr.bf16.mxu1 %v7219_v46 }
0x1092   :  { %4220 = vmatpush1.bf16.msra.mxu0 %v7221_v48  ;;  %4261 = vmatpush1.bf16.msra.mxu1 %v7223_v13 }
0x1093   :  { %4221 = vmatprep.subr.bf16.mxu0 %v7229_v11  ;;  %4262 = vmatprep.subr.bf16.mxu1 %v7231_v12 }
0x1096   :  { %4222 = vmatpush1.bf16.msra.mxu0 %v7233_v5  ;;  %4263 = vmatpush1.bf16.msra.mxu1 %v7235_v1 }
0x1097   :  { %4223 = vmatprep.subr.bf16.mxu0 %v7241_v56  ;;  %4264 = vmatprep.subr.bf16.mxu1 %v7243_v9 }
0x109a   :  { %4224 = vmatpush1.bf16.msra.mxu0 %v7245_v8  ;;  %4265 = vmatpush1.bf16.msra.mxu1 %v7247_v3 }
0x109b   :  { %4225 = vmatprep.subr.bf16.mxu0 %v7253_v19  ;;  %4266 = vmatprep.subr.bf16.mxu1 %v7255_v2 }
0x109e   :  { %4226 = vmatpush1.bf16.msra.mxu0 %v7257_v49  ;;  %4267 = vmatpush1.bf16.msra.mxu1 %v7259_v10 }
0x109f   :  { %4227 = vmatprep.subr.bf16.mxu0 %v7265_v52  ;;  %4268 = vmatprep.subr.bf16.mxu1 %v7267_v61 }
0x10a2   :  { %4228 = vmatpush1.bf16.msra.mxu0 %v7269_v16  ;;  %4269 = vmatpush1.bf16.msra.mxu1 %v7271_v17 }
0x10a3   :  { %4229 = vmatprep.subr.bf16.mxu0 %v7277_v18  ;;  %4270 = vmatprep.subr.bf16.mxu1 %v7279_v20 }
0x10a6   :  { %4230 = vmatpush1.bf16.msra.mxu0 %v7281_v24  ;;  %4271 = vmatpush1.bf16.msra.mxu1 %v7283_v25 }
0x10a7   :  { %4517 = vmatprep.subr.bf16.mxu0 %v7193_v14  ;;  %4558 = vmatprep.subr.bf16.mxu1 %v7195_v38  ;;  %v7592_v14 = vld [vmem:[#allocation58_spill] sm:$0xff] }
0x1149   :  { %v3947_v27 = vpop.f32.mrf.mxu0  ;;  %v3988_v57 = vpop.f32.mrf.mxu1 }
0x114a   :  { %v3995_v21 = vadd.f32 %v3947_v27, %v7589_v45  ;;  %v3997_v30 = vadd.f32 %v3988_v57, %v7591_v29 }
0x114b   :  { %v3949_v23 = vpop.f32.mrf.mxu0  ;;  %v3990_v59 = vpop.f32.mrf.mxu1 }
0x114c   :  { %v3999_v32 = vmul.f32 0.5, %v3995_v21  ;;  %v3996_v35 = vadd.f32 %v3949_v23, %v7590_v33  ;;  %v3998_v38 = vadd.f32 %v3990_v59, %v7592_v14  ;;  %v5523_v14 = vld [vmem:[#allocation16 + $0x20] sm:$0xff]  }
0x114d   :  { %v3951_v26 = vpop.f32.mrf.mxu0  ;;  %v3992_v28 = vpop.f32.mrf.mxu1 }
0x114e   :  { %5658 = vtanh.f32 %v3999_v32  ;;  %v4003_v36 = vmul.f32 0.5, %v3996_v35  ;;  %v4008_v22 = vmul.f32 0.5, %v3998_v38  ;;  %v5524_v38 = vld [vmem:[#allocation16 + $0x18] sm:$0xff]  }
0x114f   :  { %v3952_v31 = vpop.f32.mrf.mxu0  ;;  %v3993_v39 = vpop.f32.mrf.mxu1 }
0x1150   :  { %5660 = vtanh.f32 %v4003_v36  ;;  %v5521_v36 = vld [vmem:[#allocation16 + $0x30] sm:$0xff]   ;;  %v4630_v31 = vpack.c.bf16 %v7143_v54, %v7097_v51  ;;  %v5522_v39 = vld [vmem:[#allocation16 + $0x28] sm:$0xff]   ;;  %v5527_v51 = vld [vmem:[#allocation16] sm:$0xff]   ;;  %v4631_v54 = vpack.c.bf16 %v7299_v15, %v7187_v34 }
0x1151   :  { %5662 = vtanh.f32 %v3997_v30 }
0x1152   :  { %5664 = vtanh.f32 %v4008_v22  ;;  %v5525_v22 = vld [vmem:[#allocation16 + $0x10] sm:$0xff]  }
0x115b   :  { %v5659_v41 = vpop.eup %5658 }
0x115c   :  { %v4001_v42 = vmul.f32 0.5, %v5659_v41  ;;  %v5526_v41 = vld [vmem:[#allocation16 + $0x8] sm:$0xff]  }
0x115d   :  { %v5661_v43 = vpop.eup %5660 }
0x115e   :  { %v4002_v7 = vadd.f32 0.5, %v4001_v42  ;;  %v4005_v63 = vmul.f32 0.5, %v5661_v43  ;;  %v5663_v44 = vpop.eup %5662 }
0x115f   :  { %v5665_v21 = vpop.eup %5664 }
0x1160   :  { %v4006_v4 = vadd.f32 0.5, %v4005_v63  ;;  %v4013_v27 = vmul.f32 %v5663_v44, %v4002_v7  ;;  %v4010_v23 = vmul.f32 0.5, %v5665_v21  ;;  %v7597_v63 = vld [vmem:[#allocation82_spill] sm:$0xff] }
0x1162   :  { %v4012_v45 = vmul.f32 %v4006_v4, %v7342_v40  ;;  %v4011_v32 = vadd.f32 0.5, %v4010_v23 }
0x1164   :  { %v7388_v57 = vadd.f32 %v4013_v27, %v4012_v45 }
0x1166   :  { %5666 = vtanh.f32 %v7388_v57 }
0x1173   :  { %v5667_v59 = vpop.eup %5666 }
0x1174   :  { %v7391_v33 = vmul.f32 %v5667_v59, %v4011_v32  ;;  %v7599_v59 = vld [vmem:[#allocation64_spill] sm:$0xff] }
0x1176   :  { %v4022_v35 = vpack.c.bf16 %v7391_v33, %v7391_v33  ;;  %v4632_v42 = vpack.c.bf16 %v7391_v33, %v7345_v0  ;;  %v7600_v0 = vld [vmem:[#allocation84_spill] sm:$0xff] }
0x1177   :  { %v738_v33 = vadd.f32 %v7600_v0, %v7571_v37 }
0x1178   :  { %4248 = vmatmul.mubr.bf16.vlgmr.msra.gmra.mxu0 %v4022_v35  ;;  %4289 = vmatmul.mubr.bf16.vlgmr.msra.gmra.mxu1 %v4022_v35 }
0x1179   :  { %4518 = vmatpush1.bf16.msra.mxu0 %v7197_v50  ;;  %4559 = vmatpush1.bf16.msra.mxu1 %v7199_v55 }
0x117a   :  { %4519 = vmatprep.subr.bf16.mxu0 %v7205_v62  ;;  %4560 = vmatprep.subr.bf16.mxu1 %v7207_v60  ;;  %v7593_v62 = vld [vmem:[#allocation80_spill] sm:$0xff] }
0x117b   :  { %4549 = vmatprep.mubr.bf16.mxu0 %v7542_v47  ;;  %4590 = vmatprep.mubr.bf16.mxu1 %v7542_v47  ;;  %v5520_v47 = vld [vmem:[#allocation16 + $0x38] sm:$0xff]  }
0x117d   :  { %4520 = vmatpush1.bf16.msra.mxu0 %v7209_v6  ;;  %4561 = vmatpush1.bf16.msra.mxu1 %v7211_v53 }
0x117e   :  { %4521 = vmatprep.subr.bf16.mxu0 %v7217_v58  ;;  %4562 = vmatprep.subr.bf16.mxu1 %v7219_v46  ;;  %v7594_v46 = vld [vmem:[#allocation81_spill] sm:$0xff] }
0x1181   :  { %4522 = vmatpush1.bf16.msra.mxu0 %v7221_v48  ;;  %4563 = vmatpush1.bf16.msra.mxu1 %v7223_v13 }
0x1182   :  { %4523 = vmatprep.subr.bf16.mxu0 %v7229_v11  ;;  %4564 = vmatprep.subr.bf16.mxu1 %v7231_v12  ;;  %v7595_v12 = vld [vmem:[#allocation60_spill] sm:$0xff] }
0x1185   :  { %4524 = vmatpush1.bf16.msra.mxu0 %v7233_v5  ;;  %4565 = vmatpush1.bf16.msra.mxu1 %v7235_v1 }
0x1186   :  { %4525 = vmatprep.subr.bf16.mxu0 %v7241_v56  ;;  %4566 = vmatprep.subr.bf16.mxu1 %v7243_v9 }
0x1189   :  { %4526 = vmatpush1.bf16.msra.mxu0 %v7245_v8  ;;  %4567 = vmatpush1.bf16.msra.mxu1 %v7247_v3  ;;  %v7596_v8 = vld [vmem:[#allocation62_spill] sm:$0xff] }
0x118a   :  { %4527 = vmatprep.subr.bf16.mxu0 %v7253_v19  ;;  %4568 = vmatprep.subr.bf16.mxu1 %v7255_v2 }
0x118d   :  { %4528 = vmatpush1.bf16.msra.mxu0 %v7257_v49  ;;  %4569 = vmatpush1.bf16.msra.mxu1 %v7259_v10 }
0x118e   :  { %4529 = vmatprep.subr.bf16.mxu0 %v7265_v52  ;;  %4570 = vmatprep.subr.bf16.mxu1 %v7267_v61 }
0x1191   :  { %4530 = vmatpush1.bf16.msra.mxu0 %v7269_v16  ;;  %4571 = vmatpush1.bf16.msra.mxu1 %v7271_v17 }
0x1192   :  { %4531 = vmatprep.subr.bf16.mxu0 %v7277_v18  ;;  %4572 = vmatprep.subr.bf16.mxu1 %v7279_v20 }
0x1195   :  { %4532 = vmatpush1.bf16.msra.mxu0 %v7281_v24  ;;  %4573 = vmatpush1.bf16.msra.mxu1 %v7283_v25 }
0x1196   :  { %5300 = vmatprep.subr.bf16.mxu0 %v5520_v47 }
0x1238   :  { %v4249_v50 = vpop.f32.mrf.mxu0  ;;  %v4290_v55 = vpop.f32.mrf.mxu1 }
0x1239   :  { %v4297_v60 = vadd.f32 %v4249_v50, %v7593_v62  ;;  %v4299_v5 = vadd.f32 %v4290_v55, %v7595_v12 }
0x123a   :  { %v4251_v6 = vpop.f32.mrf.mxu0  ;;  %v4292_v53 = vpop.f32.mrf.mxu1 }
0x123b   :  { %v4301_v58 = vmul.f32 0.5, %v4297_v60  ;;  %v4298_v48 = vadd.f32 %v4251_v6, %v7594_v46  ;;  %v4300_v3 = vadd.f32 %v4292_v53, %v7596_v8 }
0x123c   :  { %v4253_v13 = vpop.f32.mrf.mxu0  ;;  %v4294_v11 = vpop.f32.mrf.mxu1 }
0x123d   :  { %5668 = vtanh.f32 %v4301_v58  ;;  %v4305_v1 = vmul.f32 0.5, %v4298_v48  ;;  %v4310_v19 = vmul.f32 0.5, %v4300_v3 }
0x123e   :  { %v4254_v56 = vpop.f32.mrf.mxu0  ;;  %v4295_v9 = vpop.f32.mrf.mxu1 }
0x123f   :  { %5670 = vtanh.f32 %v4305_v1 }
0x1240   :  { %5672 = vtanh.f32 %v4299_v5  ;;  %v5168_v5 = vld [vmem:[#allocation18] ss:$0 sm:$0xff] }
0x1241   :  { %5674 = vtanh.f32 %v4310_v19 }
0x124a   :  { %v5669_v2 = vpop.eup %5668 }
0x124b   :  { %v4303_v49 = vmul.f32 0.5, %v5669_v2 }
0x124c   :  { %v5671_v10 = vpop.eup %5670 }
0x124d   :  { %v4304_v52 = vadd.f32 0.5, %v4303_v49  ;;  %v4307_v61 = vmul.f32 0.5, %v5671_v10  ;;  %v5673_v16 = vpop.eup %5672 }
0x124e   :  { %v5675_v25 = vpop.eup %5674 }
0x124f   :  { %v4308_v17 = vadd.f32 0.5, %v4307_v61  ;;  %v4315_v18 = vmul.f32 %v5673_v16, %v4304_v52  ;;  %v4312_v40 = vmul.f32 0.5, %v5675_v25 }
0x1251   :  { %v4314_v20 = vmul.f32 %v4308_v17, %v7388_v57  ;;  %v4313_v26 = vadd.f32 0.5, %v4312_v40  ;;  %v7598_v57 = vld [vmem:[#allocation83_spill] sm:$0xff] }
0x1253   :  { %v7432_v24 = vadd.f32 %v4315_v18, %v4314_v20 }
0x1255   :  { %5676 = vtanh.f32 %v7432_v24 }
0x1262   :  { %v5677_v28 = vpop.eup %5676 }
0x1263   :  { %v7435_v29 = vmul.f32 %v5677_v28, %v4313_v26 }
0x1265   :  { %v4324_v30 = vpack.c.bf16 %v7435_v29, %v7435_v29 }
0x1267   :  { %4550 = vmatmul.mubr.bf16.vlgmr.msra.gmra.mxu0 %v4324_v30  ;;  %4591 = vmatmul.mubr.bf16.vlgmr.msra.gmra.mxu1 %v4324_v30 }
0x1268   :  { %5301 = vmatpush3.bf16.msra.mxu0 %v5520_v47  ;;  %5316 = vmatprep.mubr.bf16.mxu0 %v4630_v31 }
0x1269   :  { %5302 = vmatprep.subr.bf16.mxu0 %v5521_v36 }
0x126c   :  { %5303 = vmatpush3.bf16.msra.mxu0 %v5521_v36 }
0x126d   :  { %5304 = vmatprep.subr.bf16.mxu0 %v5522_v39 }
0x1270   :  { %5305 = vmatpush3.bf16.msra.mxu0 %v5522_v39 }
0x1271   :  { %5306 = vmatprep.subr.bf16.mxu0 %v5523_v14 }
0x1274   :  { %5307 = vmatpush3.bf16.msra.mxu0 %v5523_v14 }
0x1275   :  { %5308 = vmatprep.subr.bf16.mxu0 %v5524_v38 }
0x1278   :  { %5309 = vmatpush3.bf16.msra.mxu0 %v5524_v38 }
0x1279   :  { %5310 = vmatprep.subr.bf16.mxu0 %v5525_v22 }
0x127c   :  { %5311 = vmatpush3.bf16.msra.mxu0 %v5525_v22 }
0x127d   :  { %5312 = vmatprep.subr.bf16.mxu0 %v5526_v41 }
0x1280   :  { %5313 = vmatpush3.bf16.msra.mxu0 %v5526_v41 }
0x1281   :  { %5314 = vmatprep.subr.bf16.mxu0 %v5527_v51 }
0x1284   :  { %5315 = vmatpush3.bf16.msra.mxu0 %v5527_v51 }
0x1287   :  { %5317 = vmatmul.mubr.bf16.vlgmr.msra.gmra.mxu0 %v4631_v54 }
0x1288   :  { %5320 = vmatprep.mubr.bf16.mxu0 %v4632_v42 }
0x1327   :  { %v4551_v43 = vpop.f32.mrf.mxu0  ;;  %v4592_v7 = vpop.f32.mrf.mxu1 }
0x1328   :  { %v4599_v44 = vadd.f32 %v4551_v43, %v7597_v63  ;;  %v4601_v35 = vadd.f32 %v4592_v7, %v7599_v59 }
0x1329   :  { %v4553_v4 = vpop.f32.mrf.mxu0  ;;  %v4594_v27 = vpop.f32.mrf.mxu1 }
0x132a   :  { %v4603_v45 = vmul.f32 0.5, %v4599_v44  ;;  %v4600_v21 = vadd.f32 %v4553_v4, %v7598_v57  ;;  %v4602_v50 = vadd.f32 %v4594_v27, %v738_v33 }
0x132b   :  { %v4555_v23 = vpop.f32.mrf.mxu0  ;;  %v4596_v32 = vpop.f32.mrf.mxu1 }
0x132c   :  { %5678 = vtanh.f32 %v4603_v45  ;;  %v4607_v34 = vmul.f32 0.5, %v4600_v21  ;;  %v4612_v55 = vmul.f32 0.5, %v4602_v50 }
0x132d   :  { %v4556_v15 = vpop.f32.mrf.mxu0  ;;  %v4597_v47 = vpop.f32.mrf.mxu1 }
0x132e   :  { %5680 = vtanh.f32 %v4607_v34 }
0x132f   :  { %5682 = vtanh.f32 %v4601_v35 }
0x1330   :  { %5684 = vtanh.f32 %v4612_v55 }
0x1339   :  { %v5679_v62 = vpop.eup %5678 }
0x133a   :  { %v4605_v60 = vmul.f32 0.5, %v5679_v62 }
0x133b   :  { %v5681_v6 = vpop.eup %5680 }
0x133c   :  { %v4606_v53 = vadd.f32 0.5, %v4605_v60  ;;  %v4609_v58 = vmul.f32 0.5, %v5681_v6  ;;  %v5683_v46 = vpop.eup %5682 }
0x133d   :  { %v5685_v9 = vpop.eup %5684 }
0x133e   :  { %v4610_v48 = vadd.f32 0.5, %v4609_v58  ;;  %v4617_v13 = vmul.f32 %v5683_v46, %v4606_v53  ;;  %v4614_v19 = vmul.f32 0.5, %v5685_v9 }
0x1340   :  { %v4616_v11 = vmul.f32 %v4610_v48, %v7432_v24  ;;  %v4615_v52 = vadd.f32 0.5, %v4614_v19 }
0x1342   :  { %v4618_v12 = vadd.f32 %v4617_v13, %v4616_v11 }
0x1344   :  { %5686 = vtanh.f32 %v4618_v12 }
0x1347   :  { %v5318_v1 = vpop.f32.mrf.mxu0 }
0x1348   :  { %v4748_v56 = vadd.f32 %v5318_v1, %v5168_v5 }
0x1349   :  { %v4739_v37 = vpop.f32.mrf.mxu0 }
0x134a   :  { %4772 = vst [vmem:[#allocation19 + $0x10] sm:$0xff] %v4748_v56  ;;  %v4740_v8 = vadd.f32 %v5168_v5, %v4739_v37 }
0x134b   :  { %v5319_v3 = vpop.f32.mrf.mxu0 }
0x134c   :  { %4770 = vst [vmem:[#allocation19] sm:$0xff] %v4740_v8  ;;  %v4751_v2 = vadd.f32 %v5319_v3, %v5168_v5 }
0x134d   :  { %v4742_v49 = vpop.f32.mrf.mxu0 }
0x134e   :  { %4773 = vst [vmem:[#allocation19 + $0x18] sm:$0xff] %v4751_v2  ;;  %v4743_v10 = vadd.f32 %v5168_v5, %v4742_v49 }
0x1350   :  { %4771 = vst [vmem:[#allocation19 + $0x8] sm:$0xff] %v4743_v10 }
0x1351   :  { %v5687_v61 = vpop.eup %5686 }
0x1352   :  { %v4620_v16 = vmul.f32 %v5687_v61, %v4615_v52 }
0x1354   :  { %v4633_v17 = vpack.c.bf16 %v4620_v16, %v7435_v29 }
0x1356   :  { %5321 = vmatmul.mubr.bf16.gmra.mxu0 %v4633_v17 }
0x1357   :  { %5911 = shalt.err (!%p5908_p7)
}
0x1358   :  { %4799 = dma.vmem_to_hbm [thread:$0]  %s4797_s13, 128, %s7474_s16, [#allocation21]  }
0x1359   :  { %s5971_s17 = smov [#allocation19]  }
0x135a   :  { %s4783_s18 = sshll.u32 %s5971_s17, 4  ;;  %s4784_s18 = int_to_ptr.vmem [resolvable:$true] %s4783_s18 }
0x135b   :  { %s5920_s19 = scalar_lea.vmem %s4784_s18, 1024  ;;  %p5925_p9 = scmp.lt.s32.totalorder %s4784_s18, %s4784_s18 }
0x135c   :  { %p5921_p8 = scmp.ne.s32.totalorder %s4784_s18, %s5920_s19  ;;  %p5926_p10 = scmp.lt.s32.totalorder %s5920_s19, %s5920_s19 }
0x135e   :  { %p5927_p11 = por %p5926_p10, %p5925_p9 }
0x1360   :  { %p5928_p12 = pnand %p5927_p11, %p5921_p8 }
0x1416   :  { %v5322_v18 = vpop.f32.mrf.mxu0 }
0x1417   :  { %v4764_v20 = vadd.f32 %v5322_v18, %v5168_v5 }
0x1418   :  { %v4755_v24 = vpop.f32.mrf.mxu0 }
0x1419   :  { %4776 = vst [vmem:[#allocation19 + $0x30] sm:$0xff] %v4764_v20  ;;  %v4756_v25 = vadd.f32 %v5168_v5, %v4755_v24 }
0x141a   :  { %v5323_v40 = vpop.f32.mrf.mxu0 }
0x141b   :  { %4774 = vst [vmem:[#allocation19 + $0x20] sm:$0xff] %v4756_v25  ;;  %v4767_v26 = vadd.f32 %v5323_v40, %v5168_v5 }
0x141c   :  { %v4758_v28 = vpop.f32.mrf.mxu0 }
0x141d   :  { %4777 = vst [vmem:[#allocation19 + $0x38] sm:$0xff] %v4767_v26  ;;  %v4759_v29 = vadd.f32 %v5168_v5, %v4758_v28 }
0x141f   :  { %4775 = vst [vmem:[#allocation19 + $0x28] sm:$0xff] %v4759_v29 }
0x1420   :  { %5931 = shalt.err (!%p5928_p12)
}
0x1421   :  { %s5972_s16 = smov 128   ;;  %s5973_s11 = smov 8  }
0x1422   :  { %4789 = dma.vmem_to_hbm [thread:$0]  %s4784_s18, 1024, %s7473_s15, [#allocation6], %s5972_s16, %s5972_s16, %s5973_s11  }
0x1423   :  { %5950 = dma.done.wait [#allocation6], 1024  }
0x1424   :  { %5951 = vsyncadd [#allocation6], 4294966272 }
0x1425   :  { %5952 = dma.done.wait [#allocation21], 128  }
0x1426   :  { %5953 = vsyncadd [#allocation21], 4294967168 }
0x1427   :  { %4806 = vsyncpa [#allocation5], 1 }
0x1428   :  { %4807 = vsyncpa [#allocation8], 1 }
0x1429   :  { %4808 = vsyncpa [#allocation11], 1 }
0x142a   :  { %4809 = vsyncpa [#allocation14], 1 }
0x142b   :  { %4810 = vsyncpa [#allocation17], 1 }
0x142c   :  { %4811 = vsyncpa [#allocation6], 1 }
0x142d   :  { %4812 = vsyncpa [#allocation21], 1 }

</bundles_post_ra>
